<compile_context>
chip_gen: v7x
topology: tpu7x:2x2x1
jax: 0.10.0
libtpu: 0.0.40
codegen_flags: <defaults>
</compile_context>

<pallas_src>
import numpy as np
import jax
import jax.numpy as jnp
from jax import lax
from jax.experimental import pallas as pl
from jax.experimental.pallas import tpu as pltpu

# ----------------------------------------------------------------------------
# Configuration (mirrors KmerMulticlassCNN.__init__ at small, consistent sizes)
# ----------------------------------------------------------------------------
VOCAB         = 32
NUM_CHANNELS  = 2                        # conv groups
VEC_SIZES     = [12, 12]
MAX_SIZE      = max(VEC_SIZES)           # "W" of the embedded image
NUM_KMERS     = 20                       # "H" of the embedded image
NUM_CONVS     = 2
NUM_FCS       = 3
FC_SIZE       = 32
CONV_FEAT     = 8
CONV_FEATURES = CONV_FEAT * NUM_CHANNELS # 16 total conv output channels
CURR_CLASSES  = 5
POOL          = 2
KSIZE         = 3
BATCH         = 4
EPS           = 1e-5                     # BatchNorm eps (PyTorch default)

assert POOL == 2, "pooling selection matrices below are built for 2x2 / stride 2"


def _spatial_after_convs():
    h, w = NUM_KMERS, MAX_SIZE
    for _ in range(NUM_CONVS):
        h, w = h - (KSIZE - 1), w - (KSIZE - 1)                 # conv (pad=0,s=1,d=1)
        h, w = (h - POOL) // POOL + 1, (w - POOL) // POOL + 1   # max-pool
    return h, w


_FH, _FW = _spatial_after_convs()
FC_INPUT = _FH * _FW * CONV_FEATURES
FC_SIZES = [FC_INPUT] + [FC_SIZE if i == 0 else int(FC_SIZE / (2 * i))
                         for i in range(NUM_FCS - 1)] + [CURR_CLASSES]


# ----------------------------------------------------------------------------
# Host-side constant builders (all tiny; built once at init)
# ----------------------------------------------------------------------------
def _row_shift_mats(batch, h_in, h_out, k):
    """A[kh] @ X selects rows (b, oh+kh) from X whose rows are ordered (b, h)."""
    A = np.zeros((k, batch * h_out, batch * h_in), np.float32)
    r = np.arange(batch * h_out)
    b, oh = r // h_out, r % h_out
    for kh in range(k):
        A[kh, r, b * h_in + oh + kh] = 1.0
    return A


def _col_conv_mats(w, cin, w_in, w_out, groups, k):
    """M[kh][ci*w_in + ow + kw, co*w_out + ow] = w[co, ci_local, kh, kw] so that
    sum_kh (A[kh] @ X) @ M[kh] is the grouped 'valid' convolution when X has
    rows (b, h) and columns (cin, w)."""
    cout = w.shape[0]
    cpg_in, cpg_out = cin // groups, cout // groups
    M = np.zeros((k, cin * w_in, cout * w_out), np.float32)
    ow = np.arange(w_out)
    for kh in range(k):
        for kw in range(k):
            for co in range(cout):
                g = co // cpg_out
                for ci_loc in range(cpg_in):
                    ci = g * cpg_in + ci_loc
                    M[kh, ci * w_in + ow + kw, co * w_out + ow] += w[co, ci_loc, kh, kw]
    return M


def _pool_row_mats(batch, h_in, h_out):
    """R[0]/R[1] select conv rows 2*ph / 2*ph+1 (per batch block)."""
    R = np.zeros((2, batch * h_out, batch * h_in), np.float32)
    r = np.arange(batch * h_out)
    b, ph = r // h_out, r % h_out
    R[0, r, b * h_in + 2 * ph] = 1.0
    R[1, r, b * h_in + 2 * ph + 1] = 1.0
    return R


def _pool_col_mats(cout, w_in, w_out):
    """C[0]/C[1] select conv columns (co, 2*pw) / (co, 2*pw+1)."""
    C = np.zeros((2, cout * w_in, cout * w_out), np.float32)
    c = np.arange(cout * w_out)
    co, pw = c // w_out, c % w_out
    C[0, co * w_in + 2 * pw, c] = 1.0
    C[1, co * w_in + 2 * pw + 1, c] = 1.0
    return C


def _group_sum_mat(cout, w_out):
    """G[(co, pw), co] = 1: right-multiplying a (1, cout*w_out) row vector sums
    the w_out columns belonging to each channel (per-channel BN statistics)."""
    G = np.zeros((cout * w_out, cout), np.float32)
    cols = np.arange(cout * w_out)
    G[cols, cols // w_out] = 1.0
    return G


def _flatten_row_sel(batch, fh):
    """S[h][b, b*fh + h] = 1: selects spatial row h of every batch element."""
    S = np.zeros((fh, batch, batch * fh), np.float32)
    b = np.arange(batch)
    for hh in range(fh):
        S[hh, b, b * fh + hh] = 1.0
    return S


# ----------------------------------------------------------------------------
# In-kernel helpers (trace-time Python; only 2-D dots / elementwise / axis
# reductions / rsqrt reach Mosaic)
# ----------------------------------------------------------------------------
def _mm_f32(a, b):
    """Exact f32 matmul; used for the 0/1 gather / pooling / flatten selections."""
    return jnp.dot(a, b, preferred_element_type=jnp.float32)


def _mm_bf16(a, b_bf16):
    """bf16 x bf16 MXU matmul with f32 accumulation (weight-carrying matmuls)."""
    return jnp.dot(a.astype(jnp.bfloat16), b_bf16, preferred_element_type=jnp.float32)


def _bn1d_train(h, g_ref, b_ref):
    """nn.BatchNorm1d(1) in training mode: stats over every element of (B, feat)."""
    n = float(h.shape[0] * h.shape[1])
    s1 = jnp.sum(jnp.sum(h, axis=1, keepdims=True), axis=0, keepdims=True)
    s2 = jnp.sum(jnp.sum(h * h, axis=1, keepdims=True), axis=0, keepdims=True)
    mu = s1 / n
    var = s2 / n - mu * mu
    return (h - mu) * (g_ref[...] * lax.rsqrt(var + EPS)) + b_ref[...]


def _conv_block(x, refs):
    """Grouped Conv2d + bias + ReLU + 2x2 max-pool + training-mode BatchNorm2d.

    x: (B*H, Cin*W) f32, rows ordered (b, h), cols ordered (cin, w).  Returns
    (B*PH, Cout*PW) f32 in the same (row, col) convention, which is exactly
    what the next conv block / the flatten stage consumes.
    """
    a_ref, m_ref, brow_ref, r_ref, c_ref, g_ref, gt_ref, gam_ref, bet_ref = refs

    # 'valid' conv as sum over kh of (row-shift selection) @ x @ (banded weight)
    y = None
    for kh in range(KSIZE):
        t = _mm_f32(a_ref[kh], x)            # exact gather of rows (b, oh+kh)
        yk = _mm_bf16(t, m_ref[kh])          # kw taps x conv weights (block-diag groups)
        y = yk if y is None else y + yk
    y = jnp.maximum(y + brow_ref[...], 0.0)  # conv bias + ReLU    (B*OH, Cout*OW)

    # 2x2 / stride-2 max pool: exact row / column selections + elementwise max
    y = jnp.maximum(_mm_f32(r_ref[0], y), _mm_f32(r_ref[1], y))   # pool over H
    z = jnp.maximum(_mm_f32(y, c_ref[0]), _mm_f32(y, c_ref[1]))   # pool over W

    # BatchNorm2d (training): one-pass per-channel stats over (batch, H, W)
    n = float(z.shape[0] * (z.shape[1] // gam_ref.shape[1]))
    s1 = _mm_f32(jnp.sum(z, axis=0, keepdims=True), g_ref[...])        # (1, Cout)
    s2 = _mm_f32(jnp.sum(z * z, axis=0, keepdims=True), g_ref[...])    # (1, Cout)
    mu = s1 / n
    var = s2 / n - mu * mu
    scale = gam_ref[...] * lax.rsqrt(var + EPS)
    shift = bet_ref[...] - mu * scale
    return z * _mm_f32(scale, gt_ref[...]) + _mm_f32(shift, gt_ref[...])


def _kmer_cnn_kernel(*refs):
    """Whole KmerMulticlassCNN forward in a single Pallas program (grid=(1,))."""
    o_ref = refs[-1]
    it = iter(refs[:-1])
    idx_ref, emb_ref = next(it), next(it)

    # Embedding lookup as one-hot @ table (exact; runs on the MXU).
    idx = idx_ref[...]                                            # (B*H, 1) int32
    lane = lax.broadcasted_iota(jnp.int32, (idx.shape[0], VOCAB), 1)
    onehot = (idx == lane).astype(jnp.float32)                    # (B*H, VOCAB)
    x = _mm_f32(onehot, emb_ref[...])                             # rows (b,h), cols (chan,w)

    for _ in range(NUM_CONVS):
        x = _conv_block(x, [next(it) for _ in range(9)])

    # NCHW .view(B, 1, -1) flatten folded into the first Linear:
    #   fc1(x_flat) = sum_h (row-select_h @ x) @ W1_slice_h
    sel_ref, wf1_ref, b_ref = next(it), next(it), next(it)
    h = None
    for hh in range(_FH):
        part = _mm_bf16(_mm_f32(sel_ref[hh], x), wf1_ref[hh])
        h = part if h is None else h + part
    h = jnp.maximum(h + b_ref[...], 0.0)
    h = _bn1d_train(h, next(it), next(it))

    for i in range(1, NUM_FCS):
        w_ref, b_ref = next(it), next(it)
        h = _mm_bf16(h, w_ref[...]) + b_ref[...]
        if i < NUM_FCS - 1:
            h = jnp.maximum(h, 0.0)
            h = _bn1d_train(h, next(it), next(it))

    o_ref[...] = h.astype(o_ref.dtype)


# ----------------------------------------------------------------------------
# pallas_call wrapper
# ----------------------------------------------------------------------------
def _full_block_spec(a):
    nd = a.ndim
    return pl.BlockSpec(tuple(a.shape), lambda i, _nd=nd: (0,) * _nd)


def kmer_cnn_forward(kmers, kernel_args):
    """kmers: (NUM_KMERS, batch) int32 -- same convention as the PyTorch module."""
    bsz = kmers.shape[1]
    assert bsz == BATCH, "selection matrices were built for this batch size"
    idx = kmers.T.reshape(bsz * NUM_KMERS, 1).astype(jnp.int32)   # rows ordered (b, h)
    args = [idx] + list(kernel_args)
    out = pl.pallas_call(
        _kmer_cnn_kernel,
        out_shape=jax.ShapeDtypeStruct((bsz, CURR_CLASSES), jnp.float32),
        grid=(1,),
        in_specs=[_full_block_spec(a) for a in args],
        out_specs=pl.BlockSpec((bsz, CURR_CLASSES), lambda i: (0, 0)),
        compiler_params=pltpu.CompilerParams(dimension_semantics=("arbitrary",)),
    )(*args)
    return out.reshape(bsz, 1, CURR_CLASSES)


# ----------------------------------------------------------------------------
# Parameter initialization + packing into the kernel operand list
# ----------------------------------------------------------------------------
def _build_kernel_args(params):
    """Flatten all parameters into the ordered operand list the fused kernel
    consumes.  Weight-carrying matrices go in as bf16 (MXU-native); 0/1
    selection matrices, biases and BN affine terms stay f32."""
    f32, bf16 = jnp.float32, jnp.bfloat16
    args = []

    # embedding tables, concatenated along lanes: columns ordered (channel, w)
    emb = np.concatenate([np.asarray(t, np.float32) for t in params["emb_tables"]], axis=1)
    args.append(jnp.asarray(emb, f32))

    hcur, wcur, cin = NUM_KMERS, MAX_SIZE, NUM_CHANNELS
    for l in range(NUM_CONVS):
        oh, ow = hcur - (KSIZE - 1), wcur - (KSIZE - 1)
        ph, pw = (oh - POOL) // POOL + 1, (ow - POOL) // POOL + 1
        wt, bias, gamma, beta = [np.asarray(t, np.float32) for t in params["conv_torch"][l]]
        cout = wt.shape[0]
        A = _row_shift_mats(BATCH, hcur, oh, KSIZE)
        M = _col_conv_mats(wt, cin, wcur, ow, NUM_CHANNELS, KSIZE)
        brow = np.repeat(bias, ow)[None, :]
        R = _pool_row_mats(BATCH, oh, ph)
        C = _pool_col_mats(cout, ow, pw)
        G = _group_sum_mat(cout, pw)
        args += [jnp.asarray(A, f32), jnp.asarray(M, bf16), jnp.asarray(brow, f32),
                 jnp.asarray(R, f32), jnp.asarray(C, f32),
                 jnp.asarray(G, f32), jnp.asarray(G.T.copy(), f32),
                 jnp.asarray(gamma[None, :], f32), jnp.asarray(beta[None, :], f32)]
        hcur, wcur, cin = ph, pw, cout

    # FC stack; the NCHW flatten permutation is folded into fc1's weight slices
    fc1_w, fc1_b = [np.asarray(t, np.float32) for t in params["fc_torch"][0]]
    w4 = fc1_w.reshape(FC_SIZES[1], CONV_FEATURES, _FH, _FW)          # (out, C, H, W)
    Wf1 = np.stack([w4[:, :, hh, :].reshape(FC_SIZES[1], CONV_FEATURES * _FW).T
                    for hh in range(_FH)], axis=0)                    # (FH, C*W, out)
    args += [jnp.asarray(_flatten_row_sel(BATCH, _FH), f32),
             jnp.asarray(Wf1, bf16), jnp.asarray(fc1_b[None, :], f32)]
    g0, b0 = params["fc_bn_scalars"][0]
    args += [jnp.asarray(g0, f32).reshape(1, 1), jnp.asarray(b0, f32).reshape(1, 1)]

    for i in range(1, NUM_FCS):
        wi, bi = [np.asarray(t, np.float32) for t in params["fc_torch"][i]]
        args += [jnp.asarray(wi.T.copy(), bf16), jnp.asarray(bi[None, :], f32)]
        if i < NUM_FCS - 1:
            gi, bti = params["fc_bn_scalars"][i]
            args += [jnp.asarray(gi, f32).reshape(1, 1), jnp.asarray(bti, f32).reshape(1, 1)]
    return args


def init_params(key):
    keys = iter(jax.random.split(key, 64))
    params = {}

    # embeddings: replicate the module's slicing / zero-padding of `vecs`
    vecs = jax.random.normal(next(keys), (VOCAB, sum(VEC_SIZES)), jnp.float32) * 0.5
    tables = []
    start_pos = 0
    for i in range(NUM_CHANNELS):
        v = vecs[:, start_pos:start_pos + VEC_SIZES[i]]
        padded = jnp.zeros((VOCAB, MAX_SIZE), jnp.float32).at[:, :VEC_SIZES[i]].set(v)
        tables.append(padded)
        start_pos = VEC_SIZES[i]   # NOTE: mirrors the module's non-accumulating update
    params["emb_tables"] = tables

    # conv stack: Conv2d(groups=NUM_CHANNELS) + BatchNorm2d
    conv_torch = []
    cin = NUM_CHANNELS
    for _ in range(NUM_CONVS):
        cig = cin // NUM_CHANNELS
        w = jax.random.normal(next(keys), (CONV_FEATURES, cig, KSIZE, KSIZE), jnp.float32) * 0.2
        b = jax.random.normal(next(keys), (CONV_FEATURES,), jnp.float32) * 0.1
        g = 1.0 + 0.1 * jax.random.normal(next(keys), (CONV_FEATURES,), jnp.float32)
        bt = 0.1 * jax.random.normal(next(keys), (CONV_FEATURES,), jnp.float32)
        conv_torch.append((w, b, g, bt))
        cin = CONV_FEATURES
    params["conv_torch"] = conv_torch

    # fully connected stack + BatchNorm1d(1)
    fc_torch = []
    for i in range(NUM_FCS):
        fan_in, fan_out = FC_SIZES[i], FC_SIZES[i + 1]
        w = jax.random.normal(next(keys), (fan_out, fan_in), jnp.float32) / np.sqrt(fan_in)
        b = jax.random.normal(next(keys), (fan_out,), jnp.float32) * 0.1
        fc_torch.append((w, b))
    params["fc_torch"] = fc_torch

    fc_bn = []
    for _ in range(NUM_FCS - 1):
        g = 1.0 + 0.1 * jax.random.normal(next(keys), (), jnp.float32)
        bt = 0.1 * jax.random.normal(next(keys), (), jnp.float32)
        fc_bn.append((g, bt))
    params["fc_bn_scalars"] = fc_bn

    params["kernel_args"] = _build_kernel_args(params)
    return params


# ----------------------------------------------------------------------------
# Pure-JAX reference (module semantics, HIGHEST precision)
# ----------------------------------------------------------------------------
def reference_forward(kmers, params):
    hp = lax.Precision.HIGHEST
    kmers_t = kmers.T
    emb = [jnp.take(t, kmers_t, axis=0) for t in params["emb_tables"]]
    x = jnp.stack(emb, axis=1)                                    # (B, C, H, W)
    bsz = x.shape[0]
    for l in range(NUM_CONVS):
        w, b, g, bt = params["conv_torch"][l]
        y = lax.conv_general_dilated(
            x, w, window_strides=(1, 1), padding="VALID",
            dimension_numbers=("NCHW", "OIHW", "NCHW"),
            feature_group_count=NUM_CHANNELS, precision=hp)
        y = jnp.maximum(y + b[None, :, None, None], 0.0)
        y = lax.reduce_window(y, -jnp.inf, lax.max,
                              (1, 1, POOL, POOL), (1, 1, POOL, POOL), "VALID")
        mu = jnp.mean(y, axis=(0, 2, 3), keepdims=True)
        var = jnp.var(y, axis=(0, 2, 3), keepdims=True)
        x = (y - mu) / jnp.sqrt(var + EPS) * g[None, :, None, None] + bt[None, :, None, None]
    h = x.reshape(bsz, -1)
    for i in range(NUM_FCS - 1):
        w, b = params["fc_torch"][i]
        h = jnp.maximum(jnp.dot(h, w.T, precision=hp) + b, 0.0)
        g, bt = params["fc_bn_scalars"][i]
        h = (h - jnp.mean(h)) / jnp.sqrt(jnp.var(h) + EPS) * g + bt
    w, b = params["fc_torch"][-1]
    out = jnp.dot(h, w.T, precision=hp) + b
    return out.reshape(bsz, 1, CURR_CLASSES)


if __name__ == "__main__":
    key = jax.random.PRNGKey(0)
    pkey, dkey = jax.random.split(key)
    params = init_params(pkey)

    # Module input convention: (num_kmers, batch) integer kmer ids.
    kmers = jax.random.randint(dkey, (NUM_KMERS, BATCH), 0, VOCAB, dtype=jnp.int32)

    fwd = jax.jit(kmer_cnn_forward)
    out = jax.block_until_ready(fwd(kmers, params["kernel_args"]))
    assert out.shape == (BATCH, 1, CURR_CLASSES), out.shape

    ref = jax.block_until_ready(reference_forward(kmers, params))
    np.testing.assert_allclose(np.asarray(out), np.asarray(ref), rtol=5e-2, atol=5e-2)
    print("KERNEL_OK")
</pallas_src>

<mosaic_0001>
module attributes {stable_mosaic.version = 11 : i64} {
  func.func @_kmer_cnn_kernel(%arg0: i32, %arg1: memref<80x1xi32, #tpu.memory_space<vmem>>, %arg2: memref<32x24xf32, #tpu.memory_space<vmem>>, %arg3: memref<3x72x80xf32, #tpu.memory_space<vmem>>, %arg4: memref<3x24x160xbf16, #tpu.memory_space<vmem>>, %arg5: memref<1x160xf32, #tpu.memory_space<vmem>>, %arg6: memref<2x36x72xf32, #tpu.memory_space<vmem>>, %arg7: memref<2x160x80xf32, #tpu.memory_space<vmem>>, %arg8: memref<80x16xf32, #tpu.memory_space<vmem>>, %arg9: memref<16x80xf32, #tpu.memory_space<vmem>>, %arg10: memref<1x16xf32, #tpu.memory_space<vmem>>, %arg11: memref<1x16xf32, #tpu.memory_space<vmem>>, %arg12: memref<3x28x36xf32, #tpu.memory_space<vmem>>, %arg13: memref<3x80x48xbf16, #tpu.memory_space<vmem>>, %arg14: memref<1x48xf32, #tpu.memory_space<vmem>>, %arg15: memref<2x12x28xf32, #tpu.memory_space<vmem>>, %arg16: memref<2x48x16xf32, #tpu.memory_space<vmem>>, %arg17: memref<16x16xf32, #tpu.memory_space<vmem>>, %arg18: memref<16x16xf32, #tpu.memory_space<vmem>>, %arg19: memref<1x16xf32, #tpu.memory_space<vmem>>, %arg20: memref<1x16xf32, #tpu.memory_space<vmem>>, %arg21: memref<3x4x12xf32, #tpu.memory_space<vmem>>, %arg22: memref<3x16x32xbf16, #tpu.memory_space<vmem>>, %arg23: memref<1x32xf32, #tpu.memory_space<vmem>>, %arg24: memref<1x1xf32, #tpu.memory_space<vmem>>, %arg25: memref<1x1xf32, #tpu.memory_space<vmem>>, %arg26: memref<32x16xbf16, #tpu.memory_space<vmem>>, %arg27: memref<1x16xf32, #tpu.memory_space<vmem>>, %arg28: memref<1x1xf32, #tpu.memory_space<vmem>>, %arg29: memref<1x1xf32, #tpu.memory_space<vmem>>, %arg30: memref<16x5xbf16, #tpu.memory_space<vmem>>, %arg31: memref<1x5xf32, #tpu.memory_space<vmem>>, %arg32: memref<4x5xf32, #tpu.memory_space<vmem>>) attributes {dimension_semantics = [#tpu.dimension_semantics<arbitrary>], iteration_bounds = array<i64: 1>, scalar_prefetch = 0 : i64, scratch_operands = 0 : i64, tpu.core_type = #tpu.core_type<tc>, window_params = [{pipeline_mode = #tpu.pipeline_mode<synchronous>, transform_indices = @transform_0, window_bounds = array<i64: 80, 1>}, {pipeline_mode = #tpu.pipeline_mode<synchronous>, transform_indices = @transform_1, window_bounds = array<i64: 32, 24>}, {pipeline_mode = #tpu.pipeline_mode<synchronous>, transform_indices = @transform_2, window_bounds = array<i64: 3, 72, 80>}, {pipeline_mode = #tpu.pipeline_mode<synchronous>, transform_indices = @transform_3, window_bounds = array<i64: 3, 24, 160>}, {pipeline_mode = #tpu.pipeline_mode<synchronous>, transform_indices = @transform_4, window_bounds = array<i64: 1, 160>}, {pipeline_mode = #tpu.pipeline_mode<synchronous>, transform_indices = @transform_5, window_bounds = array<i64: 2, 36, 72>}, {pipeline_mode = #tpu.pipeline_mode<synchronous>, transform_indices = @transform_6, window_bounds = array<i64: 2, 160, 80>}, {pipeline_mode = #tpu.pipeline_mode<synchronous>, transform_indices = @transform_7, window_bounds = array<i64: 80, 16>}, {pipeline_mode = #tpu.pipeline_mode<synchronous>, transform_indices = @transform_8, window_bounds = array<i64: 16, 80>}, {pipeline_mode = #tpu.pipeline_mode<synchronous>, transform_indices = @transform_9, window_bounds = array<i64: 1, 16>}, {pipeline_mode = #tpu.pipeline_mode<synchronous>, transform_indices = @transform_10, window_bounds = array<i64: 1, 16>}, {pipeline_mode = #tpu.pipeline_mode<synchronous>, transform_indices = @transform_11, window_bounds = array<i64: 3, 28, 36>}, {pipeline_mode = #tpu.pipeline_mode<synchronous>, transform_indices = @transform_12, window_bounds = array<i64: 3, 80, 48>}, {pipeline_mode = #tpu.pipeline_mode<synchronous>, transform_indices = @transform_13, window_bounds = array<i64: 1, 48>}, {pipeline_mode = #tpu.pipeline_mode<synchronous>, transform_indices = @transform_14, window_bounds = array<i64: 2, 12, 28>}, {pipeline_mode = #tpu.pipeline_mode<synchronous>, transform_indices = @transform_15, window_bounds = array<i64: 2, 48, 16>}, {pipeline_mode = #tpu.pipeline_mode<synchronous>, transform_indices = @transform_16, window_bounds = array<i64: 16, 16>}, {pipeline_mode = #tpu.pipeline_mode<synchronous>, transform_indices = @transform_17, window_bounds = array<i64: 16, 16>}, {pipeline_mode = #tpu.pipeline_mode<synchronous>, transform_indices = @transform_18, window_bounds = array<i64: 1, 16>}, {pipeline_mode = #tpu.pipeline_mode<synchronous>, transform_indices = @transform_19, window_bounds = array<i64: 1, 16>}, {pipeline_mode = #tpu.pipeline_mode<synchronous>, transform_indices = @transform_20, window_bounds = array<i64: 3, 4, 12>}, {pipeline_mode = #tpu.pipeline_mode<synchronous>, transform_indices = @transform_21, window_bounds = array<i64: 3, 16, 32>}, {pipeline_mode = #tpu.pipeline_mode<synchronous>, transform_indices = @transform_22, window_bounds = array<i64: 1, 32>}, {pipeline_mode = #tpu.pipeline_mode<synchronous>, transform_indices = @transform_23, window_bounds = array<i64: 1, 1>}, {pipeline_mode = #tpu.pipeline_mode<synchronous>, transform_indices = @transform_24, window_bounds = array<i64: 1, 1>}, {pipeline_mode = #tpu.pipeline_mode<synchronous>, transform_indices = @transform_25, window_bounds = array<i64: 32, 16>}, {pipeline_mode = #tpu.pipeline_mode<synchronous>, transform_indices = @transform_26, window_bounds = array<i64: 1, 16>}, {pipeline_mode = #tpu.pipeline_mode<synchronous>, transform_indices = @transform_27, window_bounds = array<i64: 1, 1>}, {pipeline_mode = #tpu.pipeline_mode<synchronous>, transform_indices = @transform_28, window_bounds = array<i64: 1, 1>}, {pipeline_mode = #tpu.pipeline_mode<synchronous>, transform_indices = @transform_29, window_bounds = array<i64: 16, 5>}, {pipeline_mode = #tpu.pipeline_mode<synchronous>, transform_indices = @transform_30, window_bounds = array<i64: 1, 5>}, {pipeline_mode = #tpu.pipeline_mode<synchronous>, transform_indices = @transform_31, window_bounds = array<i64: 4, 5>}]} {
    %c0 = arith.constant 0 : index
    %c0_0 = arith.constant 0 : index
    %0 = vector.load %arg1[%c0, %c0_0] : memref<80x1xi32, #tpu.memory_space<vmem>>, vector<80x1xi32>
    %1 = tpu.iota {dimensions = array<i32: 1>} : vector<80x32xi32>
    %2 = vector.broadcast %0 : vector<80x1xi32> to vector<80x32xi32>
    %3 = arith.cmpi eq, %2, %1 : vector<80x32xi32>
    %4 = arith.extui %3 : vector<80x32xi1> to vector<80x32xi32>
    %5 = arith.sitofp %4 : vector<80x32xi32> to vector<80x32xf32>
    %c0_1 = arith.constant 0 : index
    %c0_2 = arith.constant 0 : index
    %6 = vector.load %arg2[%c0_1, %c0_2] : memref<32x24xf32, #tpu.memory_space<vmem>>, vector<32x24xf32>
    %cst = arith.constant dense<0.000000e+00> : vector<80x24xf32>
    %7 = tpu.matmul %5, %6, %cst {dimension_numbers = #tpu.dot_dimension_numbers<[1], [0], [0], [1], [0, 0, 1, 1], [], []>} : vector<80x32xf32>, vector<32x24xf32>, vector<80x24xf32> -> vector<80x24xf32>
    %c0_3 = arith.constant 0 : index
    %c0_4 = arith.constant 0 : index
    %c0_5 = arith.constant 0 : index
    %8 = vector.load %arg3[%c0_3, %c0_4, %c0_5] : memref<3x72x80xf32, #tpu.memory_space<vmem>>, vector<1x72x80xf32>
    %9 = vector.shape_cast %8 : vector<1x72x80xf32> to vector<72x80xf32>
    %cst_6 = arith.constant dense<0.000000e+00> : vector<72x24xf32>
    %10 = tpu.matmul %9, %7, %cst_6 {dimension_numbers = #tpu.dot_dimension_numbers<[1], [0], [0], [1], [0, 0, 1, 1], [], []>} : vector<72x80xf32>, vector<80x24xf32>, vector<72x24xf32> -> vector<72x24xf32>
    %c0_7 = arith.constant 0 : index
    %c0_8 = arith.constant 0 : index
    %c0_9 = arith.constant 0 : index
    %11 = vector.load %arg4[%c0_7, %c0_8, %c0_9] : memref<3x24x160xbf16, #tpu.memory_space<vmem>>, vector<1x24x160xbf16>
    %12 = vector.shape_cast %11 : vector<1x24x160xbf16> to vector<24x160xbf16>
    %13 = arith.truncf %10 : vector<72x24xf32> to vector<72x24xbf16>
    %cst_10 = arith.constant dense<0.000000e+00> : vector<72x160xf32>
    %14 = tpu.matmul %13, %12, %cst_10 {dimension_numbers = #tpu.dot_dimension_numbers<[1], [0], [0], [1], [0, 0, 1, 1], [], []>} : vector<72x24xbf16>, vector<24x160xbf16>, vector<72x160xf32> -> vector<72x160xf32>
    %c1 = arith.constant 1 : index
    %c0_11 = arith.constant 0 : index
    %c0_12 = arith.constant 0 : index
    %15 = vector.load %arg3[%c1, %c0_11, %c0_12] : memref<3x72x80xf32, #tpu.memory_space<vmem>>, vector<1x72x80xf32>
    %16 = vector.shape_cast %15 : vector<1x72x80xf32> to vector<72x80xf32>
    %cst_13 = arith.constant dense<0.000000e+00> : vector<72x24xf32>
    %17 = tpu.matmul %16, %7, %cst_13 {dimension_numbers = #tpu.dot_dimension_numbers<[1], [0], [0], [1], [0, 0, 1, 1], [], []>} : vector<72x80xf32>, vector<80x24xf32>, vector<72x24xf32> -> vector<72x24xf32>
    %c1_14 = arith.constant 1 : index
    %c0_15 = arith.constant 0 : index
    %c0_16 = arith.constant 0 : index
    %18 = vector.load %arg4[%c1_14, %c0_15, %c0_16] : memref<3x24x160xbf16, #tpu.memory_space<vmem>>, vector<1x24x160xbf16>
    %19 = vector.shape_cast %18 : vector<1x24x160xbf16> to vector<24x160xbf16>
    %20 = arith.truncf %17 : vector<72x24xf32> to vector<72x24xbf16>
    %cst_17 = arith.constant dense<0.000000e+00> : vector<72x160xf32>
    %21 = tpu.matmul %20, %19, %cst_17 {dimension_numbers = #tpu.dot_dimension_numbers<[1], [0], [0], [1], [0, 0, 1, 1], [], []>} : vector<72x24xbf16>, vector<24x160xbf16>, vector<72x160xf32> -> vector<72x160xf32>
    %22 = arith.addf %14, %21 : vector<72x160xf32>
    %c2 = arith.constant 2 : index
    %c0_18 = arith.constant 0 : index
    %c0_19 = arith.constant 0 : index
    %23 = vector.load %arg3[%c2, %c0_18, %c0_19] : memref<3x72x80xf32, #tpu.memory_space<vmem>>, vector<1x72x80xf32>
    %24 = vector.shape_cast %23 : vector<1x72x80xf32> to vector<72x80xf32>
    %cst_20 = arith.constant dense<0.000000e+00> : vector<72x24xf32>
    %25 = tpu.matmul %24, %7, %cst_20 {dimension_numbers = #tpu.dot_dimension_numbers<[1], [0], [0], [1], [0, 0, 1, 1], [], []>} : vector<72x80xf32>, vector<80x24xf32>, vector<72x24xf32> -> vector<72x24xf32>
    %c2_21 = arith.constant 2 : index
    %c0_22 = arith.constant 0 : index
    %c0_23 = arith.constant 0 : index
    %26 = vector.load %arg4[%c2_21, %c0_22, %c0_23] : memref<3x24x160xbf16, #tpu.memory_space<vmem>>, vector<1x24x160xbf16>
    %27 = vector.shape_cast %26 : vector<1x24x160xbf16> to vector<24x160xbf16>
    %28 = arith.truncf %25 : vector<72x24xf32> to vector<72x24xbf16>
    %cst_24 = arith.constant dense<0.000000e+00> : vector<72x160xf32>
    %29 = tpu.matmul %28, %27, %cst_24 {dimension_numbers = #tpu.dot_dimension_numbers<[1], [0], [0], [1], [0, 0, 1, 1], [], []>} : vector<72x24xbf16>, vector<24x160xbf16>, vector<72x160xf32> -> vector<72x160xf32>
    %30 = arith.addf %22, %29 : vector<72x160xf32>
    %c0_25 = arith.constant 0 : index
    %c0_26 = arith.constant 0 : index
    %31 = vector.load %arg5[%c0_25, %c0_26] : memref<1x160xf32, #tpu.memory_space<vmem>>, vector<1x160xf32>
    %32 = vector.broadcast %31 : vector<1x160xf32> to vector<72x160xf32>
    %33 = arith.addf %30, %32 : vector<72x160xf32>
    %cst_27 = arith.constant 0.000000e+00 : f32
    %34 = vector.broadcast %cst_27 : f32 to vector<72x160xf32>
    %35 = arith.maximumf %33, %34 : vector<72x160xf32>
    %c0_28 = arith.constant 0 : index
    %c0_29 = arith.constant 0 : index
    %c0_30 = arith.constant 0 : index
    %36 = vector.load %arg6[%c0_28, %c0_29, %c0_30] : memref<2x36x72xf32, #tpu.memory_space<vmem>>, vector<1x36x72xf32>
    %37 = vector.shape_cast %36 : vector<1x36x72xf32> to vector<36x72xf32>
    %cst_31 = arith.constant dense<0.000000e+00> : vector<36x160xf32>
    %38 = tpu.matmul %37, %35, %cst_31 {dimension_numbers = #tpu.dot_dimension_numbers<[1], [0], [0], [1], [0, 0, 1, 1], [], []>} : vector<36x72xf32>, vector<72x160xf32>, vector<36x160xf32> -> vector<36x160xf32>
    %c1_32 = arith.constant 1 : index
    %c0_33 = arith.constant 0 : index
    %c0_34 = arith.constant 0 : index
    %39 = vector.load %arg6[%c1_32, %c0_33, %c0_34] : memref<2x36x72xf32, #tpu.memory_space<vmem>>, vector<1x36x72xf32>
    %40 = vector.shape_cast %39 : vector<1x36x72xf32> to vector<36x72xf32>
    %cst_35 = arith.constant dense<0.000000e+00> : vector<36x160xf32>
    %41 = tpu.matmul %40, %35, %cst_35 {dimension_numbers = #tpu.dot_dimension_numbers<[1], [0], [0], [1], [0, 0, 1, 1], [], []>} : vector<36x72xf32>, vector<72x160xf32>, vector<36x160xf32> -> vector<36x160xf32>
    %42 = arith.maximumf %38, %41 : vector<36x160xf32>
    %c0_36 = arith.constant 0 : index
    %c0_37 = arith.constant 0 : index
    %c0_38 = arith.constant 0 : index
    %43 = vector.load %arg7[%c0_36, %c0_37, %c0_38] : memref<2x160x80xf32, #tpu.memory_space<vmem>>, vector<1x160x80xf32>
    %44 = vector.shape_cast %43 : vector<1x160x80xf32> to vector<160x80xf32>
    %cst_39 = arith.constant dense<0.000000e+00> : vector<36x80xf32>
    %45 = tpu.matmul %42, %44, %cst_39 {dimension_numbers = #tpu.dot_dimension_numbers<[1], [0], [0], [1], [0, 0, 1, 1], [], []>} : vector<36x160xf32>, vector<160x80xf32>, vector<36x80xf32> -> vector<36x80xf32>
    %c1_40 = arith.constant 1 : index
    %c0_41 = arith.constant 0 : index
    %c0_42 = arith.constant 0 : index
    %46 = vector.load %arg7[%c1_40, %c0_41, %c0_42] : memref<2x160x80xf32, #tpu.memory_space<vmem>>, vector<1x160x80xf32>
    %47 = vector.shape_cast %46 : vector<1x160x80xf32> to vector<160x80xf32>
    %cst_43 = arith.constant dense<0.000000e+00> : vector<36x80xf32>
    %48 = tpu.matmul %42, %47, %cst_43 {dimension_numbers = #tpu.dot_dimension_numbers<[1], [0], [0], [1], [0, 0, 1, 1], [], []>} : vector<36x160xf32>, vector<160x80xf32>, vector<36x80xf32> -> vector<36x80xf32>
    %49 = arith.maximumf %45, %48 : vector<36x80xf32>
    %cst_44 = arith.constant dense<0.000000e+00> : vector<80xf32>
    %50 = vector.multi_reduction <add>, %49, %cst_44 [0] : vector<36x80xf32> to vector<80xf32>
    %51 = vector.shape_cast %50 : vector<80xf32> to vector<1x80xf32>
    %c0_45 = arith.constant 0 : index
    %c0_46 = arith.constant 0 : index
    %52 = vector.load %arg8[%c0_45, %c0_46] : memref<80x16xf32, #tpu.memory_space<vmem>>, vector<80x16xf32>
    %cst_47 = arith.constant dense<0.000000e+00> : vector<1x16xf32>
    %53 = tpu.matmul %51, %52, %cst_47 {dimension_numbers = #tpu.dot_dimension_numbers<[1], [0], [0], [1], [0, 0, 1, 1], [], []>} : vector<1x80xf32>, vector<80x16xf32>, vector<1x16xf32> -> vector<1x16xf32>
    %54 = arith.mulf %49, %49 : vector<36x80xf32>
    %cst_48 = arith.constant dense<0.000000e+00> : vector<80xf32>
    %55 = vector.multi_reduction <add>, %54, %cst_48 [0] : vector<36x80xf32> to vector<80xf32>
    %56 = vector.shape_cast %55 : vector<80xf32> to vector<1x80xf32>
    %c0_49 = arith.constant 0 : index
    %c0_50 = arith.constant 0 : index
    %57 = vector.load %arg8[%c0_49, %c0_50] : memref<80x16xf32, #tpu.memory_space<vmem>>, vector<80x16xf32>
    %cst_51 = arith.constant dense<0.000000e+00> : vector<1x16xf32>
    %58 = tpu.matmul %56, %57, %cst_51 {dimension_numbers = #tpu.dot_dimension_numbers<[1], [0], [0], [1], [0, 0, 1, 1], [], []>} : vector<1x80xf32>, vector<80x16xf32>, vector<1x16xf32> -> vector<1x16xf32>
    %cst_52 = arith.constant 1.800000e+02 : f32
    %59 = vector.broadcast %cst_52 : f32 to vector<1x16xf32>
    %60 = arith.divf %53, %59 : vector<1x16xf32>
    %cst_53 = arith.constant 1.800000e+02 : f32
    %61 = vector.broadcast %cst_53 : f32 to vector<1x16xf32>
    %62 = arith.divf %58, %61 : vector<1x16xf32>
    %63 = arith.mulf %60, %60 : vector<1x16xf32>
    %64 = arith.subf %62, %63 : vector<1x16xf32>
    %c0_54 = arith.constant 0 : index
    %c0_55 = arith.constant 0 : index
    %65 = vector.load %arg10[%c0_54, %c0_55] : memref<1x16xf32, #tpu.memory_space<vmem>>, vector<1x16xf32>
    %cst_56 = arith.constant 9.99999974E-6 : f32
    %66 = vector.broadcast %cst_56 : f32 to vector<1x16xf32>
    %67 = arith.addf %64, %66 : vector<1x16xf32>
    %68 = math.rsqrt %67 : vector<1x16xf32>
    %69 = arith.mulf %65, %68 : vector<1x16xf32>
    %c0_57 = arith.constant 0 : index
    %c0_58 = arith.constant 0 : index
    %70 = vector.load %arg11[%c0_57, %c0_58] : memref<1x16xf32, #tpu.memory_space<vmem>>, vector<1x16xf32>
    %71 = arith.mulf %60, %69 : vector<1x16xf32>
    %72 = arith.subf %70, %71 : vector<1x16xf32>
    %c0_59 = arith.constant 0 : index
    %c0_60 = arith.constant 0 : index
    %73 = vector.load %arg9[%c0_59, %c0_60] : memref<16x80xf32, #tpu.memory_space<vmem>>, vector<16x80xf32>
    %cst_61 = arith.constant dense<0.000000e+00> : vector<1x80xf32>
    %74 = tpu.matmul %69, %73, %cst_61 {dimension_numbers = #tpu.dot_dimension_numbers<[1], [0], [0], [1], [0, 0, 1, 1], [], []>} : vector<1x16xf32>, vector<16x80xf32>, vector<1x80xf32> -> vector<1x80xf32>
    %75 = vector.broadcast %74 : vector<1x80xf32> to vector<36x80xf32>
    %76 = arith.mulf %49, %75 : vector<36x80xf32>
    %c0_62 = arith.constant 0 : index
    %c0_63 = arith.constant 0 : index
    %77 = vector.load %arg9[%c0_62, %c0_63] : memref<16x80xf32, #tpu.memory_space<vmem>>, vector<16x80xf32>
    %cst_64 = arith.constant dense<0.000000e+00> : vector<1x80xf32>
    %78 = tpu.matmul %72, %77, %cst_64 {dimension_numbers = #tpu.dot_dimension_numbers<[1], [0], [0], [1], [0, 0, 1, 1], [], []>} : vector<1x16xf32>, vector<16x80xf32>, vector<1x80xf32> -> vector<1x80xf32>
    %79 = vector.broadcast %78 : vector<1x80xf32> to vector<36x80xf32>
    %80 = arith.addf %76, %79 : vector<36x80xf32>
    %c0_65 = arith.constant 0 : index
    %c0_66 = arith.constant 0 : index
    %c0_67 = arith.constant 0 : index
    %81 = vector.load %arg12[%c0_65, %c0_66, %c0_67] : memref<3x28x36xf32, #tpu.memory_space<vmem>>, vector<1x28x36xf32>
    %82 = vector.shape_cast %81 : vector<1x28x36xf32> to vector<28x36xf32>
    %cst_68 = arith.constant dense<0.000000e+00> : vector<28x80xf32>
    %83 = tpu.matmul %82, %80, %cst_68 {dimension_numbers = #tpu.dot_dimension_numbers<[1], [0], [0], [1], [0, 0, 1, 1], [], []>} : vector<28x36xf32>, vector<36x80xf32>, vector<28x80xf32> -> vector<28x80xf32>
    %c0_69 = arith.constant 0 : index
    %c0_70 = arith.constant 0 : index
    %c0_71 = arith.constant 0 : index
    %84 = vector.load %arg13[%c0_69, %c0_70, %c0_71] : memref<3x80x48xbf16, #tpu.memory_space<vmem>>, vector<1x80x48xbf16>
    %85 = vector.shape_cast %84 : vector<1x80x48xbf16> to vector<80x48xbf16>
    %86 = arith.truncf %83 : vector<28x80xf32> to vector<28x80xbf16>
    %cst_72 = arith.constant dense<0.000000e+00> : vector<28x48xf32>
    %87 = tpu.matmul %86, %85, %cst_72 {dimension_numbers = #tpu.dot_dimension_numbers<[1], [0], [0], [1], [0, 0, 1, 1], [], []>} : vector<28x80xbf16>, vector<80x48xbf16>, vector<28x48xf32> -> vector<28x48xf32>
    %c1_73 = arith.constant 1 : index
    %c0_74 = arith.constant 0 : index
    %c0_75 = arith.constant 0 : index
    %88 = vector.load %arg12[%c1_73, %c0_74, %c0_75] : memref<3x28x36xf32, #tpu.memory_space<vmem>>, vector<1x28x36xf32>
    %89 = vector.shape_cast %88 : vector<1x28x36xf32> to vector<28x36xf32>
    %cst_76 = arith.constant dense<0.000000e+00> : vector<28x80xf32>
    %90 = tpu.matmul %89, %80, %cst_76 {dimension_numbers = #tpu.dot_dimension_numbers<[1], [0], [0], [1], [0, 0, 1, 1], [], []>} : vector<28x36xf32>, vector<36x80xf32>, vector<28x80xf32> -> vector<28x80xf32>
    %c1_77 = arith.constant 1 : index
    %c0_78 = arith.constant 0 : index
    %c0_79 = arith.constant 0 : index
    %91 = vector.load %arg13[%c1_77, %c0_78, %c0_79] : memref<3x80x48xbf16, #tpu.memory_space<vmem>>, vector<1x80x48xbf16>
    %92 = vector.shape_cast %91 : vector<1x80x48xbf16> to vector<80x48xbf16>
    %93 = arith.truncf %90 : vector<28x80xf32> to vector<28x80xbf16>
    %cst_80 = arith.constant dense<0.000000e+00> : vector<28x48xf32>
    %94 = tpu.matmul %93, %92, %cst_80 {dimension_numbers = #tpu.dot_dimension_numbers<[1], [0], [0], [1], [0, 0, 1, 1], [], []>} : vector<28x80xbf16>, vector<80x48xbf16>, vector<28x48xf32> -> vector<28x48xf32>
    %95 = arith.addf %87, %94 : vector<28x48xf32>
    %c2_81 = arith.constant 2 : index
    %c0_82 = arith.constant 0 : index
    %c0_83 = arith.constant 0 : index
    %96 = vector.load %arg12[%c2_81, %c0_82, %c0_83] : memref<3x28x36xf32, #tpu.memory_space<vmem>>, vector<1x28x36xf32>
    %97 = vector.shape_cast %96 : vector<1x28x36xf32> to vector<28x36xf32>
    %cst_84 = arith.constant dense<0.000000e+00> : vector<28x80xf32>
    %98 = tpu.matmul %97, %80, %cst_84 {dimension_numbers = #tpu.dot_dimension_numbers<[1], [0], [0], [1], [0, 0, 1, 1], [], []>} : vector<28x36xf32>, vector<36x80xf32>, vector<28x80xf32> -> vector<28x80xf32>
    %c2_85 = arith.constant 2 : index
    %c0_86 = arith.constant 0 : index
    %c0_87 = arith.constant 0 : index
    %99 = vector.load %arg13[%c2_85, %c0_86, %c0_87] : memref<3x80x48xbf16, #tpu.memory_space<vmem>>, vector<1x80x48xbf16>
    %100 = vector.shape_cast %99 : vector<1x80x48xbf16> to vector<80x48xbf16>
    %101 = arith.truncf %98 : vector<28x80xf32> to vector<28x80xbf16>
    %cst_88 = arith.constant dense<0.000000e+00> : vector<28x48xf32>
    %102 = tpu.matmul %101, %100, %cst_88 {dimension_numbers = #tpu.dot_dimension_numbers<[1], [0], [0], [1], [0, 0, 1, 1], [], []>} : vector<28x80xbf16>, vector<80x48xbf16>, vector<28x48xf32> -> vector<28x48xf32>
    %103 = arith.addf %95, %102 : vector<28x48xf32>
    %c0_89 = arith.constant 0 : index
    %c0_90 = arith.constant 0 : index
    %104 = vector.load %arg14[%c0_89, %c0_90] : memref<1x48xf32, #tpu.memory_space<vmem>>, vector<1x48xf32>
    %105 = vector.broadcast %104 : vector<1x48xf32> to vector<28x48xf32>
    %106 = arith.addf %103, %105 : vector<28x48xf32>
    %cst_91 = arith.constant 0.000000e+00 : f32
    %107 = vector.broadcast %cst_91 : f32 to vector<28x48xf32>
    %108 = arith.maximumf %106, %107 : vector<28x48xf32>
    %c0_92 = arith.constant 0 : index
    %c0_93 = arith.constant 0 : index
    %c0_94 = arith.constant 0 : index
    %109 = vector.load %arg15[%c0_92, %c0_93, %c0_94] : memref<2x12x28xf32, #tpu.memory_space<vmem>>, vector<1x12x28xf32>
    %110 = vector.shape_cast %109 : vector<1x12x28xf32> to vector<12x28xf32>
    %cst_95 = arith.constant dense<0.000000e+00> : vector<12x48xf32>
    %111 = tpu.matmul %110, %108, %cst_95 {dimension_numbers = #tpu.dot_dimension_numbers<[1], [0], [0], [1], [0, 0, 1, 1], [], []>} : vector<12x28xf32>, vector<28x48xf32>, vector<12x48xf32> -> vector<12x48xf32>
    %c1_96 = arith.constant 1 : index
    %c0_97 = arith.constant 0 : index
    %c0_98 = arith.constant 0 : index
    %112 = vector.load %arg15[%c1_96, %c0_97, %c0_98] : memref<2x12x28xf32, #tpu.memory_space<vmem>>, vector<1x12x28xf32>
    %113 = vector.shape_cast %112 : vector<1x12x28xf32> to vector<12x28xf32>
    %cst_99 = arith.constant dense<0.000000e+00> : vector<12x48xf32>
    %114 = tpu.matmul %113, %108, %cst_99 {dimension_numbers = #tpu.dot_dimension_numbers<[1], [0], [0], [1], [0, 0, 1, 1], [], []>} : vector<12x28xf32>, vector<28x48xf32>, vector<12x48xf32> -> vector<12x48xf32>
    %115 = arith.maximumf %111, %114 : vector<12x48xf32>
    %c0_100 = arith.constant 0 : index
    %c0_101 = arith.constant 0 : index
    %c0_102 = arith.constant 0 : index
    %116 = vector.load %arg16[%c0_100, %c0_101, %c0_102] : memref<2x48x16xf32, #tpu.memory_space<vmem>>, vector<1x48x16xf32>
    %117 = vector.shape_cast %116 : vector<1x48x16xf32> to vector<48x16xf32>
    %cst_103 = arith.constant dense<0.000000e+00> : vector<12x16xf32>
    %118 = tpu.matmul %115, %117, %cst_103 {dimension_numbers = #tpu.dot_dimension_numbers<[1], [0], [0], [1], [0, 0, 1, 1], [], []>} : vector<12x48xf32>, vector<48x16xf32>, vector<12x16xf32> -> vector<12x16xf32>
    %c1_104 = arith.constant 1 : index
    %c0_105 = arith.constant 0 : index
    %c0_106 = arith.constant 0 : index
    %119 = vector.load %arg16[%c1_104, %c0_105, %c0_106] : memref<2x48x16xf32, #tpu.memory_space<vmem>>, vector<1x48x16xf32>
    %120 = vector.shape_cast %119 : vector<1x48x16xf32> to vector<48x16xf32>
    %cst_107 = arith.constant dense<0.000000e+00> : vector<12x16xf32>
    %121 = tpu.matmul %115, %120, %cst_107 {dimension_numbers = #tpu.dot_dimension_numbers<[1], [0], [0], [1], [0, 0, 1, 1], [], []>} : vector<12x48xf32>, vector<48x16xf32>, vector<12x16xf32> -> vector<12x16xf32>
    %122 = arith.maximumf %118, %121 : vector<12x16xf32>
    %cst_108 = arith.constant dense<0.000000e+00> : vector<16xf32>
    %123 = vector.multi_reduction <add>, %122, %cst_108 [0] : vector<12x16xf32> to vector<16xf32>
    %124 = vector.shape_cast %123 : vector<16xf32> to vector<1x16xf32>
    %c0_109 = arith.constant 0 : index
    %c0_110 = arith.constant 0 : index
    %125 = vector.load %arg17[%c0_109, %c0_110] : memref<16x16xf32, #tpu.memory_space<vmem>>, vector<16x16xf32>
    %cst_111 = arith.constant dense<0.000000e+00> : vector<1x16xf32>
    %126 = tpu.matmul %124, %125, %cst_111 {dimension_numbers = #tpu.dot_dimension_numbers<[1], [0], [0], [1], [0, 0, 1, 1], [], []>} : vector<1x16xf32>, vector<16x16xf32>, vector<1x16xf32> -> vector<1x16xf32>
    %127 = arith.mulf %122, %122 : vector<12x16xf32>
    %cst_112 = arith.constant dense<0.000000e+00> : vector<16xf32>
    %128 = vector.multi_reduction <add>, %127, %cst_112 [0] : vector<12x16xf32> to vector<16xf32>
    %129 = vector.shape_cast %128 : vector<16xf32> to vector<1x16xf32>
    %c0_113 = arith.constant 0 : index
    %c0_114 = arith.constant 0 : index
    %130 = vector.load %arg17[%c0_113, %c0_114] : memref<16x16xf32, #tpu.memory_space<vmem>>, vector<16x16xf32>
    %cst_115 = arith.constant dense<0.000000e+00> : vector<1x16xf32>
    %131 = tpu.matmul %129, %130, %cst_115 {dimension_numbers = #tpu.dot_dimension_numbers<[1], [0], [0], [1], [0, 0, 1, 1], [], []>} : vector<1x16xf32>, vector<16x16xf32>, vector<1x16xf32> -> vector<1x16xf32>
    %cst_116 = arith.constant 1.200000e+01 : f32
    %132 = vector.broadcast %cst_116 : f32 to vector<1x16xf32>
    %133 = arith.divf %126, %132 : vector<1x16xf32>
    %cst_117 = arith.constant 1.200000e+01 : f32
    %134 = vector.broadcast %cst_117 : f32 to vector<1x16xf32>
    %135 = arith.divf %131, %134 : vector<1x16xf32>
    %136 = arith.mulf %133, %133 : vector<1x16xf32>
    %137 = arith.subf %135, %136 : vector<1x16xf32>
    %c0_118 = arith.constant 0 : index
    %c0_119 = arith.constant 0 : index
    %138 = vector.load %arg19[%c0_118, %c0_119] : memref<1x16xf32, #tpu.memory_space<vmem>>, vector<1x16xf32>
    %cst_120 = arith.constant 9.99999974E-6 : f32
    %139 = vector.broadcast %cst_120 : f32 to vector<1x16xf32>
    %140 = arith.addf %137, %139 : vector<1x16xf32>
    %141 = math.rsqrt %140 : vector<1x16xf32>
    %142 = arith.mulf %138, %141 : vector<1x16xf32>
    %c0_121 = arith.constant 0 : index
    %c0_122 = arith.constant 0 : index
    %143 = vector.load %arg20[%c0_121, %c0_122] : memref<1x16xf32, #tpu.memory_space<vmem>>, vector<1x16xf32>
    %144 = arith.mulf %133, %142 : vector<1x16xf32>
    %145 = arith.subf %143, %144 : vector<1x16xf32>
    %c0_123 = arith.constant 0 : index
    %c0_124 = arith.constant 0 : index
    %146 = vector.load %arg18[%c0_123, %c0_124] : memref<16x16xf32, #tpu.memory_space<vmem>>, vector<16x16xf32>
    %cst_125 = arith.constant dense<0.000000e+00> : vector<1x16xf32>
    %147 = tpu.matmul %142, %146, %cst_125 {dimension_numbers = #tpu.dot_dimension_numbers<[1], [0], [0], [1], [0, 0, 1, 1], [], []>} : vector<1x16xf32>, vector<16x16xf32>, vector<1x16xf32> -> vector<1x16xf32>
    %148 = vector.broadcast %147 : vector<1x16xf32> to vector<12x16xf32>
    %149 = arith.mulf %122, %148 : vector<12x16xf32>
    %c0_126 = arith.constant 0 : index
    %c0_127 = arith.constant 0 : index
    %150 = vector.load %arg18[%c0_126, %c0_127] : memref<16x16xf32, #tpu.memory_space<vmem>>, vector<16x16xf32>
    %cst_128 = arith.constant dense<0.000000e+00> : vector<1x16xf32>
    %151 = tpu.matmul %145, %150, %cst_128 {dimension_numbers = #tpu.dot_dimension_numbers<[1], [0], [0], [1], [0, 0, 1, 1], [], []>} : vector<1x16xf32>, vector<16x16xf32>, vector<1x16xf32> -> vector<1x16xf32>
    %152 = vector.broadcast %151 : vector<1x16xf32> to vector<12x16xf32>
    %153 = arith.addf %149, %152 : vector<12x16xf32>
    %c0_129 = arith.constant 0 : index
    %c0_130 = arith.constant 0 : index
    %c0_131 = arith.constant 0 : index
    %154 = vector.load %arg21[%c0_129, %c0_130, %c0_131] : memref<3x4x12xf32, #tpu.memory_space<vmem>>, vector<1x4x12xf32>
    %155 = vector.shape_cast %154 : vector<1x4x12xf32> to vector<4x12xf32>
    %cst_132 = arith.constant dense<0.000000e+00> : vector<4x16xf32>
    %156 = tpu.matmul %155, %153, %cst_132 {dimension_numbers = #tpu.dot_dimension_numbers<[1], [0], [0], [1], [0, 0, 1, 1], [], []>} : vector<4x12xf32>, vector<12x16xf32>, vector<4x16xf32> -> vector<4x16xf32>
    %c0_133 = arith.constant 0 : index
    %c0_134 = arith.constant 0 : index
    %c0_135 = arith.constant 0 : index
    %157 = vector.load %arg22[%c0_133, %c0_134, %c0_135] : memref<3x16x32xbf16, #tpu.memory_space<vmem>>, vector<1x16x32xbf16>
    %158 = vector.shape_cast %157 : vector<1x16x32xbf16> to vector<16x32xbf16>
    %159 = arith.truncf %156 : vector<4x16xf32> to vector<4x16xbf16>
    %cst_136 = arith.constant dense<0.000000e+00> : vector<4x32xf32>
    %160 = tpu.matmul %159, %158, %cst_136 {dimension_numbers = #tpu.dot_dimension_numbers<[1], [0], [0], [1], [0, 0, 1, 1], [], []>} : vector<4x16xbf16>, vector<16x32xbf16>, vector<4x32xf32> -> vector<4x32xf32>
    %c1_137 = arith.constant 1 : index
    %c0_138 = arith.constant 0 : index
    %c0_139 = arith.constant 0 : index
    %161 = vector.load %arg21[%c1_137, %c0_138, %c0_139] : memref<3x4x12xf32, #tpu.memory_space<vmem>>, vector<1x4x12xf32>
    %162 = vector.shape_cast %161 : vector<1x4x12xf32> to vector<4x12xf32>
    %cst_140 = arith.constant dense<0.000000e+00> : vector<4x16xf32>
    %163 = tpu.matmul %162, %153, %cst_140 {dimension_numbers = #tpu.dot_dimension_numbers<[1], [0], [0], [1], [0, 0, 1, 1], [], []>} : vector<4x12xf32>, vector<12x16xf32>, vector<4x16xf32> -> vector<4x16xf32>
    %c1_141 = arith.constant 1 : index
    %c0_142 = arith.constant 0 : index
    %c0_143 = arith.constant 0 : index
    %164 = vector.load %arg22[%c1_141, %c0_142, %c0_143] : memref<3x16x32xbf16, #tpu.memory_space<vmem>>, vector<1x16x32xbf16>
    %165 = vector.shape_cast %164 : vector<1x16x32xbf16> to vector<16x32xbf16>
    %166 = arith.truncf %163 : vector<4x16xf32> to vector<4x16xbf16>
    %cst_144 = arith.constant dense<0.000000e+00> : vector<4x32xf32>
    %167 = tpu.matmul %166, %165, %cst_144 {dimension_numbers = #tpu.dot_dimension_numbers<[1], [0], [0], [1], [0, 0, 1, 1], [], []>} : vector<4x16xbf16>, vector<16x32xbf16>, vector<4x32xf32> -> vector<4x32xf32>
    %168 = arith.addf %160, %167 : vector<4x32xf32>
    %c2_145 = arith.constant 2 : index
    %c0_146 = arith.constant 0 : index
    %c0_147 = arith.constant 0 : index
    %169 = vector.load %arg21[%c2_145, %c0_146, %c0_147] : memref<3x4x12xf32, #tpu.memory_space<vmem>>, vector<1x4x12xf32>
    %170 = vector.shape_cast %169 : vector<1x4x12xf32> to vector<4x12xf32>
    %cst_148 = arith.constant dense<0.000000e+00> : vector<4x16xf32>
    %171 = tpu.matmul %170, %153, %cst_148 {dimension_numbers = #tpu.dot_dimension_numbers<[1], [0], [0], [1], [0, 0, 1, 1], [], []>} : vector<4x12xf32>, vector<12x16xf32>, vector<4x16xf32> -> vector<4x16xf32>
    %c2_149 = arith.constant 2 : index
    %c0_150 = arith.constant 0 : index
    %c0_151 = arith.constant 0 : index
    %172 = vector.load %arg22[%c2_149, %c0_150, %c0_151] : memref<3x16x32xbf16, #tpu.memory_space<vmem>>, vector<1x16x32xbf16>
    %173 = vector.shape_cast %172 : vector<1x16x32xbf16> to vector<16x32xbf16>
    %174 = arith.truncf %171 : vector<4x16xf32> to vector<4x16xbf16>
    %cst_152 = arith.constant dense<0.000000e+00> : vector<4x32xf32>
    %175 = tpu.matmul %174, %173, %cst_152 {dimension_numbers = #tpu.dot_dimension_numbers<[1], [0], [0], [1], [0, 0, 1, 1], [], []>} : vector<4x16xbf16>, vector<16x32xbf16>, vector<4x32xf32> -> vector<4x32xf32>
    %176 = arith.addf %168, %175 : vector<4x32xf32>
    %c0_153 = arith.constant 0 : index
    %c0_154 = arith.constant 0 : index
    %177 = vector.load %arg23[%c0_153, %c0_154] : memref<1x32xf32, #tpu.memory_space<vmem>>, vector<1x32xf32>
    %178 = vector.broadcast %177 : vector<1x32xf32> to vector<4x32xf32>
    %179 = arith.addf %176, %178 : vector<4x32xf32>
    %cst_155 = arith.constant 0.000000e+00 : f32
    %180 = vector.broadcast %cst_155 : f32 to vector<4x32xf32>
    %181 = arith.maximumf %179, %180 : vector<4x32xf32>
    %cst_156 = arith.constant dense<0.000000e+00> : vector<4xf32>
    %182 = vector.multi_reduction <add>, %181, %cst_156 [1] : vector<4x32xf32> to vector<4xf32>
    %183 = vector.shape_cast %182 : vector<4xf32> to vector<4x1xf32>
    %cst_157 = arith.constant dense<0.000000e+00> : vector<1xf32>
    %184 = vector.multi_reduction <add>, %183, %cst_157 [0] : vector<4x1xf32> to vector<1xf32>
    %185 = vector.shape_cast %184 : vector<1xf32> to vector<1x1xf32>
    %186 = arith.mulf %181, %181 : vector<4x32xf32>
    %cst_158 = arith.constant dense<0.000000e+00> : vector<4xf32>
    %187 = vector.multi_reduction <add>, %186, %cst_158 [1] : vector<4x32xf32> to vector<4xf32>
    %188 = vector.shape_cast %187 : vector<4xf32> to vector<4x1xf32>
    %cst_159 = arith.constant dense<0.000000e+00> : vector<1xf32>
    %189 = vector.multi_reduction <add>, %188, %cst_159 [0] : vector<4x1xf32> to vector<1xf32>
    %190 = vector.shape_cast %189 : vector<1xf32> to vector<1x1xf32>
    %cst_160 = arith.constant 1.280000e+02 : f32
    %191 = vector.broadcast %cst_160 : f32 to vector<1x1xf32>
    %192 = arith.divf %185, %191 : vector<1x1xf32>
    %cst_161 = arith.constant 1.280000e+02 : f32
    %193 = vector.broadcast %cst_161 : f32 to vector<1x1xf32>
    %194 = arith.divf %190, %193 : vector<1x1xf32>
    %195 = arith.mulf %192, %192 : vector<1x1xf32>
    %196 = arith.subf %194, %195 : vector<1x1xf32>
    %197 = vector.broadcast %192 : vector<1x1xf32> to vector<4x32xf32>
    %198 = arith.subf %181, %197 : vector<4x32xf32>
    %c0_162 = arith.constant 0 : index
    %c0_163 = arith.constant 0 : index
    %199 = vector.load %arg24[%c0_162, %c0_163] : memref<1x1xf32, #tpu.memory_space<vmem>>, vector<1x1xf32>
    %cst_164 = arith.constant 9.99999974E-6 : f32
    %200 = vector.broadcast %cst_164 : f32 to vector<1x1xf32>
    %201 = arith.addf %196, %200 : vector<1x1xf32>
    %202 = math.rsqrt %201 : vector<1x1xf32>
    %203 = arith.mulf %199, %202 : vector<1x1xf32>
    %204 = vector.broadcast %203 : vector<1x1xf32> to vector<4x32xf32>
    %205 = arith.mulf %198, %204 : vector<4x32xf32>
    %c0_165 = arith.constant 0 : index
    %c0_166 = arith.constant 0 : index
    %206 = vector.load %arg25[%c0_165, %c0_166] : memref<1x1xf32, #tpu.memory_space<vmem>>, vector<1x1xf32>
    %207 = vector.broadcast %206 : vector<1x1xf32> to vector<4x32xf32>
    %208 = arith.addf %205, %207 : vector<4x32xf32>
    %c0_167 = arith.constant 0 : index
    %c0_168 = arith.constant 0 : index
    %209 = vector.load %arg26[%c0_167, %c0_168] : memref<32x16xbf16, #tpu.memory_space<vmem>>, vector<32x16xbf16>
    %210 = arith.truncf %208 : vector<4x32xf32> to vector<4x32xbf16>
    %cst_169 = arith.constant dense<0.000000e+00> : vector<4x16xf32>
    %211 = tpu.matmul %210, %209, %cst_169 {dimension_numbers = #tpu.dot_dimension_numbers<[1], [0], [0], [1], [0, 0, 1, 1], [], []>} : vector<4x32xbf16>, vector<32x16xbf16>, vector<4x16xf32> -> vector<4x16xf32>
    %c0_170 = arith.constant 0 : index
    %c0_171 = arith.constant 0 : index
    %212 = vector.load %arg27[%c0_170, %c0_171] : memref<1x16xf32, #tpu.memory_space<vmem>>, vector<1x16xf32>
    %213 = vector.broadcast %212 : vector<1x16xf32> to vector<4x16xf32>
    %214 = arith.addf %211, %213 : vector<4x16xf32>
    %cst_172 = arith.constant 0.000000e+00 : f32
    %215 = vector.broadcast %cst_172 : f32 to vector<4x16xf32>
    %216 = arith.maximumf %214, %215 : vector<4x16xf32>
    %cst_173 = arith.constant dense<0.000000e+00> : vector<4xf32>
    %217 = vector.multi_reduction <add>, %216, %cst_173 [1] : vector<4x16xf32> to vector<4xf32>
    %218 = vector.shape_cast %217 : vector<4xf32> to vector<4x1xf32>
    %cst_174 = arith.constant dense<0.000000e+00> : vector<1xf32>
    %219 = vector.multi_reduction <add>, %218, %cst_174 [0] : vector<4x1xf32> to vector<1xf32>
    %220 = vector.shape_cast %219 : vector<1xf32> to vector<1x1xf32>
    %221 = arith.mulf %216, %216 : vector<4x16xf32>
    %cst_175 = arith.constant dense<0.000000e+00> : vector<4xf32>
    %222 = vector.multi_reduction <add>, %221, %cst_175 [1] : vector<4x16xf32> to vector<4xf32>
    %223 = vector.shape_cast %222 : vector<4xf32> to vector<4x1xf32>
    %cst_176 = arith.constant dense<0.000000e+00> : vector<1xf32>
    %224 = vector.multi_reduction <add>, %223, %cst_176 [0] : vector<4x1xf32> to vector<1xf32>
    %225 = vector.shape_cast %224 : vector<1xf32> to vector<1x1xf32>
    %cst_177 = arith.constant 6.400000e+01 : f32
    %226 = vector.broadcast %cst_177 : f32 to vector<1x1xf32>
    %227 = arith.divf %220, %226 : vector<1x1xf32>
    %cst_178 = arith.constant 6.400000e+01 : f32
    %228 = vector.broadcast %cst_178 : f32 to vector<1x1xf32>
    %229 = arith.divf %225, %228 : vector<1x1xf32>
    %230 = arith.mulf %227, %227 : vector<1x1xf32>
    %231 = arith.subf %229, %230 : vector<1x1xf32>
    %232 = vector.broadcast %227 : vector<1x1xf32> to vector<4x16xf32>
    %233 = arith.subf %216, %232 : vector<4x16xf32>
    %c0_179 = arith.constant 0 : index
    %c0_180 = arith.constant 0 : index
    %234 = vector.load %arg28[%c0_179, %c0_180] : memref<1x1xf32, #tpu.memory_space<vmem>>, vector<1x1xf32>
    %cst_181 = arith.constant 9.99999974E-6 : f32
    %235 = vector.broadcast %cst_181 : f32 to vector<1x1xf32>
    %236 = arith.addf %231, %235 : vector<1x1xf32>
    %237 = math.rsqrt %236 : vector<1x1xf32>
    %238 = arith.mulf %234, %237 : vector<1x1xf32>
    %239 = vector.broadcast %238 : vector<1x1xf32> to vector<4x16xf32>
    %240 = arith.mulf %233, %239 : vector<4x16xf32>
    %c0_182 = arith.constant 0 : index
    %c0_183 = arith.constant 0 : index
    %241 = vector.load %arg29[%c0_182, %c0_183] : memref<1x1xf32, #tpu.memory_space<vmem>>, vector<1x1xf32>
    %242 = vector.broadcast %241 : vector<1x1xf32> to vector<4x16xf32>
    %243 = arith.addf %240, %242 : vector<4x16xf32>
    %c0_184 = arith.constant 0 : index
    %c0_185 = arith.constant 0 : index
    %244 = vector.load %arg30[%c0_184, %c0_185] : memref<16x5xbf16, #tpu.memory_space<vmem>>, vector<16x5xbf16>
    %245 = arith.truncf %243 : vector<4x16xf32> to vector<4x16xbf16>
    %cst_186 = arith.constant dense<0.000000e+00> : vector<4x5xf32>
    %246 = tpu.matmul %245, %244, %cst_186 {dimension_numbers = #tpu.dot_dimension_numbers<[1], [0], [0], [1], [0, 0, 1, 1], [], []>} : vector<4x16xbf16>, vector<16x5xbf16>, vector<4x5xf32> -> vector<4x5xf32>
    %c0_187 = arith.constant 0 : index
    %c0_188 = arith.constant 0 : index
    %247 = vector.load %arg31[%c0_187, %c0_188] : memref<1x5xf32, #tpu.memory_space<vmem>>, vector<1x5xf32>
    %248 = vector.broadcast %247 : vector<1x5xf32> to vector<4x5xf32>
    %249 = arith.addf %246, %248 : vector<4x5xf32>
    %c0_189 = arith.constant 0 : index
    %c0_190 = arith.constant 0 : index
    %250 = vector.load %arg32[%c0_189, %c0_190] : memref<4x5xf32, #tpu.memory_space<vmem>>, vector<4x5xf32>
    tpu.vector_store %arg32[%c0_189, %c0_190], %249 {strides = array<i32>} : memref<4x5xf32, #tpu.memory_space<vmem>>, vector<4x5xf32>,
    return
  }
  func.func @transform_0(%arg0: i32) -> (i32, i32) {
    %c0_i32 = arith.constant 0 : i32
    %c0_i32_0 = arith.constant 0 : i32
    %c0_i32_1 = arith.constant 0 : i32
    return %c0_i32, %c0_i32_0 : i32, i32
  }
  func.func @transform_1(%arg0: i32) -> (i32, i32) {
    %c0_i32 = arith.constant 0 : i32
    %c0_i32_0 = arith.constant 0 : i32
    %c0_i32_1 = arith.constant 0 : i32
    return %c0_i32, %c0_i32_0 : i32, i32
  }
  func.func @transform_2(%arg0: i32) -> (i32, i32, i32) {
    %c0_i32 = arith.constant 0 : i32
    %c0_i32_0 = arith.constant 0 : i32
    %c0_i32_1 = arith.constant 0 : i32
    %c0_i32_2 = arith.constant 0 : i32
    return %c0_i32, %c0_i32_0, %c0_i32_1 : i32, i32, i32
  }
  func.func @transform_3(%arg0: i32) -> (i32, i32, i32) {
    %c0_i32 = arith.constant 0 : i32
    %c0_i32_0 = arith.constant 0 : i32
    %c0_i32_1 = arith.constant 0 : i32
    %c0_i32_2 = arith.constant 0 : i32
    return %c0_i32, %c0_i32_0, %c0_i32_1 : i32, i32, i32
  }
  func.func @transform_4(%arg0: i32) -> (i32, i32) {
    %c0_i32 = arith.constant 0 : i32
    %c0_i32_0 = arith.constant 0 : i32
    %c0_i32_1 = arith.constant 0 : i32
    return %c0_i32, %c0_i32_0 : i32, i32
  }
  func.func @transform_5(%arg0: i32) -> (i32, i32, i32) {
    %c0_i32 = arith.constant 0 : i32
    %c0_i32_0 = arith.constant 0 : i32
    %c0_i32_1 = arith.constant 0 : i32
    %c0_i32_2 = arith.constant 0 : i32
    return %c0_i32, %c0_i32_0, %c0_i32_1 : i32, i32, i32
  }
  func.func @transform_6(%arg0: i32) -> (i32, i32, i32) {
    %c0_i32 = arith.constant 0 : i32
    %c0_i32_0 = arith.constant 0 : i32
    %c0_i32_1 = arith.constant 0 : i32
    %c0_i32_2 = arith.constant 0 : i32
    return %c0_i32, %c0_i32_0, %c0_i32_1 : i32, i32, i32
  }
  func.func @transform_7(%arg0: i32) -> (i32, i32) {
    %c0_i32 = arith.constant 0 : i32
    %c0_i32_0 = arith.constant 0 : i32
    %c0_i32_1 = arith.constant 0 : i32
    return %c0_i32, %c0_i32_0 : i32, i32
  }
  func.func @transform_8(%arg0: i32) -> (i32, i32) {
    %c0_i32 = arith.constant 0 : i32
    %c0_i32_0 = arith.constant 0 : i32
    %c0_i32_1 = arith.constant 0 : i32
    return %c0_i32, %c0_i32_0 : i32, i32
  }
  func.func @transform_9(%arg0: i32) -> (i32, i32) {
    %c0_i32 = arith.constant 0 : i32
    %c0_i32_0 = arith.constant 0 : i32
    %c0_i32_1 = arith.constant 0 : i32
    return %c0_i32, %c0_i32_0 : i32, i32
  }
  func.func @transform_10(%arg0: i32) -> (i32, i32) {
    %c0_i32 = arith.constant 0 : i32
    %c0_i32_0 = arith.constant 0 : i32
    %c0_i32_1 = arith.constant 0 : i32
    return %c0_i32, %c0_i32_0 : i32, i32
  }
  func.func @transform_11(%arg0: i32) -> (i32, i32, i32) {
    %c0_i32 = arith.constant 0 : i32
    %c0_i32_0 = arith.constant 0 : i32
    %c0_i32_1 = arith.constant 0 : i32
    %c0_i32_2 = arith.constant 0 : i32
    return %c0_i32, %c0_i32_0, %c0_i32_1 : i32, i32, i32
  }
  func.func @transform_12(%arg0: i32) -> (i32, i32, i32) {
    %c0_i32 = arith.constant 0 : i32
    %c0_i32_0 = arith.constant 0 : i32
    %c0_i32_1 = arith.constant 0 : i32
    %c0_i32_2 = arith.constant 0 : i32
    return %c0_i32, %c0_i32_0, %c0_i32_1 : i32, i32, i32
  }
  func.func @transform_13(%arg0: i32) -> (i32, i32) {
    %c0_i32 = arith.constant 0 : i32
    %c0_i32_0 = arith.constant 0 : i32
    %c0_i32_1 = arith.constant 0 : i32
    return %c0_i32, %c0_i32_0 : i32, i32
  }
  func.func @transform_14(%arg0: i32) -> (i32, i32, i32) {
    %c0_i32 = arith.constant 0 : i32
    %c0_i32_0 = arith.constant 0 : i32
    %c0_i32_1 = arith.constant 0 : i32
    %c0_i32_2 = arith.constant 0 : i32
    return %c0_i32, %c0_i32_0, %c0_i32_1 : i32, i32, i32
  }
  func.func @transform_15(%arg0: i32) -> (i32, i32, i32) {
    %c0_i32 = arith.constant 0 : i32
    %c0_i32_0 = arith.constant 0 : i32
    %c0_i32_1 = arith.constant 0 : i32
    %c0_i32_2 = arith.constant 0 : i32
    return %c0_i32, %c0_i32_0, %c0_i32_1 : i32, i32, i32
  }
  func.func @transform_16(%arg0: i32) -> (i32, i32) {
    %c0_i32 = arith.constant 0 : i32
    %c0_i32_0 = arith.constant 0 : i32
    %c0_i32_1 = arith.constant 0 : i32
    return %c0_i32, %c0_i32_0 : i32, i32
  }
  func.func @transform_17(%arg0: i32) -> (i32, i32) {
    %c0_i32 = arith.constant 0 : i32
    %c0_i32_0 = arith.constant 0 : i32
    %c0_i32_1 = arith.constant 0 : i32
    return %c0_i32, %c0_i32_0 : i32, i32
  }
  func.func @transform_18(%arg0: i32) -> (i32, i32) {
    %c0_i32 = arith.constant 0 : i32
    %c0_i32_0 = arith.constant 0 : i32
    %c0_i32_1 = arith.constant 0 : i32
    return %c0_i32, %c0_i32_0 : i32, i32
  }
  func.func @transform_19(%arg0: i32) -> (i32, i32) {
    %c0_i32 = arith.constant 0 : i32
    %c0_i32_0 = arith.constant 0 : i32
    %c0_i32_1 = arith.constant 0 : i32
    return %c0_i32, %c0_i32_0 : i32, i32
  }
  func.func @transform_20(%arg0: i32) -> (i32, i32, i32) {
    %c0_i32 = arith.constant 0 : i32
    %c0_i32_0 = arith.constant 0 : i32
    %c0_i32_1 = arith.constant 0 : i32
    %c0_i32_2 = arith.constant 0 : i32
    return %c0_i32, %c0_i32_0, %c0_i32_1 : i32, i32, i32
  }
  func.func @transform_21(%arg0: i32) -> (i32, i32, i32) {
    %c0_i32 = arith.constant 0 : i32
    %c0_i32_0 = arith.constant 0 : i32
    %c0_i32_1 = arith.constant 0 : i32
    %c0_i32_2 = arith.constant 0 : i32
    return %c0_i32, %c0_i32_0, %c0_i32_1 : i32, i32, i32
  }
  func.func @transform_22(%arg0: i32) -> (i32, i32) {
    %c0_i32 = arith.constant 0 : i32
    %c0_i32_0 = arith.constant 0 : i32
    %c0_i32_1 = arith.constant 0 : i32
    return %c0_i32, %c0_i32_0 : i32, i32
  }
  func.func @transform_23(%arg0: i32) -> (i32, i32) {
    %c0_i32 = arith.constant 0 : i32
    %c0_i32_0 = arith.constant 0 : i32
    %c0_i32_1 = arith.constant 0 : i32
    return %c0_i32, %c0_i32_0 : i32, i32
  }
  func.func @transform_24(%arg0: i32) -> (i32, i32) {
    %c0_i32 = arith.constant 0 : i32
    %c0_i32_0 = arith.constant 0 : i32
    %c0_i32_1 = arith.constant 0 : i32
    return %c0_i32, %c0_i32_0 : i32, i32
  }
  func.func @transform_25(%arg0: i32) -> (i32, i32) {
    %c0_i32 = arith.constant 0 : i32
    %c0_i32_0 = arith.constant 0 : i32
    %c0_i32_1 = arith.constant 0 : i32
    return %c0_i32, %c0_i32_0 : i32, i32
  }
  func.func @transform_26(%arg0: i32) -> (i32, i32) {
    %c0_i32 = arith.constant 0 : i32
    %c0_i32_0 = arith.constant 0 : i32
    %c0_i32_1 = arith.constant 0 : i32
    return %c0_i32, %c0_i32_0 : i32, i32
  }
  func.func @transform_27(%arg0: i32) -> (i32, i32) {
    %c0_i32 = arith.constant 0 : i32
    %c0_i32_0 = arith.constant 0 : i32
    %c0_i32_1 = arith.constant 0 : i32
    return %c0_i32, %c0_i32_0 : i32, i32
  }
  func.func @transform_28(%arg0: i32) -> (i32, i32) {
    %c0_i32 = arith.constant 0 : i32
    %c0_i32_0 = arith.constant 0 : i32
    %c0_i32_1 = arith.constant 0 : i32
    return %c0_i32, %c0_i32_0 : i32, i32
  }
  func.func @transform_29(%arg0: i32) -> (i32, i32) {
    %c0_i32 = arith.constant 0 : i32
    %c0_i32_0 = arith.constant 0 : i32
    %c0_i32_1 = arith.constant 0 : i32
    return %c0_i32, %c0_i32_0 : i32, i32
  }
  func.func @transform_30(%arg0: i32) -> (i32, i32) {
    %c0_i32 = arith.constant 0 : i32
    %c0_i32_0 = arith.constant 0 : i32
    %c0_i32_1 = arith.constant 0 : i32
    return %c0_i32, %c0_i32_0 : i32, i32
  }
  func.func @transform_31(%arg0: i32) -> (i32, i32) {
    %c0_i32 = arith.constant 0 : i32
    %c0_i32_0 = arith.constant 0 : i32
    %c0_i32_1 = arith.constant 0 : i32
    return %c0_i32, %c0_i32_0 : i32, i32
  }
}

</mosaic_0001>

<bundles_post_ra>
// kernel: kmer_cnn_forward.1
= control target key start
LH: loop header
LB: loop body
LE: loop exit
PB: predicated region body
PF: predicated region fallthrough
CT: control target
= control target key end

     0   :  { %s5679_s6 = smov 1   ;;  %s5680_s10 = smov 2   ;;  %s6524_s0 = inlined_call_operand.smem [shape: u32[32], index: -1, kind: input, shape index: {}] }
   0x1   :  { %s5733_s5 = sld [smem:[%s6524_s0]]   ;;  %s5681_s14 = smov 3  }
   0x2   :  { %s5738_s9 = sld [smem:[%s6524_s0 + %s5679_s6]]   ;;  %s5682_s18 = smov 4  }
   0x3   :  { %s5743_s13 = sld [smem:[%s6524_s0 + %s5680_s10]]   ;;  %s5683_s22 = smov 5  }
   0x4   :  { %s5748_s17 = sld [smem:[%s6524_s0 + %s5681_s14]]   ;;  %s5684_s26 = smov 6  }
   0x5   :  { %s5753_s21 = sld [smem:[%s6524_s0 + %s5682_s18]]   ;;  %s5685_s30 = smov 7  }
   0x6   :  { %s5758_s25 = sld [smem:[%s6524_s0 + %s5683_s22]]   ;;  %s5686_s4 = smov 8  }
   0x7   :  { %s5763_s29 = sld [smem:[%s6524_s0 + %s5684_s26]]   ;;  %s5687_s10 = smov 9  }
   0x8   :  { %s5768_s3 = sld [smem:[%s6524_s0 + %s5685_s30]]   ;;  %s5688_s15 = smov 10  }
   0x9   :  { %s5773_s8 = sld [smem:[%s6524_s0 + %s5686_s4]]   ;;  %s5689_s20 = smov 11  }
   0xa   :  { %s5778_s14 = sld [smem:[%s6524_s0 + %s5687_s10]]   ;;  %s5690_s26 = smov 12  }
   0xb   :  { %s5783_s19 = sld [smem:[%s6524_s0 + %s5688_s15]]   ;;  %s5691_s1 = smov 13  }
   0xc   :  { %s5788_s24 = sld [smem:[%s6524_s0 + %s5689_s20]]   ;;  %s5692_s7 = smov 14  }
   0xd   :  { %s5793_s30 = sld [smem:[%s6524_s0 + %s5690_s26]]   ;;  %s5693_s15 = smov 15  }
   0xe   :  { %s5798_s6 = sld [smem:[%s6524_s0 + %s5691_s1]]   ;;  %s5694_s22 = smov 16  }
   0xf   :  { %s5803_s12 = sld [smem:[%s6524_s0 + %s5692_s7]]   ;;  %s5695_s28 = smov 17  }
  0x10   :  { %s5808_s20 = sld [smem:[%s6524_s0 + %s5693_s15]]   ;;  %s5696_s7 = smov 18  }
  0x11   :  { %s5813_s27 = sld [smem:[%s6524_s0 + %s5694_s22]]   ;;  %s5697_s15 = smov 19  }
  0x12   :  { %6533 = sst [smem:[#allocation24_spill]] %s5788_s24  ;;  %s5698_s22 = smov 20  }
  0x13   :  { %6534 = sst [smem:[#allocation25_spill]] %s5793_s30  ;;  %s5702_s23 = smov 25  }
  0x14   :  { %6535 = sst [smem:[#allocation26_spill]] %s5798_s6  ;;  %s5703_s1 = smov 26  }
  0x15   :  { %6536 = sst [smem:[#allocation27_spill]] %s5803_s12  ;;  %s5704_s10 = smov 29  }
  0x16   :  { %6537 = sst [smem:[#allocation28_spill]] %s5808_s20  ;;  %s5705_s16 = smov 30  }
  0x17   :  { %6538 = sst [smem:[#allocation29_spill]] %s5813_s27 }
  0x18   :  { %s5818_s4 = sld [smem:[%s6524_s0 + %s5695_s28]]   ;;  %s5699_s28 = smov 21  }
  0x19   :  { %s5823_s6 = sld [smem:[%s6524_s0 + %s5696_s7]]   ;;  %s5700_s7 = smov 22  }
  0x1a   :  { %s5828_s20 = sld [smem:[%s6524_s0 + %s5697_s15]]   ;;  %s5701_s15 = smov 23  }
  0x1b   :  { %s5833_s27 = sld [smem:[%s6524_s0 + %s5698_s22]]  }
  0x1c   :  { %s5838_s12 = sld [smem:[%s6524_s0 + %s5699_s28]]  }
  0x1d   :  { %s4166_s30 = sld [smem:[%s6524_s0 + %s5701_s15]]  }
  0x1e   :  { %s5866_s24 = sld [smem:[%s6524_s0 + %s5705_s16]]   ;;  %s5709_s16 = smov 28  }
  0x1f   :  { %6539 = sst [smem:[#allocation30_spill]] %s5823_s6 }
  0x20   :  { %s5843_s6 = sld [smem:[%s6524_s0 + %s5700_s7]]  }
  0x21   :  { %6540 = sst [smem:[#allocation31_spill]] %s5833_s27 }
  0x22   :  { %6541 = sst [smem:[#allocation32_spill]] %s5838_s12 }
  0x23   :  { %s5851_s27 = sld [smem:[%s6524_s0 + %s5702_s23]]   ;;  %s5706_s23 = smov 31   ;;  %v68_v0 = vstv %s4166_s30 }
  0x24   :  { %s5856_s12 = sld [smem:[%s6524_s0 + %s5703_s1]]   ;;  %s5707_s1 = smov 24   ;;  %69 = vst [vmem:[#allocation2] sm:$0x1] %v68_v0 }
  0x25   :  { %6546 = sst [smem:[#allocation37_spill]] %s5866_s24 }
  0x26   :  { %6542 = sst [smem:[#allocation33_spill]] %s5843_s6 }
  0x27   :  { %s5861_s6 = sld [smem:[%s6524_s0 + %s5704_s10]]   ;;  %s5708_s10 = smov 27  }
  0x28   :  { %s4167_s7 = sld [smem:[%s6524_s0 + %s5707_s1]]  }
  0x29   :  { %6543 = sst [smem:[#allocation34_spill]] %s5851_s27 }
  0x2a   :  { %6544 = sst [smem:[#allocation35_spill]] %s5856_s12 }
  0x2b   :  { %s5871_s27 = sld [smem:[%s6524_s0 + %s5706_s23]]  }
  0x2c   :  { %s4170_s15 = sld [smem:[%s6524_s0 + %s5708_s10]]  }
  0x2d   :  { %6545 = sst [smem:[#allocation36_spill]] %s5861_s6 }
  0x2e   :  { %s4171_s12 = sld [smem:[%s6524_s0 + %s5709_s16]]   ;;  %v70_v1 = vstv %s4167_s7 }
  0x2f   :  { %71 = vst [vmem:[#allocation3] sm:$0x1] %v70_v1 }
  0x32   :  { %v72_v2 = vstv %s4170_s15 }
  0x33   :  { %73 = vst [vmem:[#allocation4] sm:$0x1] %v72_v2 }
  0x34   :  { %v74_v3 = vstv %s4171_s12 }
  0x35   :  { %75 = vst [vmem:[#allocation5] sm:$0x1] %v74_v3 }
  0x36   :  { %76 = vsyncpa [#allocation7], 0 }
  0x37   :  { %77 = vsyncpa [#allocation10], 0 }
  0x38   :  { %78 = vsyncpa [#allocation13], 0 }
  0x39   :  { %79 = vsyncpa [#allocation16], 0 }
  0x3a   :  { %80 = vsyncpa [#allocation8], 0  ;;  %s5710_s30 = smov [#allocation9]   ;;  %s5711_s23 = smov [#allocation12]  }
  0x3b   :  { %s105_s6 = sshll.u32 %s5710_s30, 4  ;;  %s133_s22 = sshll.u32 %s5711_s23, 4  ;;  %s106_s6 = int_to_ptr.vmem [resolvable:$true] %s105_s6  ;;  %s134_s22 = int_to_ptr.vmem [resolvable:$true] %s133_s22 }
  0x3c   :  { %s5493_s0 = scalar_lea.hbm %s5753_s21, 32 }
  0x3d   :  { %p5494_p0 = scmp.ne.s32.totalorder %s5753_s21, %s5493_s0  ;;  %p5497_p1 = scmp.lt.u32.totalorder %s5493_s0, %s5753_s21 }
  0x3f   :  { %p5499_p2 = pnand %p5497_p1, %p5494_p0 }
  0x41   :  { %5502 = shalt.err (!%p5499_p2)
}
  0x42   :  { %s5503_s24 = scalar_lea.vmem %s106_s6, 32  ;;  %p5508_p4 = scmp.lt.s32.totalorder %s106_s6, %s106_s6 }
  0x43   :  { %p5504_p3 = scmp.ne.s32.totalorder %s106_s6, %s5503_s24  ;;  %p5509_p5 = scmp.lt.s32.totalorder %s5503_s24, %s5503_s24 }
  0x45   :  { %p5510_p6 = por %p5509_p5, %p5508_p4 }
  0x47   :  { %p5511_p7 = pnand %p5510_p6, %p5504_p3 }
  0x49   :  { %5514 = shalt.err (!%p5511_p7)
}
  0x4a   :  { %108 = dma.hbm_to_vmem [thread:$0]  %s5753_s21, 32, %s106_s6, [#allocation10]  }
  0x4b   :  { %s5515_s12 = scalar_lea.hbm %s5778_s14, 16 }
  0x4c   :  { %p5516_p8 = scmp.ne.s32.totalorder %s5778_s14, %s5515_s12  ;;  %p5519_p9 = scmp.lt.u32.totalorder %s5515_s12, %s5778_s14 }
  0x4e   :  { %p5521_p10 = pnand %p5519_p9, %p5516_p8 }
  0x50   :  { %5524 = shalt.err (!%p5521_p10)
}
  0x51   :  { %s5525_s26 = scalar_lea.vmem %s134_s22, 16  ;;  %s5529_s1 = scalar_lea.vmem %s134_s22, 32 }
  0x52   :  { %p5526_p11 = scmp.ne.s32.totalorder %s134_s22, %s5525_s26  ;;  %p5530_p12 = scmp.lt.s32.totalorder %s134_s22, %s134_s22 }
  0x53   :  { %p5531_p13 = scmp.lt.s32.totalorder %s5529_s1, %s5525_s26 }
  0x55   :  { %p5532_p0 = por %p5531_p13, %p5530_p12 }
  0x57   :  { %p5533_p1 = pnand %p5532_p0, %p5526_p11 }
  0x59   :  { %5536 = shalt.err (!%p5533_p1)
}
  0x5a   :  { %136 = dma.hbm_to_vmem [thread:$0]  %s5778_s14, 16, %s134_s22, [#allocation13]  }
  0x5b   :  { %s5712_s28 = smov [#allocation15]   ;;  %s5713_s2 = smov [#allocation6]  }
  0x5c   :  { %s164_s21 = sshll.u32 %s5712_s28, 4  ;;  %s92_s7 = sshll.u32 %s5713_s2, 4  ;;  %s165_s21 = int_to_ptr.vmem [resolvable:$true] %s164_s21  ;;  %s5890_s7 = int_to_ptr.vmem [resolvable:$true] %s92_s7 }
  0x5d   :  { %s5537_s10 = scalar_lea.hbm %s5818_s4, 256 }
  0x5e   :  { %p5538_p2 = scmp.ne.s32.totalorder %s5818_s4, %s5537_s10  ;;  %p5541_p3 = scmp.lt.u32.totalorder %s5537_s10, %s5818_s4 }
  0x60   :  { %p5543_p4 = pnand %p5541_p3, %p5538_p2 }
  0x62   :  { %5546 = shalt.err (!%p5543_p4)
}
  0x63   :  { %s5547_s11 = scalar_lea.vmem %s165_s21, 256  ;;  %p5552_p6 = scmp.lt.s32.totalorder %s165_s21, %s165_s21 }
  0x64   :  { %p5548_p5 = scmp.ne.s32.totalorder %s165_s21, %s5547_s11  ;;  %p5553_p7 = scmp.lt.s32.totalorder %s5547_s11, %s5547_s11 }
  0x66   :  { %p5554_p8 = por %p5553_p7, %p5552_p6 }
  0x68   :  { %p5555_p9 = pnand %p5554_p8, %p5548_p5 }
  0x6a   :  { %5558 = shalt.err (!%p5555_p9)
}
  0x6b   :  { %s5714_s14 = smov 128   ;;  %s5715_s15 = smov 8  }
  0x6c   :  { %170 = dma.hbm_to_vmem [thread:$0]  %s5818_s4, 256, %s165_s21, [#allocation16], %s5714_s14, %s5714_s14, %s5715_s15  }
  0x6d   :  { %s5559_s16 = scalar_lea.hbm %s5748_s17, 1152 }
  0x6e   :  { %p5560_p10 = scmp.ne.s32.totalorder %s5748_s17, %s5559_s16  ;;  %p5563_p11 = scmp.lt.u32.totalorder %s5559_s16, %s5748_s17 }
  0x70   :  { %p5565_p12 = pnand %p5563_p11, %p5560_p10 }
  0x72   :  { %5568 = shalt.err (!%p5565_p12)
}
  0x73   :  { %s5569_s18 = scalar_lea.vmem %s5890_s7, 1152  ;;  %p5574_p0 = scmp.lt.s32.totalorder %s5890_s7, %s5890_s7 }
  0x74   :  { %p5570_p13 = scmp.ne.s32.totalorder %s5890_s7, %s5569_s18  ;;  %p5575_p1 = scmp.lt.s32.totalorder %s5569_s18, %s5569_s18 }
  0x76   :  { %p5576_p2 = por %p5575_p1, %p5574_p0 }
  0x78   :  { %p5577_p3 = pnand %p5576_p2, %p5570_p13 }
  0x7a   :  { %5580 = shalt.err (!%p5577_p3)
}
  0x7b   :  { %98 = dma.hbm_to_vmem [thread:$0]  %s5748_s17, 1152, %s5890_s7, [#allocation7], %s5714_s14, %s5714_s14, %s5715_s15  }
  0x7c   :  { %s5716_s4 = smov [#allocation11]   ;;  %s5717_s6 = smov [#allocation14]  }
  0x7d   :  { %s120_s30 = sshll.u32 %s5716_s4, 4  ;;  %s143_s23 = sshll.u32 %s5717_s6, 4  ;;  %s121_s30 = int_to_ptr.vmem [resolvable:$true] %s120_s30  ;;  %s144_s23 = int_to_ptr.vmem [resolvable:$true] %s143_s23 }
  0x7e   :  { %s5581_s22 = scalar_lea.hbm %s5773_s8, 256 }
  0x7f   :  { %p5582_p4 = scmp.ne.s32.totalorder %s5773_s8, %s5581_s22  ;;  %p5585_p5 = scmp.lt.u32.totalorder %s5581_s22, %s5773_s8 }
  0x81   :  { %p5587_p6 = pnand %p5585_p5, %p5582_p4 }
  0x83   :  { %5590 = shalt.err (!%p5587_p6)
}
  0x84   :  { %s5591_s0 = scalar_lea.vmem %s121_s30, 256  ;;  %p5596_p8 = scmp.lt.s32.totalorder %s121_s30, %s121_s30 }
  0x85   :  { %p5592_p7 = scmp.ne.s32.totalorder %s121_s30, %s5591_s0  ;;  %p5597_p9 = scmp.lt.s32.totalorder %s5591_s0, %s5591_s0 }
  0x87   :  { %p5598_p10 = por %p5597_p9, %p5596_p8 }
  0x89   :  { %p5599_p11 = pnand %p5598_p10, %p5592_p7 }
  0x8b   :  { %5602 = shalt.err (!%p5599_p11)
}
  0x8c   :  { %126 = dma.hbm_to_vmem [thread:$0]  %s5773_s8, 256, %s121_s30, [#allocation10], %s5714_s14, %s5714_s14, %s5715_s15  }
  0x8d   :  { %s5603_s17 = scalar_lea.hbm %s5783_s19, 16 }
  0x8e   :  { %p5604_p12 = scmp.ne.s32.totalorder %s5783_s19, %s5603_s17  ;;  %p5607_p13 = scmp.lt.u32.totalorder %s5603_s17, %s5783_s19 }
  0x90   :  { %p5609_p0 = pnand %p5607_p13, %p5604_p12 }
  0x92   :  { %5612 = shalt.err (!%p5609_p0)
}
  0x93   :  { %s5613_s24 = scalar_lea.vmem %s144_s23, 16  ;;  %s5617_s12 = scalar_lea.vmem %s144_s23, 32 }
  0x94   :  { %p5614_p1 = scmp.ne.s32.totalorder %s144_s23, %s5613_s24  ;;  %p5618_p2 = scmp.lt.s32.totalorder %s144_s23, %s144_s23 }
  0x95   :  { %p5619_p3 = scmp.lt.s32.totalorder %s5617_s12, %s5613_s24 }
  0x97   :  { %p5620_p4 = por %p5619_p3, %p5618_p2 }
  0x99   :  { %p5621_p5 = pnand %p5620_p4, %p5614_p1 }
  0x9b   :  { %5624 = shalt.err (!%p5621_p5)
}
  0x9c   :  { %146 = dma.hbm_to_vmem [thread:$0]  %s5783_s19, 16, %s144_s23, [#allocation13]  }
  0x9d   :  { %s5718_s26 = smov [#allocation17]   ;;  %s5625_s1 = scalar_lea.hbm %s5828_s20, 16 }
  0x9e   :  { %s179_s8 = sshll.u32 %s5718_s26, 4  ;;  %p5626_p6 = scmp.ne.s32.totalorder %s5828_s20, %s5625_s1  ;;  %s180_s8 = int_to_ptr.vmem [resolvable:$true] %s179_s8 }
  0x9f   :  { %p5629_p7 = scmp.lt.u32.totalorder %s5625_s1, %s5828_s20 }
  0xa1   :  { %p5631_p8 = pnand %p5629_p7, %p5626_p6 }
  0xa3   :  { %5634 = shalt.err (!%p5631_p8)
}
  0xa4   :  { %s5635_s28 = scalar_lea.vmem %s180_s8, 16  ;;  %s5639_s21 = scalar_lea.vmem %s180_s8, 32 }
  0xa5   :  { %p5636_p9 = scmp.ne.s32.totalorder %s180_s8, %s5635_s28  ;;  %p5640_p10 = scmp.lt.s32.totalorder %s180_s8, %s180_s8 }
  0xa6   :  { %p5641_p11 = scmp.lt.s32.totalorder %s5639_s21, %s5635_s28 }
  0xa8   :  { %p5642_p12 = por %p5641_p11, %p5640_p10 }
  0xaa   :  { %p5643_p13 = pnand %p5642_p12, %p5636_p9 }
  0xac   :  { %5646 = shalt.err (!%p5643_p13)
}
  0xad   :  { %182 = dma.hbm_to_vmem [thread:$0]  %s5828_s20, 16, %s180_s8, [#allocation16]  }
  0xae   :  { %5669 = dma.done.wait [#allocation7], 1152  }
  0xaf   :  { %5670 = vsyncadd [#allocation7], 4294966144 }
  0xb0   :  { %5671 = dma.done.wait [#allocation10], 288  }
  0xb1   :  { %5672 = vsyncadd [#allocation10], 4294967008 }
  0xb2   :  { %5673 = dma.done.wait [#allocation13], 32  }
  0xb3   :  { %5674 = vsyncadd [#allocation13], 4294967264 }
  0xb4   :  { %5675 = dma.done.wait [#allocation16], 272  }
  0xb5   :  { %5676 = vsyncadd [#allocation16], 4294967024  ;;  %v5719_v4 = vmov 0   ;;  %v229_v5 = vld [vmem:[%s5733_s5 + $0x10] sm:$0xff]  ;;  %v227_v6 = vld [vmem:[%s5733_s5] sm:$0xff]  ;;  %v237_v21 = vlaneseq  ;;  %vm303_vm0 = vcmask 261120  }
  0xb6   :  { %5448 = vset.pattern.permute.xlu1 %v5719_v4  ;;  %5447 = vset.pattern.permute.xlu0 %v5719_v4  ;;  %v230_v7 = vld [vmem:[%s5733_s5 + $0x18] sm:$0xff]  ;;  %v228_v8 = vld [vmem:[%s5733_s5 + $0x8] sm:$0xff]  ;;  %v299_v9 = vld [vmem:[%s5738_s9] sm:$0xff]  ;;  %v5720_v25 = vmov 0.0   ;;  %v5721_v44 = vmov 0.0|0.0   ;;  %vm5722_vm11 = vmmov 0  }
  0xb7   :  { %246 = vperm.xlu1 %5448, %v229_v5   ;;  %240 = vperm.xlu0 %5447, %v227_v6   ;;  %v300_v10 = vld [vmem:[%s5738_s9 + $0x8] sm:$0xff]  ;;  %v231_v12 = vld [vmem:[%s5733_s5 + $0x20] sm:$0xff]  ;;  %v301_v14 = vld [vmem:[%s5738_s9 + $0x10] sm:$0xff]  ;;  %v238_v22 = vand.u32 127, %v237_v21  ;;  %vm458_vm12 = vcmask 654336   ;;  %vm791_vm13 = vcmask 1043456  }
  0xb8   :  { %v232_v11 = vld [vmem:[%s5733_s5 + $0x28] sm:$0xff]  ;;  %v5088_v13 = vpack.c.bf16 %v300_v10, %v299_v9  ;;  %v302_v15 = vld [vmem:[%s5738_s9 + $0x18] sm:$0xff]  ;;  %v233_v18 = vld [vmem:[%s5733_s5 + $0x30] sm:$0xff]  ;;  %5096 = vmatprep.subr.bf16.mxu1 %v5721_v44  ;;  %4684 = vmatprep.mubr.msk.f32.mxu1 %vm5722_vm11, %v5720_v25  ;;  %vm775_vm14 = vcmask 195584   ;;  %vm1340_vm15 = vcmask 588800   ;;  %s6548_s9 = sld [smem:[#allocation25_spill]] }
  0xb9   :  { %v5092_v16 = vpack.c.bf16 %v302_v15, %v301_v14  ;;  %v234_v17 = vld [vmem:[%s5733_s5 + $0x38] sm:$0xff]  ;;  %v236_v19 = vld [vmem:[%s5733_s5 + $0x48] sm:$0xff]  ;;  %v235_v20 = vld [vmem:[%s5733_s5 + $0x40] sm:$0xff]  ;;  %s6547_s5 = sld [smem:[#allocation24_spill]]  ;;  %s6555_s19 = sld [smem:[#allocation30_spill]] }
  0xba   :  { %5089 = vmatprep.subr.bf16.mxu0 %v5088_v13  ;;  %v5451_v59 = vld [vmem:[#allocation6 + $0x1c] ss:$8 sps:$4 sm:$0xff]   ;;  %v5449_v63 = vld [vmem:[#allocation6 + $0x18] ss:$8 sps:$4 sm:$0xff]   ;;  %v754_v0 = vld [vmem:[#allocation6 + $0x28] sm:$0xff]  ;;  %s6556_s20 = sld [smem:[#allocation31_spill]] }
  0xbb   :  { %249 = vperm.xlu1 %5448, %v230_v7   ;;  %243 = vperm.xlu0 %5447, %v228_v8   ;;  %v4204_v61 = vld [vmem:[%s5743_s13 + $0x48] sm:$0xff]  ;;  %v449_v62 = vld [vmem:[%s5743_s13] sm:$0xff]  ;;  %v4205_v1 = vld [vmem:[%s5743_s13 + $0x50] sm:$0xff]  ;;  %v4225_v3 = vcombine.high %v754_v0, %v754_v0  ;;  %v4224_v5 = vcombine.low %v754_v0, %v754_v0  ;;  %s6557_s2 = sld [smem:[#allocation32_spill]]  ;;  %s6558_s7 = sld [smem:[#allocation33_spill]] }
  0xbc   :  { %5091 = vmatpush3.bf16.msra.mxu0 %v5088_v13  ;;  %v450_v2 = vld [vmem:[%s5743_s13 + $0x8] sm:$0xff]  ;;  %v4206_v6 = vld [vmem:[%s5743_s13 + $0x58] sm:$0xff]  ;;  %v451_v7 = vld [vmem:[%s5743_s13 + $0x10] sm:$0xff]  ;;  %s6559_s10 = sld [smem:[#allocation34_spill]]  ;;  %s6560_s11 = sld [smem:[#allocation35_spill]] }
  0xbd   :  { %5093 = vmatprep.subr.bf16.mxu0 %v5092_v16  ;;  %v793_v8 = vsel %vm791_vm13, %v4224_v5, 0  ;;  %v4207_v9 = vld [vmem:[%s5743_s13 + $0x60] sm:$0xff]  ;;  %v452_v10 = vld [vmem:[%s5743_s13 + $0x18] sm:$0xff]  ;;  %v4209_v13 = vld [vmem:[%s5743_s13 + $0x70] sm:$0xff]  ;;  %s6561_s14 = sld [smem:[#allocation36_spill]]  ;;  %s6562_s15 = sld [smem:[#allocation37_spill]] }
  0xbe   :  { %v454_v14 = vld [vmem:[%s5743_s13 + $0x28] sm:$0xff]  ;;  %v4210_v15 = vld [vmem:[%s5743_s13 + $0x78] sm:$0xff]  ;;  %s5724_s16 = smov [#allocation18]  }
  0xbf   :  { %255 = vperm.xlu1 %5448, %v232_v11   ;;  %252 = vperm.xlu0 %5447, %v231_v12   ;;  %v4208_v11 = vld [vmem:[%s5743_s13 + $0x68] sm:$0xff]  ;;  %v453_v12 = vld [vmem:[%s5743_s13 + $0x20] sm:$0xff]  ;;  %s4132_s18 = sshll.u32 %s5724_s16, 4  ;;  %s4133_s18 = int_to_ptr.vmem [resolvable:$true] %s4132_s18 }
  0xc0   :  { %5095 = vmatpush3.bf16.msra.mxu0 %v5092_v16  ;;  %v455_v16 = vld [vmem:[%s5743_s13 + $0x30] sm:$0xff]  ;;  %s5647_s4 = scalar_lea.vmem %s4133_s18, 64  ;;  %p5652_p1 = scmp.lt.s32.totalorder %s4133_s18, %s4133_s18 }
  0xc1   :  { %5111 = vmatprep.subr.bf16.mxu0 %v5721_v44  ;;  %p5648_p0 = scmp.ne.s32.totalorder %s4133_s18, %s5647_s4  ;;  %p5653_p2 = scmp.lt.s32.totalorder %s5647_s4, %s5647_s4 }
  0xc3   :  { %261 = vperm.xlu1 %5448, %v234_v17   ;;  %258 = vperm.xlu0 %5447, %v233_v18   ;;  %v4211_v17 = vld [vmem:[%s5743_s13 + $0x80] sm:$0xff]  ;;  %v456_v18 = vld [vmem:[%s5743_s13 + $0x38] sm:$0xff]  ;;  %p5654_p3 = por %p5653_p2, %p5652_p1 }
  0xc5   :  { %p5655_p4 = pnand %p5654_p3, %p5648_p0 }
  0xc7   :  { %267 = vperm.xlu1 %5448, %v236_v19   ;;  %264 = vperm.xlu0 %5447, %v235_v20   ;;  %v4212_v19 = vld [vmem:[%s5743_s13 + $0x88] sm:$0xff]  ;;  %v457_v20 = vld [vmem:[%s5743_s13 + $0x40] sm:$0xff] }
 0x136   :  { %v247_v23 = vpop.permute.xlu1 %246  ;;  %v241_v24 = vpop.permute.xlu0 %240 }
 0x137   :  { %vm269_vm1 = vcmp.eq.s32.totalorder %v241_v24, %v238_v22  ;;  %vm271_vm2 = vcmp.eq.s32.totalorder %v247_v23, %v238_v22  ;;  %v4243_v23 = vld [vmem:[%s5743_s13 + $0x98] sm:$0xff]  ;;  %v4244_v24 = vld [vmem:[%s5743_s13 + $0xa0] sm:$0xff] }
 0x138   :  { %v4175_v26 = vsel %vm269_vm1, 1.0, %v5720_v25  ;;  %v4177_v29 = vsel %vm271_vm2, 1.0, %v5720_v25  ;;  %vm1825_vm1 = vcmask 650240   ;;  %vm2024_vm2 = vcmask 130048  }
 0x139   :  { %4649 = vmatprep.mubr.msk.f32.mxu0 %vm303_vm0, %v4175_v26  ;;  %v4245_v26 = vld [vmem:[%s5743_s13 + $0xa8] sm:$0xff] }
 0x13a   :  { %v250_v27 = vpop.permute.xlu1 %249  ;;  %v244_v28 = vpop.permute.xlu0 %243 }
 0x13b   :  { %vm270_vm3 = vcmp.eq.s32.totalorder %v244_v28, %v238_v22  ;;  %vm272_vm4 = vcmp.eq.s32.totalorder %v250_v27, %v238_v22  ;;  %v4246_v27 = vld [vmem:[%s5743_s13 + $0xb0] sm:$0xff]  ;;  %v4247_v28 = vld [vmem:[%s5743_s13 + $0xb8] sm:$0xff] }
 0x13c   :  { %v4176_v30 = vsel %vm270_vm3, 1.0, %v5720_v25  ;;  %v4178_v33 = vsel %vm272_vm4, 1.0, %v5720_v25  ;;  %vm2193_vm3 = vcmask 293888   ;;  %vm2812_vm4 = vcmask 228352  }
 0x13d   :  { %4650 = vmatmul.mubr.msk.f32.vlgmr.msra.gmra.mrb[0].mxu0 %vm303_vm0, %v4176_v30  ;;  %v4249_v30 = vld [vmem:[%s5743_s13 + $0xc8] sm:$0xff] }
 0x13e   :  { %v256_v31 = vpop.permute.xlu1 %255  ;;  %4652 = vmatprep.mubr.msk.f32.mxu0 %vm303_vm0, %v4177_v29  ;;  %v253_v32 = vpop.permute.xlu0 %252  ;;  %v4248_v29 = vld [vmem:[%s5743_s13 + $0xc0] sm:$0xff] }
 0x13f   :  { %vm273_vm5 = vcmp.eq.s32.totalorder %v253_v32, %v238_v22  ;;  %vm274_vm6 = vcmp.eq.s32.totalorder %v256_v31, %v238_v22  ;;  %v4250_v31 = vld [vmem:[%s5743_s13 + $0xd0] sm:$0xff] }
 0x140   :  { %v4179_v34 = vsel %vm273_vm5, 1.0, %v5720_v25  ;;  %v4180_v37 = vsel %vm274_vm6, 1.0, %v5720_v25  ;;  %v5456_v32 = vld [vmem:[#allocation6 + $0x4] ss:$8 sps:$4 sm:$0xff]   ;;  %vm5723_vm5 = vmmov 1  }
 0x141   :  { %4653 = vmatmul.mubr.msk.f32.gmra.mrb[2].mxu0 %vm303_vm0, %v4178_v33  ;;  %vm6409_vm6 = vmpackc.low %vm791_vm13, %vm5723_vm5 }
 0x142   :  { %v262_v35 = vpop.permute.xlu1 %261  ;;  %4655 = vmatprep.mubr.msk.f32.mxu0 %vm303_vm0, %v4179_v34  ;;  %v259_v36 = vpop.permute.xlu0 %258 }
 0x143   :  { %vm275_vm7 = vcmp.eq.s32.totalorder %v259_v36, %v238_v22  ;;  %vm276_vm8 = vcmp.eq.s32.totalorder %v262_v35, %v238_v22 }
 0x144   :  { %v4181_v38 = vsel %vm275_vm7, 1.0, %v5720_v25  ;;  %v4182_v41 = vsel %vm276_vm8, 1.0, %v5720_v25  ;;  %vm2989_vm7 = vcmask 392192   ;;  %vm3156_vm8 = vcmask 125952  }
 0x145   :  { %4656 = vmatmul.mubr.msk.f32.gmra.mrb[4].mxu0 %vm303_vm0, %v4180_v37  ;;  %v598_v37 = vld [vmem:[#allocation6 + $0x10] sm:$0xff] }
 0x146   :  { %v268_v39 = vpop.permute.xlu1 %267  ;;  %4658 = vmatprep.mubr.msk.f32.mxu0 %vm303_vm0, %v4181_v38  ;;  %v265_v40 = vpop.permute.xlu0 %264 }
 0x147   :  { %vm277_vm9 = vcmp.eq.s32.totalorder %v265_v40, %v238_v22  ;;  %vm278_vm10 = vcmp.eq.s32.totalorder %v268_v39, %v238_v22  ;;  %v4242_v22 = vld [vmem:[%s5743_s13 + $0x90] sm:$0xff]  ;;  %v5454_v39 = vld [vmem:[#allocation6] ss:$8 sps:$4 sm:$0xff]   ;;  %s6549_s13 = sld [smem:[#allocation27_spill]] }
 0x148   :  { %v4183_v42 = vsel %vm277_vm9, 1.0, %v5720_v25  ;;  %v4184_v43 = vsel %vm278_vm10, 1.0, %v5720_v25  ;;  %vm3497_vm9 = vcmask 97280   ;;  %vm3892_vm10 = vcmask 257024  }
 0x149   :  { %4659 = vmatmul.mubr.msk.f32.gmra.mrb[6].mxu0 %vm303_vm0, %v4182_v41 }
 0x14a   :  { %4661 = vmatprep.mubr.msk.f32.mxu0 %vm303_vm0, %v4183_v42 }
 0x14d   :  { %4662 = vmatmul.mubr.msk.f32.gmra.mrb[8].mxu0 %vm303_vm0, %v4184_v43  ;;  %v4235_v43 = vcombine.high %v598_v37, %v598_v37 }
 0x14e   :  { %4731 = vmatprep.mubr.msk.f32.mxu0 %vm5722_vm11, %v5720_v25 }
 0x210   :  { %v4651_v45 = vpop.f32.mrb[0].mxu0 }
 0x211   :  { %v400_v46 = vpop.f32.mrb[1].mxu0 }
 0x212   :  { %v5097_v47 = vpack.c.bf16 %v4651_v45, %v400_v46  ;;  %v4234_v45 = vcombine.low %v598_v37, %v598_v37 }
 0x214   :  { %v4654_v48 = vpop.f32.mrb[2].mxu0  ;;  %5098 = vmatpush3.bf16.msra.mxu1 %v5097_v47  ;;  %5113 = vmatpush3.bf16.msra.mxu0 %v5097_v47 }
 0x215   :  { %v410_v49 = vpop.f32.mrb[3].mxu0  ;;  %5099 = vmatprep.subr.bf16.mxu1 %v5721_v44  ;;  %5114 = vmatprep.subr.bf16.mxu0 %v5721_v44 }
 0x216   :  { %v5100_v50 = vpack.c.bf16 %v4654_v48, %v410_v49 }
 0x218   :  { %v4657_v51 = vpop.f32.mrb[4].mxu0  ;;  %5101 = vmatpush3.bf16.msra.mxu1 %v5100_v50  ;;  %5116 = vmatpush3.bf16.msra.mxu0 %v5100_v50 }
 0x219   :  { %v420_v52 = vpop.f32.mrb[5].mxu0  ;;  %5102 = vmatprep.subr.bf16.mxu1 %v5721_v44  ;;  %5117 = vmatprep.subr.bf16.mxu0 %v5721_v44 }
 0x21a   :  { %v5103_v53 = vpack.c.bf16 %v4657_v51, %v420_v52  ;;  %v910_v51 = vsel %vm791_vm13, %v4234_v45, 0 }
 0x21c   :  { %v4660_v54 = vpop.f32.mrb[6].mxu0  ;;  %5104 = vmatpush3.bf16.msra.mxu1 %v5103_v53  ;;  %5119 = vmatpush3.bf16.msra.mxu0 %v5103_v53 }
 0x21d   :  { %v430_v55 = vpop.f32.mrb[7].mxu0  ;;  %5105 = vmatprep.subr.bf16.mxu1 %v5721_v44  ;;  %5120 = vmatprep.subr.bf16.mxu0 %v5721_v44 }
 0x21e   :  { %v5106_v56 = vpack.c.bf16 %v4660_v54, %v430_v55 }
 0x220   :  { %v4663_v57 = vpop.f32.mrb[8].mxu0  ;;  %5107 = vmatpush3.bf16.msra.mxu1 %v5106_v56  ;;  %5122 = vmatpush3.bf16.msra.mxu0 %v5106_v56 }
 0x221   :  { %v440_v58 = vpop.f32.mrb[9].mxu0  ;;  %5108 = vmatprep.subr.bf16.mxu1 %v5721_v44  ;;  %5123 = vmatprep.subr.bf16.mxu0 %v5721_v44 }
 0x222   :  { %v5109_v60 = vpack.c.bf16 %v4663_v57, %v440_v58 }
 0x224   :  { %5110 = vmatpush3.bf16.msra.mxu1 %v5109_v60  ;;  %5125 = vmatpush3.bf16.msra.mxu0 %v5109_v60 }
 0x225   :  { %5126 = vmatprep.subr.bf16.mxu0 %v5721_v44  ;;  %798 = vmatprep.subr.bf16.mxu1 %v5451_v59 }
 0x227   :  { %4732 = vmatmul.mubr.msk.f32.vlgmr.msra.gmra.mrb[10].mxu0 %vm458_vm12, %v4204_v61  ;;  %4685 = vmatmul.mubr.msk.f32.vlgmr.msra.gmra.mrb[0].mxu1 %vm458_vm12, %v449_v62 }
 0x228   :  { %5128 = vmatpush3.bf16.msra.mxu0 %v5097_v47  ;;  %4734 = vmatprep.mubr.msk.f32.mxu0 %vm5722_vm11, %v5720_v25 }
 0x229   :  { %5129 = vmatprep.subr.bf16.mxu0 %v5721_v44  ;;  %4687 = vmatprep.mubr.msk.f32.mxu1 %vm5722_vm11, %v5720_v25 }
 0x22a   :  { %799 = vmatpush1.bf16.msra.mxu1 %v5449_v63 }
 0x22b   :  { %4735 = vmatmul.mubr.msk.f32.gmra.mrb[12].mxu0 %vm458_vm12, %v4205_v1  ;;  %4688 = vmatmul.mubr.msk.f32.gmra.mrb[2].mxu1 %vm458_vm12, %v450_v2 }
 0x22c   :  { %5131 = vmatpush3.bf16.msra.mxu0 %v5100_v50  ;;  %4737 = vmatprep.mubr.msk.f32.mxu0 %vm5722_vm11, %v5720_v25 }
 0x22d   :  { %5132 = vmatprep.subr.bf16.mxu0 %v5721_v44  ;;  %4690 = vmatprep.mubr.msk.f32.mxu1 %vm5722_vm11, %v5720_v25 }
 0x22e   :  { %4226 = vmatprep.subr.msk.bf16.mxu1 %vm791_vm13, %v4225_v3 }
 0x22f   :  { %4738 = vmatmul.mubr.msk.f32.gmra.mrb[14].mxu0 %vm458_vm12, %v4206_v6  ;;  %4691 = vmatmul.mubr.msk.f32.gmra.mrb[4].mxu1 %vm458_vm12, %v451_v7 }
 0x230   :  { %5134 = vmatpush3.bf16.msra.mxu0 %v5103_v53  ;;  %4740 = vmatprep.mubr.msk.f32.mxu0 %vm5722_vm11, %v5720_v25  ;;  %v5461_v53 = vld [vmem:[#allocation6 + $0x34] ss:$8 sps:$4 sm:$0xff]  }
 0x231   :  { %5135 = vmatprep.subr.bf16.mxu0 %v5721_v44  ;;  %4693 = vmatprep.mubr.msk.f32.mxu1 %vm5722_vm11, %v5720_v25 }
 0x232   :  { %801 = vmatpush1.bf16.msra.mxu1 %v793_v8 }
 0x233   :  { %4741 = vmatmul.mubr.msk.f32.gmra.mrb[16].mxu0 %vm458_vm12, %v4207_v9  ;;  %4694 = vmatmul.mubr.msk.f32.gmra.mrb[6].mxu1 %vm458_vm12, %v452_v10 }
 0x234   :  { %5137 = vmatpush3.bf16.msra.mxu0 %v5106_v56  ;;  %4743 = vmatprep.mubr.msk.f32.mxu0 %vm5722_vm11, %v5720_v25 }
 0x235   :  { %5138 = vmatprep.subr.bf16.mxu0 %v5721_v44  ;;  %4696 = vmatprep.mubr.msk.f32.mxu1 %vm5722_vm11, %v5720_v25 }
 0x236   :  { %915 = vmatprep.subr.bf16.mxu1 %v5456_v32 }
 0x237   :  { %4744 = vmatmul.mubr.msk.f32.gmra.mrb[18].mxu0 %vm458_vm12, %v4208_v11  ;;  %4697 = vmatmul.mubr.msk.f32.gmra.mrb[8].mxu1 %vm458_vm12, %v453_v12 }
 0x238   :  { %5140 = vmatpush3.bf16.msra.mxu0 %v5109_v60  ;;  %4746 = vmatprep.mubr.msk.f32.mxu0 %vm5722_vm11, %v5720_v25 }
 0x239   :  { %4699 = vmatprep.mubr.msk.f32.mxu1 %vm5722_vm11, %v5720_v25 }
 0x23b   :  { %4747 = vmatmul.mubr.msk.f32.gmra.mrb[20].mxu0 %vm458_vm12, %v4209_v13  ;;  %4700 = vmatmul.mubr.msk.f32.gmra.mrb[10].mxu1 %vm458_vm12, %v454_v14 }
 0x23c   :  { %4749 = vmatprep.mubr.msk.f32.mxu0 %vm5722_vm11, %v5720_v25  ;;  %4702 = vmatprep.mubr.msk.f32.mxu1 %vm5722_vm11, %v5720_v25 }
 0x23f   :  { %4750 = vmatmul.mubr.msk.f32.gmra.mrb[22].mxu0 %vm458_vm12, %v4210_v15  ;;  %4703 = vmatmul.mubr.msk.f32.gmra.mrb[12].mxu1 %vm458_vm12, %v455_v16 }
 0x240   :  { %4752 = vmatprep.mubr.msk.f32.mxu0 %vm5722_vm11, %v5720_v25  ;;  %4705 = vmatprep.mubr.msk.f32.mxu1 %vm5722_vm11, %v5720_v25 }
 0x243   :  { %4753 = vmatmul.mubr.msk.f32.gmra.mrb[24].mxu0 %vm458_vm12, %v4211_v17  ;;  %4706 = vmatmul.mubr.msk.f32.gmra.mrb[14].mxu1 %vm458_vm12, %v456_v18 }
 0x244   :  { %4755 = vmatprep.mubr.msk.f32.mxu0 %vm5722_vm11, %v5720_v25  ;;  %4708 = vmatprep.mubr.msk.f32.mxu1 %vm5722_vm11, %v5720_v25 }
 0x247   :  { %4756 = vmatmul.mubr.msk.f32.gmra.mrb[26].mxu0 %vm458_vm12, %v4212_v19  ;;  %4709 = vmatmul.mubr.msk.f32.gmra.mrb[16].mxu1 %vm458_vm12, %v457_v20 }
 0x248   :  { %4778 = vmatprep.mubr.msk.f32.mxu0 %vm5722_vm11, %v5720_v25  ;;  %830 = vmatprep.mubr.bf16.mxu1 %v5719_v4 }
 0x24b   :  { %4779 = vmatmul.mubr.msk.f32.vlgmr.msra.gmra.mrb[28].mxu0 %vm458_vm12, %v4242_v22 }
 0x24c   :  { %4781 = vmatprep.mubr.msk.f32.mxu0 %vm5722_vm11, %v5720_v25 }
 0x24f   :  { %4782 = vmatmul.mubr.msk.f32.gmra.mrb[30].mxu0 %vm458_vm12, %v4243_v23 }
 0x250   :  { %4784 = vmatprep.mubr.msk.f32.mxu0 %vm5722_vm11, %v5720_v25 }
 0x253   :  { %4785 = vmatmul.mubr.msk.f32.gmra.mrb[32].mxu0 %vm458_vm12, %v4244_v24 }
 0x254   :  { %4787 = vmatprep.mubr.msk.f32.mxu0 %vm5722_vm11, %v5720_v25 }
 0x257   :  { %4788 = vmatmul.mubr.msk.f32.gmra.mrb[34].mxu0 %vm458_vm12, %v4245_v26 }
 0x258   :  { %4790 = vmatprep.mubr.msk.f32.mxu0 %vm5722_vm11, %v5720_v25 }
 0x25b   :  { %4791 = vmatmul.mubr.msk.f32.gmra.mrb[36].mxu0 %vm458_vm12, %v4246_v27 }
 0x25c   :  { %4793 = vmatprep.mubr.msk.f32.mxu0 %vm5722_vm11, %v5720_v25 }
 0x25f   :  { %4794 = vmatmul.mubr.msk.f32.gmra.mrb[38].mxu0 %vm458_vm12, %v4247_v28 }
 0x260   :  { %4796 = vmatprep.mubr.msk.f32.mxu0 %vm5722_vm11, %v5720_v25 }
 0x263   :  { %4797 = vmatmul.mubr.msk.f32.gmra.mrb[40].mxu0 %vm458_vm12, %v4248_v29  ;;  %v1146_v29 = vld [vmem:[#allocation6 + $0x40] sm:$0xff] }
 0x264   :  { %4799 = vmatprep.mubr.msk.f32.mxu0 %vm5722_vm11, %v5720_v25  ;;  %v4263_v32 = vcombine.high %v1146_v29, %v1146_v29 }
 0x267   :  { %4800 = vmatmul.mubr.msk.f32.gmra.mrb[42].mxu0 %vm458_vm12, %v4249_v30  ;;  %v5459_v30 = vld [vmem:[#allocation6 + $0x30] ss:$8 sps:$4 sm:$0xff]  }
 0x268   :  { %4802 = vmatprep.mubr.msk.f32.mxu0 %vm5722_vm11, %v5720_v25 }
 0x26b   :  { %4803 = vmatmul.mubr.msk.f32.gmra.mrb[44].mxu0 %vm458_vm12, %v4250_v31 }
 0x26c   :  { %1420 = vmatprep.mubr.f32.mxu0 %v5720_v25 }
 0x2fa   :  { %v707_v33 = vpop.f32.mrb[10].mxu0  ;;  %v6090_v34 = vpop.f32.mrb[0].mxu1 }
 0x2fb   :  { %v4733_v35 = vpop.f32.mrb[11].mxu0  ;;  %v4686_v36 = vpop.f32.mrb[1].mxu1 }
 0x2fe   :  { %v712_v38 = vpop.f32.mrb[12].mxu0  ;;  %v6092_v40 = vpop.f32.mrb[2].mxu1 }
 0x2ff   :  { %v755_v41 = vpack.c.bf16 %v712_v38, %v707_v33  ;;  %v4736_v42 = vpop.f32.mrb[13].mxu0  ;;  %v599_v46 = vpack.c.bf16 %v6092_v40, %v6090_v34  ;;  %v4689_v47 = vpop.f32.mrb[3].mxu1  ;;  %v4262_v33 = vcombine.low %v1146_v29, %v1146_v29 }
 0x301   :  { %4227 = vmatmul.mubr.msk.bf16.vlgmr.msra.gmra.mrb[20].mxu1 %vm775_vm14, %v755_v41  ;;  %v1183_v37 = vsel %vm791_vm13, %v4262_v33, 0 }
 0x302   :  { %v717_v48 = vpop.f32.mrb[14].mxu0  ;;  %840 = vmatprep.mubr.bf16.mxu1 %v5719_v4  ;;  %916 = vmatpush1.bf16.msra.mxu1 %v5454_v39  ;;  %v6098_v49 = vpop.f32.mrb[4].mxu1 }
 0x303   :  { %v4739_v50 = vpop.f32.mrb[15].mxu0  ;;  %4236 = vmatprep.subr.msk.bf16.mxu1 %vm791_vm13, %v4235_v43  ;;  %v4692_v52 = vpop.f32.mrb[5].mxu1 }
 0x306   :  { %v722_v54 = vpop.f32.mrb[16].mxu0  ;;  %918 = vmatpush1.bf16.msra.mxu1 %v910_v51  ;;  %v6102_v55 = vpop.f32.mrb[6].mxu1 }
 0x307   :  { %v756_v56 = vpack.c.bf16 %v722_v54, %v717_v48  ;;  %v4742_v57 = vpop.f32.mrb[17].mxu0  ;;  %v600_v58 = vpack.c.bf16 %v6102_v55, %v6098_v49  ;;  %v4695_v59 = vpop.f32.mrb[7].mxu1  ;;  %1188 = vmatprep.subr.bf16.mxu1 %v5461_v53  ;;  %v4290_v54 = vld [vmem:[%s5763_s29 + $0xa0] sm:$0xff]  ;;  %v4291_v55 = vld [vmem:[%s5763_s29 + $0xa8] sm:$0xff] }
 0x308   :  { %v5204_v57 = vpack.c.bf16 %v4291_v55, %v4290_v54  ;;  %v4293_v59 = vld [vmem:[%s5763_s29 + $0xb8] sm:$0xff] }
 0x309   :  { %4228 = vmatmul.mubr.msk.bf16.gmra.mrb[24].mxu1 %vm775_vm14, %v756_v56 }
 0x30a   :  { %v727_v60 = vpop.f32.mrb[18].mxu0  ;;  %850 = vmatprep.mubr.bf16.mxu1 %v5719_v4  ;;  %v572_v61 = vpop.f32.mrb[8].mxu1 }
 0x30b   :  { %v4745_v62 = vpop.f32.mrb[19].mxu0  ;;  %v4698_v63 = vpop.f32.mrb[9].mxu1 }
 0x30e   :  { %v732_v0 = vpop.f32.mrb[20].mxu0  ;;  %v577_v1 = vpop.f32.mrb[10].mxu1 }
 0x30f   :  { %v757_v2 = vpack.c.bf16 %v732_v0, %v727_v60  ;;  %v4748_v3 = vpop.f32.mrb[21].mxu0  ;;  %v601_v5 = vpack.c.bf16 %v577_v1, %v572_v61  ;;  %v4701_v6 = vpop.f32.mrb[11].mxu1  ;;  %v4295_v0 = vld [vmem:[%s5763_s29 + $0xc8] sm:$0xff] }
 0x310   :  { %v4297_v3 = vld [vmem:[%s5763_s29 + $0xd8] sm:$0xff]  ;;  %v4298_v6 = vld [vmem:[%s5763_s29 + $0xe0] sm:$0xff] }
 0x311   :  { %4229 = vmatmul.mubr.msk.bf16.gmra.mrb[28].mxu1 %vm775_vm14, %v757_v2  ;;  %v4296_v2 = vld [vmem:[%s5763_s29 + $0xd0] sm:$0xff] }
 0x312   :  { %v737_v7 = vpop.f32.mrb[22].mxu0  ;;  %860 = vmatprep.mubr.bf16.mxu1 %v5719_v4  ;;  %v582_v8 = vpop.f32.mrb[12].mxu1 }
 0x313   :  { %v4751_v9 = vpop.f32.mrb[23].mxu0  ;;  %v4704_v10 = vpop.f32.mrb[13].mxu1 }
 0x314   :  { %v1290_v9 = vshrl.u32 %v237_v21, 7 }
 0x316   :  { %v742_v11 = vpop.f32.mrb[24].mxu0  ;;  %v587_v12 = vpop.f32.mrb[14].mxu1 }
 0x317   :  { %v758_v13 = vpack.c.bf16 %v742_v11, %v737_v7  ;;  %v4754_v14 = vpop.f32.mrb[25].mxu0  ;;  %v602_v15 = vpack.c.bf16 %v587_v12, %v582_v8  ;;  %v4707_v16 = vpop.f32.mrb[15].mxu1  ;;  %v4299_v7 = vld [vmem:[%s5763_s29 + $0xe8] sm:$0xff] }
 0x318   :  { %v5216_v8 = vpack.c.bf16 %v4299_v7, %v4298_v6  ;;  %v1287_v16 = vld [vmem:[#allocation9] sm:$0x3] }
 0x319   :  { %4230 = vmatmul.mubr.msk.bf16.gmra.mrb[32].mxu1 %vm775_vm14, %v758_v13  ;;  %v6157_v13 = vsub.s32 0, %v1290_v9 }
 0x31a   :  { %v747_v17 = vpop.f32.mrb[26].mxu0  ;;  %870 = vmatprep.mubr.bf16.mxu1 %v5719_v4  ;;  %v592_v18 = vpop.f32.mrb[16].mxu1 }
 0x31b   :  { %v4757_v19 = vpop.f32.mrb[27].mxu0  ;;  %v4710_v20 = vpop.f32.mrb[17].mxu1  ;;  %v759_v22 = vpack.c.bf16 %v747_v17, %v747_v17  ;;  %v603_v52 = vpack.c.bf16 %v592_v18, %v592_v18  ;;  %v1295_v17 = vsub.s32 1, %v1290_v9 }
 0x31c   :  { %v6162_v19 = vrot.slane %v1287_v16, %v6157_v13 }
 0x31d   :  { %v6164_v20 = vrot.slane %v1287_v16, %v1295_v17 }
 0x31e   :  { %v1099_v23 = vpop.f32.mrb[28].mxu0 }
 0x31f   :  { %v4780_v24 = vpop.f32.mrb[29].mxu0 }
 0x321   :  { %4231 = vmatmul.mubr.msk.bf16.gmra.mrb[36].mxu1 %vm775_vm14, %v759_v22 }
 0x322   :  { %947 = vmatprep.mubr.bf16.mxu1 %v5719_v4  ;;  %v1104_v26 = vpop.f32.mrb[30].mxu0 }
 0x323   :  { %v1147_v27 = vpack.c.bf16 %v1104_v26, %v1099_v23  ;;  %v4783_v28 = vpop.f32.mrb[31].mxu0 }
 0x326   :  { %v1109_v31 = vpop.f32.mrb[32].mxu0 }
 0x327   :  { %v4786_v35 = vpop.f32.mrb[33].mxu0 }
 0x329   :  { %4237 = vmatmul.mubr.msk.bf16.vlgmr.msra.gmra.mrb[20].mxu1 %vm775_vm14, %v599_v46 }
 0x32a   :  { %957 = vmatprep.mubr.bf16.mxu1 %v5719_v4  ;;  %1189 = vmatpush1.bf16.msra.mxu1 %v5459_v30  ;;  %v1114_v36 = vpop.f32.mrb[34].mxu0 }
 0x32b   :  { %4264 = vmatprep.subr.msk.bf16.mxu1 %vm791_vm13, %v4263_v32  ;;  %v1148_v38 = vpack.c.bf16 %v1114_v36, %v1109_v31  ;;  %v4789_v39 = vpop.f32.mrb[35].mxu0 }
 0x32e   :  { %1191 = vmatpush1.bf16.msra.mxu1 %v1183_v37  ;;  %v1119_v41 = vpop.f32.mrb[36].mxu0 }
 0x32f   :  { %v4792_v42 = vpop.f32.mrb[37].mxu0  ;;  %5203 = vmatprep.subr.bf16.mxu1 %v5721_v44 }
 0x331   :  { %4238 = vmatmul.mubr.msk.bf16.gmra.mrb[24].mxu1 %vm775_vm14, %v600_v58  ;;  %v4292_v58 = vld [vmem:[%s5763_s29 + $0xb0] sm:$0xff] }
 0x332   :  { %967 = vmatprep.mubr.bf16.mxu1 %v5719_v4  ;;  %v1124_v34 = vpop.f32.mrb[38].mxu0  ;;  %v5207_v62 = vpack.c.bf16 %v4293_v59, %v4292_v58 }
 0x333   :  { %v1149_v40 = vpack.c.bf16 %v1124_v34, %v1119_v41  ;;  %v4795_v43 = vpop.f32.mrb[39].mxu0 }
 0x336   :  { %v1129_v45 = vpop.f32.mrb[40].mxu0 }
 0x337   :  { %v4798_v46 = vpop.f32.mrb[41].mxu0 }
 0x339   :  { %4239 = vmatmul.mubr.msk.bf16.gmra.mrb[28].mxu1 %vm775_vm14, %v601_v5  ;;  %v5213_v5 = vpack.c.bf16 %v4297_v3, %v4296_v2 }
 0x33a   :  { %977 = vmatprep.mubr.bf16.mxu1 %v5719_v4  ;;  %v1134_v47 = vpop.f32.mrb[42].mxu0 }
 0x33b   :  { %v1150_v48 = vpack.c.bf16 %v1134_v47, %v1129_v45  ;;  %v4801_v49 = vpop.f32.mrb[43].mxu0 }
 0x33e   :  { %v1139_v50 = vpop.f32.mrb[44].mxu0 }
 0x33f   :  { %v4804_v51 = vpop.f32.mrb[45].mxu0  ;;  %v1151_v53 = vpack.c.bf16 %v1139_v50, %v1139_v50 }
 0x341   :  { %4240 = vmatmul.mubr.msk.bf16.gmra.mrb[32].mxu1 %vm775_vm14, %v602_v15 }
 0x342   :  { %987 = vmatprep.mubr.bf16.mxu1 %v5719_v4 }
 0x349   :  { %4241 = vmatmul.mubr.msk.bf16.gmra.mrb[40].mxu1 %vm775_vm14, %v603_v52 }
 0x34a   :  { %1220 = vmatprep.mubr.bf16.mxu1 %v5719_v4 }
 0x351   :  { %4265 = vmatmul.mubr.msk.bf16.vlgmr.msra.gmra.mrb[20].mxu1 %vm775_vm14, %v1147_v27 }
 0x352   :  { %1230 = vmatprep.mubr.bf16.mxu1 %v5719_v4  ;;  %5205 = vmatpush1.bf16.msra.mxu1 %v5204_v57 }
 0x353   :  { %5206 = vmatprep.subr.bf16.mxu1 %v5721_v44 }
 0x356   :  { %5208 = vmatpush1.bf16.msra.mxu1 %v5207_v62 }
 0x357   :  { %5209 = vmatprep.subr.bf16.mxu1 %v5721_v44 }
 0x359   :  { %4266 = vmatmul.mubr.msk.bf16.gmra.mrb[24].mxu1 %vm775_vm14, %v1148_v38 }
 0x35a   :  { %1240 = vmatprep.mubr.bf16.mxu1 %v5719_v4 }
 0x361   :  { %4267 = vmatmul.mubr.msk.bf16.gmra.mrb[28].mxu1 %vm775_vm14, %v1149_v40 }
 0x362   :  { %1250 = vmatprep.mubr.bf16.mxu1 %v5719_v4 }
 0x369   :  { %4268 = vmatmul.mubr.msk.bf16.gmra.mrb[32].mxu1 %vm775_vm14, %v1150_v48 }
 0x36a   :  { %1260 = vmatprep.mubr.bf16.mxu1 %v5719_v4  ;;  %v4294_v4 = vld [vmem:[%s5763_s29 + $0xc0] sm:$0xff] }
 0x36b   :  { %v5210_v1 = vpack.c.bf16 %v4295_v0, %v4294_v4 }
 0x36d   :  { %5211 = vmatpush1.bf16.msra.mxu1 %v5210_v1 }
 0x36e   :  { %5212 = vmatprep.subr.bf16.mxu1 %v5721_v44 }
 0x371   :  { %4269 = vmatmul.mubr.msk.bf16.gmra.mrb[44].mxu1 %vm775_vm14, %v1151_v53 }
 0x372   :  { %5214 = vmatpush1.bf16.msra.mxu1 %v5213_v5 }
 0x373   :  { %5215 = vmatprep.subr.bf16.mxu1 %v5721_v44 }
 0x376   :  { %5217 = vmatpush1.bf16.msra.mxu1 %v5216_v8 }
 0x377   :  { %5218 = vmatprep.subr.bf16.mxu1 %v5721_v44 }
 0x3f4   :  { %v872_v56 = vpop.f32.mrb[36].mxu1 }
 0x3f5   :  { %v874_v60 = vpop.f32.mrb[37].mxu1 }
 0x3f6   :  { %v876_v61 = vpop.f32.mrb[38].mxu1 }
 0x3f7   :  { %v877_v63 = vpop.f32.mrb[39].mxu1 }
 0x41c   :  { %v989_v10 = vpop.f32.mrb[40].mxu1 }
 0x41d   :  { %v6155_v11 = vadd.f32 %v989_v10, %v872_v56  ;;  %v991_v12 = vpop.f32.mrb[41].mxu1 }
 0x41e   :  { %v6159_v14 = vadd.f32 %v991_v12, %v874_v60  ;;  %v993_v15 = vpop.f32.mrb[42].mxu1 }
 0x41f   :  { %v994_v18 = vpop.f32.mrb[43].mxu1 }
 0x424   :  { %v1222_v22 = vpop.f32.mrb[20].mxu1 }
 0x425   :  { %v1299_v21 = vadd.f32 %v6162_v19, %v1222_v22  ;;  %v1224_v23 = vpop.f32.mrb[21].mxu1 }
 0x426   :  { %v1300_v24 = vadd.f32 %v6164_v20, %v1224_v23  ;;  %v1226_v26 = vpop.f32.mrb[22].mxu1 }
 0x427   :  { %v1301_v27 = vadd.f32 %v6162_v19, %v1226_v26  ;;  %v1228_v28 = vpop.f32.mrb[23].mxu1  ;;  %v1317_v30 = vmax.f32 %v1299_v21, 0.0 }
 0x428   :  { %v1302_v29 = vadd.f32 %v6164_v20, %v1228_v28  ;;  %v1318_v32 = vmax.f32 %v1300_v24, 0.0 }
 0x429   :  { %v1319_v31 = vmax.f32 %v1301_v27, 0.0 }
 0x42a   :  { %v1320_v33 = vmax.f32 %v1302_v29, 0.0 }
 0x42b   :  { %v6170_v35 = vpack.c.bf16 %v1319_v31, %v1317_v30  ;;  %v1335_v31 = vld [vmem:[%s5758_s25] sm:$0xff] }
 0x42c   :  { %v6172_v36 = vpack.c.bf16 %v1320_v33, %v1318_v32  ;;  %v1232_v37 = vpop.f32.mrb[24].mxu1  ;;  %v1577_v32 = vld [vmem:[%s5763_s29] sm:$0xff]  ;;  %v1578_v33 = vld [vmem:[%s5763_s29 + $0x8] sm:$0xff] }
 0x42d   :  { %v1303_v38 = vadd.f32 %v6162_v19, %v1232_v37  ;;  %v1234_v39 = vpop.f32.mrb[25].mxu1  ;;  %v1579_v37 = vld [vmem:[%s5763_s29 + $0x10] sm:$0xff] }
 0x42e   :  { %v1304_v41 = vadd.f32 %v6164_v20, %v1234_v39  ;;  %v1236_v42 = vpop.f32.mrb[26].mxu1  ;;  %5142 = vmatprep.subr.bf16.mxu0 %v6172_v36  ;;  %v4276_v39 = vld [vmem:[%s5758_s25 + $0x30] sm:$0xff] }
 0x42f   :  { %v1305_v34 = vadd.f32 %v6162_v19, %v1236_v42  ;;  %v1238_v40 = vpop.f32.mrb[27].mxu1  ;;  %5144 = vmatpush1.bf16.msra.mxu0 %v6170_v35  ;;  %v1321_v45 = vmax.f32 %v1303_v38, 0.0  ;;  %v1580_v38 = vld [vmem:[%s5763_s29 + $0x18] sm:$0xff]  ;;  %v1581_v42 = vld [vmem:[%s5763_s29 + $0x20] sm:$0xff] }
 0x430   :  { %v1306_v43 = vadd.f32 %v6164_v20, %v1238_v40  ;;  %v1322_v47 = vmax.f32 %v1304_v41, 0.0  ;;  %v5177_v41 = vpack.c.bf16 %v1580_v38, %v1579_v37  ;;  %v4277_v40 = vld [vmem:[%s5758_s25 + $0x38] sm:$0xff] }
 0x431   :  { %v1323_v46 = vmax.f32 %v1305_v34, 0.0  ;;  %v1582_v34 = vld [vmem:[%s5763_s29 + $0x28] sm:$0xff] }
 0x432   :  { %v1324_v48 = vmax.f32 %v1306_v43, 0.0  ;;  %v5180_v43 = vpack.c.bf16 %v1582_v34, %v1581_v42 }
 0x433   :  { %v5147_v49 = vpack.c.bf16 %v1323_v46, %v1321_v45  ;;  %v1583_v45 = vld [vmem:[%s5763_s29 + $0x30] sm:$0xff]  ;;  %v1584_v46 = vld [vmem:[%s5763_s29 + $0x38] sm:$0xff] }
 0x434   :  { %v5145_v50 = vpack.c.bf16 %v1324_v48, %v1322_v47  ;;  %v1242_v51 = vpop.f32.mrb[28].mxu1  ;;  %v4278_v47 = vld [vmem:[%s5758_s25 + $0x40] sm:$0xff]  ;;  %v5183_v48 = vpack.c.bf16 %v1584_v46, %v1583_v45 }
 0x435   :  { %v1307_v52 = vadd.f32 %v6162_v19, %v1242_v51  ;;  %v1244_v53 = vpop.f32.mrb[29].mxu1  ;;  %v4279_v51 = vld [vmem:[%s5758_s25 + $0x48] sm:$0xf] }
 0x436   :  { %v1308_v54 = vadd.f32 %v6164_v20, %v1244_v53  ;;  %v1246_v55 = vpop.f32.mrb[30].mxu1  ;;  %5146 = vmatprep.subr.bf16.mxu0 %v5145_v50  ;;  %v1587_v53 = vld [vmem:[%s5763_s29 + $0x50] sm:$0xff] }
 0x437   :  { %v1309_v56 = vadd.f32 %v6162_v19, %v1246_v55  ;;  %v1248_v57 = vpop.f32.mrb[31].mxu1  ;;  %5148 = vmatpush1.bf16.msra.mxu0 %v5147_v49  ;;  %v1325_v59 = vmax.f32 %v1307_v52, 0.0  ;;  %v4300_v55 = vld [vmem:[%s5763_s29 + $0xf0] sm:$0xff] }
 0x438   :  { %v1310_v58 = vadd.f32 %v6164_v20, %v1248_v57  ;;  %v1326_v61 = vmax.f32 %v1308_v54, 0.0  ;;  %v1588_v54 = vld [vmem:[%s5763_s29 + $0x58] sm:$0xff] }
 0x439   :  { %v1327_v60 = vmax.f32 %v1309_v56, 0.0  ;;  %v5189_v56 = vpack.c.bf16 %v1588_v54, %v1587_v53  ;;  %v4301_v57 = vld [vmem:[%s5763_s29 + $0xf8] sm:$0xff]  ;;  %v1835_v53 = vld [vmem:[%s5768_s3 + $0x8] sm:$0xff] }
 0x43a   :  { %v1328_v62 = vmax.f32 %v1310_v58, 0.0  ;;  %v5219_v58 = vpack.c.bf16 %v4301_v57, %v4300_v55  ;;  %v1836_v55 = vld [vmem:[%s5768_s3 + $0x10] sm:$0xff] }
 0x43b   :  { %v5151_v63 = vpack.c.bf16 %v1327_v60, %v1325_v59  ;;  %v1589_v59 = vld [vmem:[%s5763_s29 + $0x60] sm:$0xff]  ;;  %v1590_v60 = vld [vmem:[%s5763_s29 + $0x68] sm:$0xff] }
 0x43c   :  { %v5149_v4 = vpack.c.bf16 %v1328_v62, %v1326_v61  ;;  %v1252_v0 = vpop.f32.mrb[32].mxu1  ;;  %5220 = vmatpush1.bf16.msra.mxu1 %v5219_v58  ;;  %v4302_v61 = vld [vmem:[%s5763_s29 + $0x100] sm:$0xff]  ;;  %v5192_v62 = vpack.c.bf16 %v1590_v60, %v1589_v59  ;;  %v1839_v59 = vld [vmem:[%s5768_s3 + $0x28] sm:$0xff] }
 0x43d   :  { %v1311_v1 = vadd.f32 %v6162_v19, %v1252_v0  ;;  %v1254_v2 = vpop.f32.mrb[33].mxu1  ;;  %5221 = vmatprep.subr.bf16.mxu1 %v5721_v44  ;;  %v1591_v0 = vld [vmem:[%s5763_s29 + $0x70] sm:$0xff]  ;;  %v1838_v58 = vld [vmem:[%s5768_s3 + $0x20] sm:$0xff] }
 0x43e   :  { %v1312_v3 = vadd.f32 %v6164_v20, %v1254_v2  ;;  %v1256_v5 = vpop.f32.mrb[34].mxu1  ;;  %5150 = vmatprep.subr.bf16.mxu0 %v5149_v4  ;;  %v4304_v2 = vld [vmem:[%s5763_s29 + $0x110] sm:$0xff]  ;;  %v5240_v60 = vpack.c.bf16 %v1839_v59, %v1838_v58 }
 0x43f   :  { %v1313_v6 = vadd.f32 %v6162_v19, %v1256_v5  ;;  %v1258_v7 = vpop.f32.mrb[35].mxu1  ;;  %5152 = vmatpush1.bf16.msra.mxu0 %v5151_v63  ;;  %v1329_v9 = vmax.f32 %v1311_v1, 0.0  ;;  %v1592_v1 = vld [vmem:[%s5763_s29 + $0x78] sm:$0xff] }
 0x440   :  { %v1314_v8 = vadd.f32 %v6164_v20, %v1258_v7  ;;  %v1330_v12 = vmax.f32 %v1312_v3, 0.0  ;;  %v5195_v3 = vpack.c.bf16 %v1592_v1, %v1591_v0  ;;  %v4305_v5 = vld [vmem:[%s5763_s29 + $0x118] sm:$0xff]  ;;  %v1593_v7 = vld [vmem:[%s5763_s29 + $0x80] sm:$0xff]  ;;  %v1843_v0 = vld [vmem:[%s5768_s3 + $0x48] sm:$0xff] }
 0x441   :  { %v1331_v10 = vmax.f32 %v1313_v6, 0.0  ;;  %v5225_v6 = vpack.c.bf16 %v4305_v5, %v4304_v2 }
 0x442   :  { %v1332_v15 = vmax.f32 %v1314_v8, 0.0  ;;  %v1594_v8 = vld [vmem:[%s5763_s29 + $0x88] sm:$0xff] }
 0x443   :  { %v5155_v16 = vpack.c.bf16 %v1331_v10, %v1329_v9  ;;  %v4306_v9 = vld [vmem:[%s5763_s29 + $0x120] sm:$0xff]  ;;  %v5198_v10 = vpack.c.bf16 %v1594_v8, %v1593_v7 }
 0x444   :  { %v5153_v17 = vpack.c.bf16 %v1332_v15, %v1330_v12  ;;  %v1262_v18 = vpop.f32.mrb[44].mxu1  ;;  %v4307_v12 = vld [vmem:[%s5763_s29 + $0x128] sm:$0xff] }
 0x445   :  { %v1285_v22 = vadd.f32 %v1262_v18, %v6155_v11  ;;  %v1264_v21 = vpop.f32.mrb[45].mxu1  ;;  %v1336_v11 = vld [vmem:[%s5758_s25 + $0x8] sm:$0xff]  ;;  %v5228_v15 = vpack.c.bf16 %v4307_v12, %v4306_v9  ;;  %v4308_v18 = vld [vmem:[%s5763_s29 + $0x130] sm:$0xff] }
 0x446   :  { %v1286_v23 = vadd.f32 %v1264_v21, %v6159_v14  ;;  %v1266_v24 = vpop.f32.mrb[46].mxu1  ;;  %5154 = vmatprep.subr.bf16.mxu0 %v5153_v17  ;;  %v1337_v14 = vld [vmem:[%s5758_s25 + $0x10] sm:$0xff]  ;;  %v4309_v21 = vld [vmem:[%s5763_s29 + $0x138] sm:$0xff] }
 0x447   :  { %v1315_v26 = vadd.f32 %v6162_v19, %v1285_v22  ;;  %v1267_v27 = vpop.f32.mrb[47].mxu1  ;;  %5156 = vmatpush1.bf16.msra.mxu0 %v5155_v16  ;;  %v1338_v19 = vld [vmem:[%s5758_s25 + $0x18] sm:$0xff] }
 0x448   :  { %v1316_v28 = vadd.f32 %v6164_v20, %v1286_v23  ;;  %v1339_v20 = vld [vmem:[%s5758_s25 + $0x20] sm:$0xf]  ;;  %v5231_v23 = vpack.c.bf16 %v4309_v21, %v4308_v18 }
 0x449   :  { %v1333_v30 = vmax.f32 %v1315_v26, 0.0 }
 0x44a   :  { %v1334_v29 = vmax.f32 %v1316_v28, 0.0 }
 0x44c   :  { %1372 = vmatprep.subr.mxu0 %v1334_v29 }
 0x44d   :  { %1373 = vmatpush1.msra.mxu0 %v1333_v30 }
 0x44e   :  { %4270 = vmatmul.mubr.msk.f32.vlgmr.msra.gmra.mrb[46].mxu0 %vm1340_vm15, %v1335_v31  ;;  %5158 = vmatprep.subr.bf16.mxu0 %v6172_v36  ;;  %v5174_v36 = vpack.c.bf16 %v1578_v33, %v1577_v32 }
 0x44f   :  { %5160 = vmatpush1.bf16.msra.mxu0 %v6170_v35  ;;  %1426 = vmatprep.mubr.f32.mxu0 %v5720_v25  ;;  %v4275_v35 = vld [vmem:[%s5758_s25 + $0x28] sm:$0xff]  ;;  %s6550_s25 = sld [smem:[#allocation26_spill]] }
 0x450   :  { %5162 = vmatprep.subr.bf16.mxu0 %v5145_v50  ;;  %v1586_v50 = vld [vmem:[%s5763_s29 + $0x48] sm:$0xff] }
 0x452   :  { %4271 = vmatmul.mubr.msk.f32.gmra.mrb[48].mxu0 %vm1340_vm15, %v1336_v11 }
 0x453   :  { %5164 = vmatpush1.bf16.msra.mxu0 %v5147_v49  ;;  %1432 = vmatprep.mubr.f32.mxu0 %v5720_v25  ;;  %v1585_v49 = vld [vmem:[%s5763_s29 + $0x40] sm:$0xff] }
 0x454   :  { %5166 = vmatprep.subr.bf16.mxu0 %v5149_v4  ;;  %v5186_v52 = vpack.c.bf16 %v1586_v50, %v1585_v49 }
 0x456   :  { %4272 = vmatmul.mubr.msk.f32.gmra.mrb[50].mxu0 %vm1340_vm15, %v1337_v14 }
 0x457   :  { %5168 = vmatpush1.bf16.msra.mxu0 %v5151_v63  ;;  %1438 = vmatprep.mubr.f32.mxu0 %v5720_v25  ;;  %v4303_v63 = vld [vmem:[%s5763_s29 + $0x108] sm:$0xff] }
 0x458   :  { %5170 = vmatprep.subr.bf16.mxu0 %v5153_v17  ;;  %v5222_v4 = vpack.c.bf16 %v4303_v63, %v4302_v61  ;;  %v1596_v17 = vld [vmem:[%s5763_s29 + $0x98] sm:$0xff]  ;;  %v1840_v61 = vld [vmem:[%s5768_s3 + $0x30] sm:$0xff] }
 0x45a   :  { %4273 = vmatmul.mubr.msk.f32.gmra.mrb[52].mxu0 %vm1340_vm15, %v1338_v19  ;;  %5223 = vmatpush1.bf16.msra.mxu1 %v5222_v4  ;;  %v1842_v4 = vld [vmem:[%s5768_s3 + $0x40] sm:$0xff] }
 0x45b   :  { %5172 = vmatpush1.bf16.msra.mxu0 %v5155_v16  ;;  %1444 = vmatprep.mubr.f32.mxu0 %v5720_v25  ;;  %v1595_v16 = vld [vmem:[%s5763_s29 + $0x90] sm:$0xff]  ;;  %v5246_v1 = vpack.c.bf16 %v1843_v0, %v1842_v4  ;;  %s6551_s29 = sld [smem:[#allocation28_spill]] }
 0x45c   :  { %1488 = vmatprep.subr.mxu0 %v1334_v29  ;;  %5224 = vmatprep.subr.bf16.mxu1 %v5721_v44  ;;  %v5201_v22 = vpack.c.bf16 %v1596_v17, %v1595_v16 }
 0x45e   :  { %4274 = vmatmul.mubr.msk.f32.gmra.mrb[54].mxu0 %vm1340_vm15, %v1339_v20  ;;  %5226 = vmatpush1.bf16.msra.mxu1 %v5225_v6 }
 0x45f   :  { %1489 = vmatpush1.msra.mxu0 %v1333_v30  ;;  %1536 = vmatprep.mubr.f32.mxu0 %v5720_v25 }
 0x460   :  { %5173 = vmatprep.subr.bf16.mxu0 %v5721_v44  ;;  %5227 = vmatprep.subr.bf16.mxu1 %v5721_v44 }
 0x462   :  { %4280 = vmatmul.mubr.msk.f32.vlgmr.msra.gmra.mrb[56].mxu0 %vm1340_vm15, %v4275_v35  ;;  %5229 = vmatpush1.bf16.msra.mxu1 %v5228_v15 }
 0x463   :  { %1542 = vmatprep.mubr.f32.mxu0 %v5720_v25  ;;  %5175 = vmatpush1.bf16.msra.mxu0 %v5174_v36 }
 0x464   :  { %5176 = vmatprep.subr.bf16.mxu0 %v5721_v44  ;;  %5230 = vmatprep.subr.bf16.mxu1 %v5721_v44 }
 0x466   :  { %4281 = vmatmul.mubr.msk.f32.gmra.mrb[58].mxu0 %vm1340_vm15, %v4276_v39  ;;  %5232 = vmatpush1.bf16.msra.mxu1 %v5231_v23 }
 0x467   :  { %1548 = vmatprep.mubr.f32.mxu0 %v5720_v25  ;;  %5178 = vmatpush1.bf16.msra.mxu0 %v5177_v41 }
 0x468   :  { %5179 = vmatprep.subr.bf16.mxu0 %v5721_v44  ;;  %5248 = vmatprep.subr.bf16.mxu1 %v5721_v44 }
 0x46a   :  { %4282 = vmatmul.mubr.msk.f32.gmra.mrb[60].mxu0 %vm1340_vm15, %v4277_v40 }
 0x46b   :  { %1554 = vmatprep.mubr.f32.mxu0 %v5720_v25  ;;  %5181 = vmatpush1.bf16.msra.mxu0 %v5180_v43 }
 0x46c   :  { %5182 = vmatprep.subr.bf16.mxu0 %v5721_v44 }
 0x46e   :  { %4283 = vmatmul.mubr.msk.f32.gmra.mrb[62].mxu0 %vm1340_vm15, %v4278_v47 }
 0x46f   :  { %1560 = vmatprep.mubr.f32.mxu0 %v5720_v25  ;;  %5184 = vmatpush1.bf16.msra.mxu0 %v5183_v48 }
 0x470   :  { %5185 = vmatprep.subr.bf16.mxu0 %v5721_v44 }
 0x472   :  { %4284 = vmatmul.mubr.msk.f32.gmra.mrb[64].mxu0 %vm1340_vm15, %v4279_v51 }
 0x473   :  { %5187 = vmatpush1.bf16.msra.mxu0 %v5186_v52  ;;  %v1834_v52 = vld [vmem:[%s5768_s3] sm:$0xff] }
 0x474   :  { %5188 = vmatprep.subr.bf16.mxu0 %v5721_v44  ;;  %v5234_v54 = vpack.c.bf16 %v1835_v53, %v1834_v52 }
 0x477   :  { %5190 = vmatpush1.bf16.msra.mxu0 %v5189_v56  ;;  %v1837_v56 = vld [vmem:[%s5768_s3 + $0x18] sm:$0xff] }
 0x478   :  { %5191 = vmatprep.subr.bf16.mxu0 %v5721_v44  ;;  %v5237_v57 = vpack.c.bf16 %v1837_v56, %v1836_v55 }
 0x47b   :  { %5193 = vmatpush1.bf16.msra.mxu0 %v5192_v62  ;;  %v1841_v62 = vld [vmem:[%s5768_s3 + $0x38] sm:$0xff]  ;;  %s6554_s3 = sld [smem:[#allocation29_spill]] }
 0x47c   :  { %5194 = vmatprep.subr.bf16.mxu0 %v5721_v44  ;;  %v5243_v63 = vpack.c.bf16 %v1841_v62, %v1840_v61 }
 0x47f   :  { %5196 = vmatpush1.bf16.msra.mxu0 %v5195_v3 }
 0x480   :  { %5197 = vmatprep.subr.bf16.mxu0 %v5721_v44 }
 0x483   :  { %5199 = vmatpush1.bf16.msra.mxu0 %v5198_v10 }
 0x484   :  { %5200 = vmatprep.subr.bf16.mxu0 %v5721_v44 }
 0x487   :  { %5202 = vmatpush1.bf16.msra.mxu0 %v5201_v22 }
 0x488   :  { %5233 = vmatprep.subr.bf16.mxu0 %v5721_v44 }
 0x521   :  { %v1422_v24 = vpop.f32.mrb[46].mxu0 }
 0x522   :  { %v1424_v26 = vpop.f32.mrb[47].mxu0 }
 0x525   :  { %v1428_v27 = vpop.f32.mrb[48].mxu0 }
 0x526   :  { %v1430_v28 = vpop.f32.mrb[49].mxu0 }
 0x529   :  { %v1434_v29 = vpop.f32.mrb[50].mxu0 }
 0x52a   :  { %v1436_v30 = vpop.f32.mrb[51].mxu0 }
 0x52d   :  { %v1440_v31 = vpop.f32.mrb[52].mxu0 }
 0x52e   :  { %v1442_v11 = vpop.f32.mrb[53].mxu0 }
 0x531   :  { %v1446_v14 = vpop.f32.mrb[54].mxu0 }
 0x532   :  { %v1448_v19 = vpop.f32.mrb[55].mxu0 }
 0x535   :  { %v1538_v20 = vpop.f32.mrb[56].mxu0 }
 0x536   :  { %v1567_v32 = vmax.f32 %v1422_v24, %v1538_v20  ;;  %v1540_v33 = vpop.f32.mrb[57].mxu0 }
 0x537   :  { %v1568_v35 = vmax.f32 %v1424_v26, %v1540_v33 }
 0x539   :  { %v1544_v36 = vpop.f32.mrb[58].mxu0  ;;  %4285 = vmatprep.mubr.msk.f32.mxu0 %vm303_vm0, %v1568_v35  ;;  %4310 = vmatprep.mubr.msk.f32.mxu1 %vm303_vm0, %v1568_v35 }
 0x53a   :  { %v1569_v37 = vmax.f32 %v1428_v27, %v1544_v36  ;;  %v1546_v38 = vpop.f32.mrb[59].mxu0  ;;  %1677 = vmatmul.mubr.f32.vlgmr.msra.gmra.mrb[66].mxu0 %v1567_v32  ;;  %1788 = vmatmul.mubr.f32.vlgmr.msra.gmra.mrb[18].mxu1 %v1567_v32 }
 0x53b   :  { %v1570_v39 = vmax.f32 %v1430_v28, %v1546_v38  ;;  %5235 = vmatpush3.bf16.msra.mxu0 %v5234_v54  ;;  %5250 = vmatpush3.bf16.msra.mxu1 %v5234_v54 }
 0x53c   :  { %5236 = vmatprep.subr.bf16.mxu0 %v5721_v44  ;;  %5251 = vmatprep.subr.bf16.mxu1 %v5721_v44 }
 0x53d   :  { %v1550_v41 = vpop.f32.mrb[60].mxu0  ;;  %4286 = vmatprep.mubr.msk.f32.mxu0 %vm303_vm0, %v1570_v39  ;;  %4311 = vmatprep.mubr.msk.f32.mxu1 %vm303_vm0, %v1570_v39 }
 0x53e   :  { %v1571_v42 = vmax.f32 %v1434_v29, %v1550_v41  ;;  %v1552_v34 = vpop.f32.mrb[61].mxu0  ;;  %1682 = vmatmul.mubr.f32.gmra.mrb[68].mxu0 %v1569_v37  ;;  %1793 = vmatmul.mubr.f32.gmra.mrb[48].mxu1 %v1569_v37 }
 0x53f   :  { %v1572_v40 = vmax.f32 %v1436_v30, %v1552_v34  ;;  %5238 = vmatpush3.bf16.msra.mxu0 %v5237_v57  ;;  %5253 = vmatpush3.bf16.msra.mxu1 %v5237_v57 }
 0x540   :  { %5239 = vmatprep.subr.bf16.mxu0 %v5721_v44  ;;  %5254 = vmatprep.subr.bf16.mxu1 %v5721_v44 }
 0x541   :  { %v1556_v43 = vpop.f32.mrb[62].mxu0  ;;  %4287 = vmatprep.mubr.msk.f32.mxu0 %vm303_vm0, %v1572_v40  ;;  %4312 = vmatprep.mubr.msk.f32.mxu1 %vm303_vm0, %v1572_v40 }
 0x542   :  { %v1573_v45 = vmax.f32 %v1440_v31, %v1556_v43  ;;  %v1558_v46 = vpop.f32.mrb[63].mxu0  ;;  %1687 = vmatmul.mubr.f32.gmra.mrb[70].mxu0 %v1571_v42  ;;  %1798 = vmatmul.mubr.f32.gmra.mrb[50].mxu1 %v1571_v42 }
 0x543   :  { %v1574_v47 = vmax.f32 %v1442_v11, %v1558_v46  ;;  %5241 = vmatpush3.bf16.msra.mxu0 %v5240_v60  ;;  %5256 = vmatpush3.bf16.msra.mxu1 %v5240_v60 }
 0x544   :  { %5242 = vmatprep.subr.bf16.mxu0 %v5721_v44  ;;  %5257 = vmatprep.subr.bf16.mxu1 %v5721_v44 }
 0x545   :  { %v1562_v48 = vpop.f32.mrb[64].mxu0  ;;  %4288 = vmatprep.mubr.msk.f32.mxu0 %vm303_vm0, %v1574_v47  ;;  %4313 = vmatprep.mubr.msk.f32.mxu1 %vm303_vm0, %v1574_v47 }
 0x546   :  { %v1575_v49 = vmax.f32 %v1446_v14, %v1562_v48  ;;  %v1564_v50 = vpop.f32.mrb[65].mxu0  ;;  %1692 = vmatmul.mubr.f32.gmra.mrb[72].mxu0 %v1573_v45  ;;  %1803 = vmatmul.mubr.f32.gmra.mrb[52].mxu1 %v1573_v45 }
 0x547   :  { %v1576_v51 = vmax.f32 %v1448_v19, %v1564_v50  ;;  %5244 = vmatpush3.bf16.msra.mxu0 %v5243_v63  ;;  %5259 = vmatpush3.bf16.msra.mxu1 %v5243_v63 }
 0x548   :  { %5245 = vmatprep.subr.bf16.mxu0 %v5721_v44  ;;  %5260 = vmatprep.subr.bf16.mxu1 %v5721_v44 }
 0x549   :  { %4289 = vmatprep.mubr.msk.f32.mxu0 %vm303_vm0, %v1576_v51  ;;  %4314 = vmatprep.mubr.msk.f32.mxu1 %vm303_vm0, %v1576_v51 }
 0x54a   :  { %1697 = vmatmul.mubr.f32.gmra.mrb[74].mxu0 %v1575_v49  ;;  %1808 = vmatmul.mubr.f32.gmra.mrb[54].mxu1 %v1575_v49 }
 0x54b   :  { %4825 = vmatprep.mubr.msk.f32.mxu0 %vm5722_vm11, %v5720_v25  ;;  %4848 = vmatprep.mubr.msk.f32.mxu1 %vm5722_vm11, %v5720_v25 }
 0x54c   :  { %5247 = vmatpush3.bf16.msra.mxu0 %v5246_v1  ;;  %5262 = vmatpush3.bf16.msra.mxu1 %v5246_v1  ;;  %v2022_v1 = vld [vmem:[#allocation11] sm:$0xff] }
 0x54d   :  { %5263 = vmatprep.subr.bf16.mxu0 %v5721_v44 }
 0x60d   :  { %v1678_v2 = vpop.f32.mrb[66].mxu0  ;;  %v1789_v3 = vpop.f32.mrb[18].mxu1 }
 0x60e   :  { %v6302_v5 = vmax.f32 %v1678_v2, %v1789_v3  ;;  %v1680_v6 = vpop.f32.mrb[67].mxu0  ;;  %v1791_v7 = vpop.f32.mrb[19].mxu1  ;;  %v2023_v2 = vld [vmem:[#allocation11 + $0x8] sm:$0xff] }
 0x60f   :  { %v5264_v3 = vpack.c.bf16 %v2023_v2, %v2022_v1 }
 0x610   :  { %v1917_v24 = vmul.f32 %v6302_v5, %v6302_v5  ;;  %v1818_v30 = vsel %vm458_vm12, %v6302_v5, 0.0 }
 0x611   :  { %v1683_v8 = vpop.f32.mrb[68].mxu0  ;;  %v1794_v9 = vpop.f32.mrb[48].mxu1 }
 0x612   :  { %v6304_v10 = vmax.f32 %v1683_v8, %v1794_v9  ;;  %v1685_v12 = vpop.f32.mrb[69].mxu0  ;;  %v1796_v15 = vpop.f32.mrb[49].mxu1  ;;  %v1922_v33 = vsel %vm458_vm12, %v1917_v24, 0.0 }
 0x614   :  { %v1918_v18 = vmul.f32 %v6304_v10, %v6304_v10  ;;  %v1819_v26 = vsel %vm458_vm12, %v6304_v10, 0.0 }
 0x615   :  { %v1688_v16 = vpop.f32.mrb[70].mxu0  ;;  %v1799_v17 = vpop.f32.mrb[50].mxu1  ;;  %v1820_v32 = vadd.f32 %v1819_v26, %v1818_v30  ;;  %v2019_v26 = vld [vmem:[#allocation14] sm:$0x1] }
 0x616   :  { %v6308_v22 = vmax.f32 %v1688_v16, %v1799_v17  ;;  %v1690_v21 = vpop.f32.mrb[71].mxu0  ;;  %v1801_v23 = vpop.f32.mrb[51].mxu1  ;;  %v1923_v31 = vsel %vm458_vm12, %v1918_v18, 0.0  ;;  %v2189_v30 = vld [vmem:[%s6547_s5] sm:$0xff] }
 0x617   :  { %v1924_v38 = vadd.f32 %v1923_v31, %v1922_v33  ;;  %v2015_v21 = vld [vmem:[#allocation12] sm:$0x1] }
 0x618   :  { %v1919_v27 = vmul.f32 %v6308_v22, %v6308_v22  ;;  %v1821_v11 = vsel %vm458_vm12, %v6308_v22, 0.0 }
 0x619   :  { %v1693_v28 = vpop.f32.mrb[72].mxu0  ;;  %v1804_v29 = vpop.f32.mrb[52].mxu1  ;;  %v1822_v39 = vadd.f32 %v1821_v11, %v1820_v32 }
 0x61a   :  { %v6321_v14 = vmax.f32 %v1693_v28, %v1804_v29  ;;  %v1695_v19 = vpop.f32.mrb[73].mxu0  ;;  %v1806_v20 = vpop.f32.mrb[53].mxu1  ;;  %v1925_v35 = vsel %vm458_vm12, %v1919_v27, 0.0  ;;  %v4324_v29 = vld [vmem:[%s6547_s5 + $0x20] sm:$0xff] }
 0x61b   :  { %v1926_v46 = vadd.f32 %v1925_v35, %v1924_v38 }
 0x61c   :  { %v1823_v36 = vsel %vm458_vm12, %v6321_v14, 0.0  ;;  %v1920_v37 = vmul.f32 %v6321_v14, %v6321_v14 }
 0x61d   :  { %v1698_v41 = vpop.f32.mrb[74].mxu0  ;;  %v1809_v42 = vpop.f32.mrb[54].mxu1  ;;  %v1824_v47 = vadd.f32 %v1823_v36, %v1822_v39 }
 0x61e   :  { %v1927_v34 = vsel %vm458_vm12, %v1920_v37, 0.0  ;;  %v6330_v40 = vmax.f32 %v1698_v41, %v1809_v42  ;;  %v1700_v43 = vpop.f32.mrb[75].mxu0  ;;  %v1811_v45 = vpop.f32.mrb[55].mxu1 }
 0x61f   :  { %v1928_v50 = vadd.f32 %v1927_v34, %v1926_v46 }
 0x620   :  { %v1826_v48 = vsel %vm1825_vm1, %v6330_v40, 0.0  ;;  %v1921_v49 = vmul.f32 %v6330_v40, %v6330_v40 }
 0x621   :  { %v1827_v51 = vadd.f32 %v1826_v48, %v1824_v47  ;;  %v2191_v47 = vld [vmem:[%s6547_s5 + $0x10] sm:$0xff]  ;;  %v4327_v48 = vld [vmem:[%s6547_s5 + $0x38] sm:$0xf] }
 0x622   :  { %v1929_v52 = vsel %vm1825_vm1, %v1921_v49, 0.0  ;;  %v4357_v49 = vld [vmem:[%s6547_s5 + $0x40] sm:$0xff] }
 0x623   :  { %v1828_v53 = vrot.slane %v1827_v51, 4  ;;  %v1930_v54 = vadd.f32 %v1929_v52, %v1928_v50  ;;  %v2192_v50 = vld [vmem:[%s6547_s5 + $0x18] sm:$0xf] }
 0x624   :  { %v5466_v52 = vld [vmem:[%s6548_s9 + $0x38] sm:$0xff]  }
 0x625   :  { %v1829_v55 = vadd.f32 %v1828_v53, %v1827_v51  ;;  %v1931_v56 = vrot.slane %v1930_v54, 4  ;;  %v5465_v51 = vld [vmem:[%s6548_s9 + $0x30] sm:$0xff]   ;;  %v4358_v53 = vld [vmem:[%s6547_s5 + $0x48] sm:$0xff] }
 0x627   :  { %v1830_v57 = vrot.slane %v1829_v55, 2  ;;  %v1932_v58 = vadd.f32 %v1931_v56, %v1930_v54  ;;  %v4359_v54 = vld [vmem:[%s6547_s5 + $0x50] sm:$0xff]  ;;  %v4360_v56 = vld [vmem:[%s6547_s5 + $0x58] sm:$0xf] }
 0x629   :  { %v1831_v59 = vadd.f32 %v1830_v57, %v1829_v55  ;;  %v1933_v60 = vrot.slane %v1932_v58, 2  ;;  %v5467_v55 = vld [vmem:[%s6548_s9 + $0x40] sm:$0xff]   ;;  %v5468_v57 = vld [vmem:[%s6548_s9 + $0x48] sm:$0xff]  }
 0x62b   :  { %v1832_v61 = vrot.slane %v1831_v59, 1  ;;  %v1934_v62 = vadd.f32 %v1933_v60, %v1932_v58  ;;  %v5469_v58 = vld [vmem:[%s6548_s9] sm:$0xff]  }
 0x62d   :  { %v1833_v63 = vadd.f32 %v1832_v61, %v1831_v59  ;;  %v1935_v4 = vrot.slane %v1934_v62, 1 }
 0x62f   :  { %v1936_v0 = vadd.f32 %v1935_v4, %v1934_v62  ;;  %4826 = vmatmul.mubr.msk.f32.vlgmr.msra.gmra.mrb[76].mxu0 %vm458_vm12, %v1833_v63 }
 0x630   :  { %4855 = vmatprep.mubr.msk.f32.mxu0 %vm5722_vm11, %v5720_v25  ;;  %5265 = vmatpush3.bf16.msra.mxu0 %v5264_v3 }
 0x631   :  { %4849 = vmatmul.mubr.msk.f32.vlgmr.msra.gmra.mrb[56].mxu1 %vm458_vm12, %v1936_v0  ;;  %5266 = vmatprep.subr.bf16.mxu0 %v5721_v44 }
 0x632   :  { %4891 = vmatprep.mubr.msk.f32.mxu1 %vm2193_vm3, %v4324_v29  ;;  %v5477_v29 = vld [vmem:[%s6548_s9 + $0x68] sm:$0xff]  }
 0x702   :  { %v1913_v6 = vpop.f32.mrb[76].mxu0 }
 0x703   :  { %v2011_v7 = vmul.f32 0.0055555557, %v1913_v6  ;;  %v4827_v8 = vpop.f32.mrb[77].mxu0 }
 0x704   :  { %v2006_v9 = vpop.f32.mrb[56].mxu1 }
 0x705   :  { %v2013_v12 = vmul.f32 %v2011_v7, %v2011_v7  ;;  %v2012_v15 = vmul.f32 0.0055555557, %v2006_v9  ;;  %v4850_v16 = vpop.f32.mrb[57].mxu1  ;;  %v5471_v9 = vld [vmem:[%s6548_s9 + $0x10] sm:$0xff]  }
 0x707   :  { %v2014_v17 = vsub.f32 %v2012_v15, %v2013_v12 }
 0x709   :  { %v2016_v18 = vadd.f32 1e-05, %v2014_v17  ;;  %v5472_v17 = vld [vmem:[%s6548_s9 + $0x18] sm:$0xff]  }
 0x70b   :  { %5485 = vrsqrt.f32 %v2016_v18 }
 0x715   :  { %v5486_v23 = vpop.eup %5485 }
 0x716   :  { %v2018_v24 = vmul.f32 %v5486_v23, %v2015_v21 }
 0x718   :  { %4856 = vmatmul.mubr.msk.f32.vlgmr.msra.gmra.mrb[78].mxu0 %vm2024_vm2, %v2018_v24  ;;  %v2020_v27 = vmul.f32 %v2018_v24, %v2011_v7  ;;  %v5473_v24 = vld [vmem:[%s6548_s9 + $0x20] sm:$0xff]  }
 0x719   :  { %5268 = vmatpush3.bf16.msra.mxu0 %v5264_v3  ;;  %4862 = vmatprep.mubr.msk.f32.mxu0 %vm5722_vm11, %v5720_v25  ;;  %v5470_v3 = vld [vmem:[%s6548_s9 + $0x8] sm:$0xff]  }
 0x71a   :  { %v2021_v28 = vsub.f32 %v2019_v26, %v2020_v27  ;;  %v5474_v26 = vld [vmem:[%s6548_s9 + $0x50] sm:$0xff]   ;;  %v5475_v27 = vld [vmem:[%s6548_s9 + $0x58] sm:$0xff]  }
 0x71c   :  { %4863 = vmatmul.mubr.msk.f32.vlgmr.msra.gmra.mrb[80].mxu0 %vm2024_vm2, %v2021_v28  ;;  %v5476_v28 = vld [vmem:[%s6548_s9 + $0x60] sm:$0xff]  }
 0x71d   :  { %4875 = vmatprep.mubr.msk.f32.mxu0 %vm2193_vm3, %v2189_v30  ;;  %v5478_v30 = vld [vmem:[%s6548_s9 + $0x70] sm:$0xff]  }
 0x7eb   :  { %v2094_v31 = vpop.f32.mrb[78].mxu0 }
 0x7ec   :  { %v2101_v11 = vrot.slane %v2094_v31, %v6157_v13  ;;  %v4857_v19 = vpop.f32.mrb[79].mxu0  ;;  %v2810_v31 = vld [vmem:[%s6549_s13] sm:$0xff] }
 0x7ee   :  { %v2102_v20 = vmul.f32 %v2101_v11, %v6302_v5  ;;  %v2103_v33 = vmul.f32 %v2101_v11, %v6304_v10  ;;  %v2104_v35 = vmul.f32 %v2101_v11, %v6308_v22  ;;  %v2105_v36 = vmul.f32 %v2101_v11, %v6321_v14  ;;  %v4325_v10 = vld [vmem:[%s6547_s5 + $0x28] sm:$0xff]  ;;  %v4326_v22 = vld [vmem:[%s6547_s5 + $0x30] sm:$0xff] }
 0x7ef   :  { %v2176_v32 = vpop.f32.mrb[80].mxu0  ;;  %v2106_v39 = vmul.f32 %v2101_v11, %v6330_v40  ;;  %v2190_v14 = vld [vmem:[%s6547_s5 + $0x8] sm:$0xff]  ;;  %v4383_v11 = vld [vmem:[%s6550_s25] ss:$0 sm:$0xff] }
 0x7f0   :  { %v2183_v37 = vrot.slane %v2176_v32, %v6157_v13  ;;  %v4864_v38 = vpop.f32.mrb[81].mxu0  ;;  %v5464_v40 = vld [vmem:[%s6548_s9 + $0x28] sm:$0xff]  }
 0x7f2   :  { %v2184_v41 = vadd.f32 %v2183_v37, %v2102_v20  ;;  %v2185_v42 = vadd.f32 %v2183_v37, %v2103_v33  ;;  %v2186_v34 = vadd.f32 %v2183_v37, %v2104_v35  ;;  %v2187_v43 = vadd.f32 %v2183_v37, %v2105_v36 }
 0x7f3   :  { %v2188_v45 = vadd.f32 %v2183_v37, %v2106_v39 }
 0x7f4   :  { %v5269_v5 = vpack.c.bf16 %v2185_v42, %v2184_v41  ;;  %v5273_v46 = vpack.c.bf16 %v2187_v43, %v2186_v34 }
 0x7f6   :  { %5270 = vmatprep.subr.bf16.mxu0 %v5269_v5  ;;  %5278 = vmatprep.subr.bf16.mxu1 %v5269_v5 }
 0x7f7   :  { %5272 = vmatpush3.bf16.msra.mxu0 %v5269_v5  ;;  %5280 = vmatpush3.bf16.msra.mxu1 %v5269_v5 }
 0x7f8   :  { %5274 = vmatprep.subr.bf16.mxu0 %v5273_v46  ;;  %5282 = vmatprep.subr.bf16.mxu1 %v5273_v46 }
 0x7fb   :  { %5276 = vmatpush3.bf16.msra.mxu0 %v5273_v46  ;;  %5284 = vmatpush3.bf16.msra.mxu1 %v5273_v46 }
 0x7fc   :  { %4873 = vmatprep.subr.msk.mxu0 %vm791_vm13, %v2188_v45  ;;  %4889 = vmatprep.subr.msk.mxu1 %vm791_vm13, %v2188_v45 }
 0x7ff   :  { %4874 = vmatpush3.msk.msra.mxu0 %vm791_vm13, %v2188_v45  ;;  %4890 = vmatpush3.msk.msra.mxu1 %vm791_vm13, %v2188_v45 }
 0x800   :  { %4892 = vmatmul.mubr.msk.f32.vlgmr.msra.gmra.mrb[58].mxu1 %vm2193_vm3, %v4325_v10  ;;  %5286 = vmatprep.subr.bf16.mxu1 %v5269_v5  ;;  %v4387_v10 = vld [vmem:[%s6549_s13 + $0x10] sm:$0xff] }
 0x801   :  { %5288 = vmatpush3.bf16.msra.mxu1 %v5269_v5  ;;  %4894 = vmatprep.mubr.msk.f32.mxu1 %vm2193_vm3, %v4326_v22  ;;  %v2983_v22 = vld [vmem:[%s6551_s29] sm:$0xff] }
 0x802   :  { %5290 = vmatprep.subr.bf16.mxu1 %v5273_v46  ;;  %4876 = vmatmul.mubr.msk.f32.vlgmr.msra.gmra.mrb[82].mxu0 %vm2193_vm3, %v2190_v14  ;;  %v2984_v14 = vld [vmem:[%s6551_s29 + $0x8] sm:$0xff] }
 0x803   :  { %4878 = vmatprep.mubr.msk.f32.mxu0 %vm2193_vm3, %v2191_v47  ;;  %4897 = vmatprep.subr.bf16.mxu0 %v5464_v40  ;;  %v2985_v47 = vld [vmem:[%s6551_s29 + $0x10] sm:$0xff] }
 0x804   :  { %4895 = vmatmul.mubr.msk.f32.gmra.mrb[60].mxu1 %vm2193_vm3, %v4327_v48  ;;  %4898 = vmatpush3.bf16.msra.mxu0 %v5464_v40  ;;  %v5313_v40 = vpack.c.bf16 %v2984_v14, %v2983_v22  ;;  %v2986_v48 = vld [vmem:[%s6551_s29 + $0x18] sm:$0xff] }
 0x805   :  { %5292 = vmatpush3.bf16.msra.mxu1 %v5273_v46  ;;  %4935 = vmatprep.mubr.msk.f32.mxu1 %vm2193_vm3, %v4357_v49  ;;  %v2811_v46 = vld [vmem:[%s6549_s13 + $0x8] sm:$0xf]  ;;  %v4388_v49 = vld [vmem:[%s6549_s13 + $0x18] sm:$0xf] }
 0x806   :  { %4933 = vmatprep.subr.msk.mxu1 %vm791_vm13, %v2188_v45  ;;  %4879 = vmatmul.mubr.msk.f32.gmra.mrb[84].mxu0 %vm2193_vm3, %v2192_v50  ;;  %v5317_v50 = vpack.c.bf16 %v2986_v48, %v2985_v47 }
 0x807   :  { %4899 = vmatprep.subr.bf16.mxu0 %v5465_v51 }
 0x808   :  { %4900 = vmatpush3.bf16.msra.mxu0 %v5465_v51  ;;  %v2987_v51 = vld [vmem:[%s6551_s29 + $0x20] sm:$0xff] }
 0x809   :  { %4934 = vmatpush3.msk.msra.mxu1 %vm791_vm13, %v2188_v45  ;;  %4901 = vmatprep.subr.bf16.mxu0 %v5466_v52 }
 0x80a   :  { %4936 = vmatmul.mubr.msk.f32.vlgmr.msra.gmra.mrb[62].mxu1 %vm2193_vm3, %v4358_v53 }
 0x80b   :  { %4938 = vmatprep.mubr.msk.f32.mxu1 %vm2193_vm3, %v4359_v54  ;;  %v4394_v54 = vld [vmem:[%s6551_s29 + $0x30] sm:$0xff] }
 0x80c   :  { %4902 = vmatpush3.bf16.msra.mxu0 %v5466_v52  ;;  %v2988_v52 = vld [vmem:[%s6551_s29 + $0x28] sm:$0xff] }
 0x80d   :  { %4903 = vmatprep.subr.bf16.mxu0 %v5467_v55  ;;  %v5321_v53 = vpack.c.bf16 %v2988_v52, %v2987_v51 }
 0x80e   :  { %4939 = vmatmul.mubr.msk.f32.gmra.mrb[64].mxu1 %vm2193_vm3, %v4360_v56 }
 0x80f   :  { %4963 = vmatprep.mubr.msk.f32.mxu1 %vm2812_vm4, %v2810_v31 }
 0x810   :  { %4904 = vmatpush3.bf16.msra.mxu0 %v5467_v55  ;;  %v4395_v55 = vld [vmem:[%s6551_s29 + $0x38] sm:$0xff] }
 0x811   :  { %4905 = vmatprep.subr.bf16.mxu0 %v5468_v57  ;;  %v5325_v56 = vpack.c.bf16 %v4395_v55, %v4394_v54 }
 0x814   :  { %4906 = vmatpush3.bf16.msra.mxu0 %v5468_v57 }
 0x815   :  { %4911 = vmatprep.subr.bf16.mxu0 %v5469_v58 }
 0x8d3   :  { %v4893_v59 = vpop.f32.mrb[58].mxu1 }
 0x8d4   :  { %v2389_v60 = vpop.f32.mrb[59].mxu1 }
 0x8d5   :  { %v2419_v61 = vpack.c.bf16 %v4893_v59, %v2389_v60  ;;  %v4877_v62 = vpop.f32.mrb[82].mxu0  ;;  %v4396_v60 = vld [vmem:[%s6551_s29 + $0x40] sm:$0xff] }
 0x8d6   :  { %v2275_v63 = vpop.f32.mrb[83].mxu0 }
 0x8d7   :  { %v4896_v4 = vpop.f32.mrb[60].mxu1  ;;  %4907 = vmatprep.mubr.msk.bf16.mxu0 %vm458_vm12, %v2419_v61  ;;  %v2304_v0 = vpack.c.bf16 %v4877_v62, %v2275_v63  ;;  %v4397_v61 = vld [vmem:[%s6551_s29 + $0x48] sm:$0xff] }
 0x8d8   :  { %v2399_v1 = vpop.f32.mrb[61].mxu1 }
 0x8d9   :  { %v2420_v2 = vpack.c.bf16 %v4896_v4, %v2399_v1  ;;  %v4880_v6 = vpop.f32.mrb[84].mxu0  ;;  %v4398_v1 = vld [vmem:[%s6551_s29 + $0x50] sm:$0xff] }
 0x8da   :  { %v2285_v7 = vpop.f32.mrb[85].mxu0 }
 0x8db   :  { %4908 = vmatmul.mubr.msk.bf16.vlgmr.msra.gmra.mrb[88].mxu0 %vm458_vm12, %v2420_v2  ;;  %v2305_v8 = vpack.c.bf16 %v4880_v6, %v2285_v7  ;;  %v4399_v2 = vld [vmem:[%s6551_s29 + $0x58] sm:$0xff]  ;;  %v3165_v6 = vld [vmem:[%s6554_s3] sm:$0xff]  ;;  %v3166_v7 = vld [vmem:[%s6554_s3 + $0x8] sm:$0xff] }
 0x8dc   :  { %4912 = vmatpush3.bf16.msra.mxu0 %v5469_v58  ;;  %4921 = vmatprep.mubr.msk.bf16.mxu0 %vm458_vm12, %v2304_v0  ;;  %v5329_v0 = vpack.c.bf16 %v4397_v61, %v4396_v60 }
 0x8dd   :  { %4913 = vmatprep.subr.bf16.mxu0 %v5470_v3  ;;  %v4937_v12 = vpop.f32.mrb[62].mxu1 }
 0x8de   :  { %v2674_v15 = vpop.f32.mrb[63].mxu1 }
 0x8df   :  { %v2704_v16 = vpack.c.bf16 %v4937_v12, %v2674_v15 }
 0x8e0   :  { %4914 = vmatpush3.bf16.msra.mxu0 %v5470_v3  ;;  %v5333_v3 = vpack.c.bf16 %v4399_v2, %v4398_v1  ;;  %v4408_v2 = vld [vmem:[%s6556_s20 + $0x4] sm:$0xf] }
 0x8e1   :  { %4915 = vmatprep.subr.bf16.mxu0 %v5471_v9  ;;  %v4940_v18 = vpop.f32.mrb[64].mxu1 }
 0x8e2   :  { %v2684_v21 = vpop.f32.mrb[65].mxu1 }
 0x8e3   :  { %v2705_v23 = vpack.c.bf16 %v4940_v18, %v2684_v21 }
 0x8e4   :  { %4916 = vmatpush3.bf16.msra.mxu0 %v5471_v9 }
 0x8e5   :  { %4917 = vmatprep.subr.bf16.mxu0 %v5472_v17 }
 0x8e8   :  { %4918 = vmatpush3.bf16.msra.mxu0 %v5472_v17 }
 0x8e9   :  { %4919 = vmatprep.subr.bf16.mxu0 %v5473_v24 }
 0x8ec   :  { %4920 = vmatpush3.bf16.msra.mxu0 %v5473_v24 }
 0x8ed   :  { %4941 = vmatprep.subr.bf16.mxu0 %v5474_v26 }
 0x8ef   :  { %4922 = vmatmul.mubr.msk.bf16.vlgmr.msra.gmra.mrb[88].mxu0 %vm458_vm12, %v2305_v8  ;;  %v5338_v8 = vpack.c.bf16 %v3166_v7, %v3165_v6  ;;  %v5479_v6 = vld [vmem:[%s6557_s2 + $0x8] sm:$0xff]   ;;  %v5480_v7 = vld [vmem:[%s6557_s2] sm:$0xff]  }
 0x8f0   :  { %4942 = vmatpush3.bf16.msra.mxu0 %v5474_v26  ;;  %4951 = vmatprep.mubr.msk.bf16.mxu0 %vm458_vm12, %v2704_v16 }
 0x8f1   :  { %4943 = vmatprep.subr.bf16.mxu0 %v5475_v27 }
 0x8f4   :  { %4944 = vmatpush3.bf16.msra.mxu0 %v5475_v27 }
 0x8f5   :  { %4945 = vmatprep.subr.bf16.mxu0 %v5476_v28 }
 0x8f8   :  { %4946 = vmatpush3.bf16.msra.mxu0 %v5476_v28 }
 0x8f9   :  { %4947 = vmatprep.subr.bf16.mxu0 %v5477_v29 }
 0x8fc   :  { %4948 = vmatpush3.bf16.msra.mxu0 %v5477_v29 }
 0x8fd   :  { %4949 = vmatprep.subr.bf16.mxu0 %v5478_v30 }
 0x900   :  { %4950 = vmatpush3.bf16.msra.mxu0 %v5478_v30 }
 0x901   :  { %5343 = vmatprep.subr.bf16.mxu0 %v5721_v44 }
 0x903   :  { %4952 = vmatmul.mubr.msk.bf16.vlgmr.msra.gmra.mrb[88].mxu0 %vm458_vm12, %v2705_v23 }
 0x904   :  { %5025 = vmatprep.mubr.msk.f32.mxu0 %vm5722_vm11, %v5720_v25 }
 0x9d6   :  { %v4953_v19 = vpop.f32.mrb[88].mxu0 }
 0x9d7   :  { %v2804_v20 = vadd.f32 %v4953_v19, %v4383_v11  ;;  %v2776_v32 = vpop.f32.mrb[89].mxu0 }
 0x9d8   :  { %v2802_v33 = vadd.f32 %v4383_v11, %v2776_v32  ;;  %v4954_v35 = vpop.f32.mrb[90].mxu0 }
 0x9d9   :  { %v2805_v36 = vadd.f32 %v4954_v35, %v4383_v11  ;;  %v2779_v37 = vpop.f32.mrb[91].mxu0  ;;  %v2808_v39 = vmax.f32 %v2804_v20, 0.0 }
 0x9da   :  { %v2803_v38 = vadd.f32 %v4383_v11, %v2779_v37  ;;  %v2806_v42 = vmax.f32 %v2802_v33, 0.0 }
 0x9db   :  { %v2809_v41 = vmax.f32 %v2805_v36, 0.0 }
 0x9dc   :  { %v2807_v34 = vmax.f32 %v2803_v38, 0.0 }
 0x9dd   :  { %v5297_v43 = vpack.c.bf16 %v2809_v41, %v2808_v39 }
 0x9de   :  { %v5293_v45 = vpack.c.bf16 %v2807_v34, %v2806_v42  ;;  %v3336_v42 = vld [vmem:[#allocation15] sm:$0xff]  ;;  %v3337_v34 = vld [vmem:[#allocation15 + $0x8] sm:$0xff] }
 0x9e0   :  { %5294 = vmatprep.subr.bf16.mxu1 %v5293_v45 }
 0x9e1   :  { %5296 = vmatpush3.bf16.msra.mxu1 %v5293_v45 }
 0x9e2   :  { %5299 = vmatprep.subr.msk.bf16.mxu1 %vm6409_vm6, %v5297_v43 }
 0x9e5   :  { %5302 = vmatpush3.bf16.msk.msra.mxu1 %vm6409_vm6, %v5297_v43 }
 0x9e6   :  { %5304 = vmatprep.subr.bf16.mxu1 %v5293_v45 }
 0x9e8   :  { %4964 = vmatmul.mubr.msk.f32.vlgmr.msra.gmra.mrb[66].mxu1 %vm2812_vm4, %v2811_v46 }
 0x9e9   :  { %5306 = vmatpush3.bf16.msra.mxu1 %v5293_v45  ;;  %4974 = vmatprep.mubr.msk.f32.mxu1 %vm2812_vm4, %v4387_v10 }
 0x9ea   :  { %5309 = vmatprep.subr.msk.bf16.mxu1 %vm6409_vm6, %v5297_v43 }
 0x9ed   :  { %5312 = vmatpush3.bf16.msk.msra.mxu1 %vm6409_vm6, %v5297_v43  ;;  %v5344_v43 = vpack.c.bf16 %v3337_v34, %v3336_v42 }
 0x9ee   :  { %5314 = vmatprep.subr.bf16.mxu1 %v5313_v40 }
 0x9ef   :  { %5345 = vmatpush3.bf16.msra.mxu0 %v5344_v43 }
 0x9f0   :  { %4975 = vmatmul.mubr.msk.f32.vlgmr.msra.gmra.mrb[68].mxu1 %vm2812_vm4, %v4388_v49  ;;  %5349 = vmatprep.subr.bf16.mxu0 %v5721_v44 }
 0x9f1   :  { %5316 = vmatpush3.bf16.msra.mxu1 %v5313_v40 }
 0x9f2   :  { %5318 = vmatprep.subr.bf16.mxu1 %v5317_v50 }
 0x9f5   :  { %5320 = vmatpush3.bf16.msra.mxu1 %v5317_v50  ;;  %v3329_v50 = vld [vmem:[%s6555_s19] sm:$0x1] }
 0x9f6   :  { %5322 = vmatprep.subr.bf16.mxu1 %v5321_v53 }
 0x9f9   :  { %5324 = vmatpush3.bf16.msra.mxu1 %v5321_v53  ;;  %v3333_v53 = vld [vmem:[#allocation17] sm:$0x1] }
 0x9fa   :  { %5326 = vmatprep.subr.bf16.mxu1 %v5325_v56 }
 0xabb   :  { %v4965_v57 = vpop.f32.mrb[66].mxu1 }
 0xabc   :  { %v2888_v58 = vpop.f32.mrb[67].mxu1 }
 0xac3   :  { %v4976_v59 = vpop.f32.mrb[68].mxu1 }
 0xac4   :  { %v2982_v62 = vmax.f32 %v4965_v57, %v4976_v59  ;;  %v2972_v63 = vpop.f32.mrb[69].mxu1 }
 0xac5   :  { %v2981_v4 = vmax.f32 %v2888_v58, %v2972_v63 }
 0xac7   :  { %4989 = vmatprep.mubr.msk.f32.mxu1 %vm2989_vm7, %v2981_v4 }
 0xac8   :  { %4990 = vmatmul.mubr.msk.f32.vlgmr.msra.gmra.mrb[70].mxu1 %vm2989_vm7, %v2982_v62 }
 0xac9   :  { %5328 = vmatpush3.bf16.msra.mxu1 %v5325_v56  ;;  %5004 = vmatprep.mubr.msk.f32.mxu1 %vm2989_vm7, %v2981_v4 }
 0xaca   :  { %5330 = vmatprep.subr.bf16.mxu1 %v5329_v0 }
 0xacd   :  { %5332 = vmatpush3.bf16.msra.mxu1 %v5329_v0 }
 0xace   :  { %5334 = vmatprep.subr.bf16.mxu1 %v5333_v3 }
 0xad1   :  { %5336 = vmatpush3.bf16.msra.mxu1 %v5333_v3  ;;  %v3496_v3 = vld [vmem:[%s6556_s20] sm:$0xf] }
 0xad2   :  { %5337 = vmatprep.subr.bf16.mxu1 %v5721_v44 }
 0xad4   :  { %5005 = vmatmul.mubr.msk.f32.vlgmr.msra.gmra.mrb[72].mxu1 %vm2989_vm7, %v2982_v62 }
 0xad5   :  { %5011 = vmatprep.mubr.msk.f32.mxu1 %vm5722_vm11, %v5720_v25  ;;  %5339 = vmatpush3.bf16.msra.mxu1 %v5338_v8 }
 0xad6   :  { %5340 = vmatprep.subr.bf16.mxu1 %v5721_v44 }
 0xb9b   :  { %v4991_v9 = vpop.f32.mrb[70].mxu1 }
 0xb9c   :  { %v3062_v12 = vpop.f32.mrb[71].mxu1 }
 0xba7   :  { %v5006_v15 = vpop.f32.mrb[72].mxu1 }
 0xba8   :  { %v3154_v16 = vmax.f32 %v4991_v9, %v5006_v15  ;;  %v3144_v17 = vpop.f32.mrb[73].mxu1 }
 0xba9   :  { %v3153_v18 = vmax.f32 %v3062_v12, %v3144_v17 }
 0xbaa   :  { %v3157_v21 = vsel %vm3156_vm8, %v3154_v16, 0.0  ;;  %v3241_v23 = vmul.f32 %v3154_v16, %v3154_v16 }
 0xbab   :  { %v3155_v24 = vsel %vm2024_vm2, %v3153_v18, 0.0  ;;  %v3240_v26 = vmul.f32 %v3153_v18, %v3153_v18 }
 0xbac   :  { %v3243_v27 = vsel %vm3156_vm8, %v3241_v23, 0.0  ;;  %v3158_v28 = vadd.f32 %v3157_v21, %v3155_v24 }
 0xbad   :  { %v3242_v29 = vsel %vm2024_vm2, %v3240_v26, 0.0 }
 0xbae   :  { %v3159_v30 = vrot.slane %v3158_v28, 4  ;;  %v3244_v31 = vadd.f32 %v3243_v27, %v3242_v29 }
 0xbb0   :  { %v3160_v11 = vadd.f32 %v3159_v30, %v3158_v28  ;;  %v3245_v19 = vrot.slane %v3244_v31, 4 }
 0xbb2   :  { %v3161_v20 = vrot.slane %v3160_v11, 2  ;;  %v3246_v32 = vadd.f32 %v3245_v19, %v3244_v31 }
 0xbb4   :  { %v3162_v33 = vadd.f32 %v3161_v20, %v3160_v11  ;;  %v3247_v35 = vrot.slane %v3246_v32, 2 }
 0xbb6   :  { %v3163_v36 = vrot.slane %v3162_v33, 1  ;;  %v3248_v37 = vadd.f32 %v3247_v35, %v3246_v32  ;;  %v4424_v32 = vld [vmem:[%s6558_s7] ss:$0 sm:$0xff] }
 0xbb8   :  { %v3164_v38 = vadd.f32 %v3163_v36, %v3162_v33  ;;  %v3249_v39 = vrot.slane %v3248_v37, 1 }
 0xbba   :  { %5012 = vmatmul.mubr.msk.f32.vlgmr.msra.gmra.mrb[74].mxu1 %vm2024_vm2, %v3164_v38  ;;  %v3250_v41 = vadd.f32 %v3249_v39, %v3248_v37 }
 0xbbb   :  { %5342 = vmatpush3.bf16.msra.mxu1 %v5338_v8  ;;  %5018 = vmatprep.mubr.msk.f32.mxu1 %vm5722_vm11, %v5720_v25 }
 0xbbc   :  { %5346 = vmatprep.subr.bf16.mxu1 %v5721_v44 }
 0xbbe   :  { %5019 = vmatmul.mubr.msk.f32.vlgmr.msra.gmra.mrb[76].mxu1 %vm2024_vm2, %v3250_v41 }
 0xbbf   :  { %5032 = vmatprep.mubr.msk.f32.mxu1 %vm5722_vm11, %v5720_v25  ;;  %5348 = vmatpush3.bf16.msra.mxu1 %v5344_v43  ;;  %v4425_v43 = vld [vmem:[#allocation3] ss:$0 sm:$0xff] }
 0xbc0   :  { %5353 = vmatprep.subr.bf16.mxu1 %v5721_v44 }
 0xc8d   :  { %v3236_v45 = vpop.f32.mrb[74].mxu1 }
 0xc8e   :  { %v3325_v46 = vmul.f32 0.083333336, %v3236_v45  ;;  %v5013_v10 = vpop.f32.mrb[75].mxu1  ;;  %v5482_v45 = vld [vmem:[%s6559_s10] sm:$0xff]  }
 0xc90   :  { %v3327_v14 = vmul.f32 %v3325_v46, %v3325_v46 }
 0xc91   :  { %v3320_v22 = vpop.f32.mrb[76].mxu1 }
 0xc92   :  { %v3326_v40 = vmul.f32 0.083333336, %v3320_v22  ;;  %v5020_v47 = vpop.f32.mrb[77].mxu1 }
 0xc94   :  { %v3328_v48 = vsub.f32 %v3326_v40, %v3327_v14 }
 0xc96   :  { %v3330_v49 = vadd.f32 1e-05, %v3328_v48 }
 0xc98   :  { %5487 = vrsqrt.f32 %v3330_v49 }
 0xca2   :  { %v5488_v51 = vpop.eup %5487 }
 0xca3   :  { %v3332_v52 = vmul.f32 %v5488_v51, %v3329_v50 }
 0xca5   :  { %5026 = vmatmul.mubr.msk.f32.vlgmr.msra.gmra.mrb[86].mxu0 %vm2024_vm2, %v3332_v52  ;;  %v3334_v54 = vmul.f32 %v3332_v52, %v3325_v46 }
 0xca6   :  { %5039 = vmatprep.mubr.msk.f32.mxu0 %vm5722_vm11, %v5720_v25 }
 0xca7   :  { %v3335_v55 = vsub.f32 %v3333_v53, %v3334_v54 }
 0xca9   :  { %5033 = vmatmul.mubr.msk.f32.vlgmr.msra.gmra.mrb[78].mxu1 %vm2024_vm2, %v3335_v55 }
 0xcaa   :  { %5046 = vmatprep.mubr.msk.f32.mxu1 %vm5722_vm11, %v5720_v25 }
 0xd78   :  { %v3407_v56 = vpop.f32.mrb[86].mxu0 }
 0xd79   :  { %v3414_v57 = vrot.slane %v3407_v56, %v6157_v13  ;;  %v5027_v58 = vpop.f32.mrb[87].mxu0 }
 0xd7b   :  { %v3415_v60 = vmul.f32 %v3414_v57, %v3153_v18  ;;  %v3416_v61 = vmul.f32 %v3414_v57, %v3154_v16  ;;  %v5481_v18 = vld [vmem:[%s6557_s2 + $0x10] sm:$0xff]  }
 0xd7c   :  { %v3486_v59 = vpop.f32.mrb[78].mxu1 }
 0xd7d   :  { %v3493_v62 = vrot.slane %v3486_v59, %v6157_v13  ;;  %v5034_v63 = vpop.f32.mrb[79].mxu1 }
 0xd7f   :  { %v3494_v4 = vadd.f32 %v3493_v62, %v3415_v60  ;;  %v3495_v0 = vadd.f32 %v3493_v62, %v3416_v61  ;;  %v3920_v62 = vld [vmem:[#allocation2] sm:$0x1] }
 0xd81   :  { %v5350_v1 = vpack.c.bf16 %v3495_v0, %v3494_v4 }
 0xd83   :  { %5352 = vmatpush3.bf16.msk.msra.mxu0 %vm6409_vm6, %v5350_v1  ;;  %5356 = vmatpush3.bf16.msk.msra.mxu1 %vm6409_vm6, %v5350_v1 }
 0xd84   :  { %5049 = vmatprep.subr.bf16.mxu0 %v5720_v25  ;;  %5055 = vmatprep.subr.bf16.mxu1 %v5720_v25 }
 0xd86   :  { %5047 = vmatmul.mubr.msk.f32.vlgmr.msra.gmra.mrb[80].mxu1 %vm3497_vm9, %v4408_v2  ;;  %5040 = vmatmul.mubr.msk.f32.vlgmr.msra.gmra.mrb[92].mxu0 %vm3497_vm9, %v3496_v3 }
 0xd87   :  { %5050 = vmatpush3.bf16.msra.mxu0 %v5479_v6  ;;  %5051 = vmatprep.mubr.msk.bf16.mxu0 %vm5722_vm11, %v5720_v25 }
 0xd88   :  { %5357 = vmatprep.subr.bf16.mxu0 %v5721_v44  ;;  %5057 = vmatprep.mubr.msk.bf16.mxu1 %vm5722_vm11, %v5720_v25  ;;  %v4417_v44 = vld [vmem:[%s6556_s20 + $0x8] sm:$0xf] }
 0xd89   :  { %5056 = vmatpush3.bf16.msra.mxu1 %v5480_v7 }
 0xd8a   :  { %5068 = vmatprep.subr.bf16.mxu1 %v5720_v25 }
 0xe59   :  { %v3648_v8 = vpop.f32.mrb[80].mxu1  ;;  %v3570_v9 = vpop.f32.mrb[92].mxu0 }
 0xe5a   :  { %v3655_v12 = vpack.c.bf16 %v3648_v8, %v3648_v8  ;;  %v3576_v15 = vpack.c.bf16 %v3570_v9, %v3570_v9  ;;  %v5048_v16 = vpop.f32.mrb[81].mxu1  ;;  %v5041_v17 = vpop.f32.mrb[93].mxu0 }
 0xe5c   :  { %5052 = vmatmul.mubr.msk.bf16.vlgmr.msra.gmra.mrb[96].mxu0 %vm2024_vm2, %v3655_v12  ;;  %5058 = vmatmul.mubr.msk.bf16.vlgmr.msra.gmra.mrb[84].mxu1 %vm2024_vm2, %v3576_v15  ;;  %v4426_v12 = vld [vmem:[%s6560_s11] ss:$0 sm:$0xff] }
 0xe5d   :  { %5360 = vmatpush3.bf16.msk.msra.mxu0 %vm6409_vm6, %v5350_v1  ;;  %5065 = vmatprep.mubr.msk.f32.mxu0 %vm5722_vm11, %v5720_v25  ;;  %v5483_v1 = vld [vmem:[%s6559_s10 + $0x8] sm:$0xff]  }
 0xe5e   :  { %5070 = vmatprep.mubr.msk.bf16.mxu1 %vm5722_vm11, %v5720_v25  ;;  %5074 = vmatprep.subr.bf16.mxu0 %v5720_v25 }
 0xe5f   :  { %5069 = vmatpush3.bf16.msra.mxu1 %v5481_v18 }
 0xe60   :  { %5082 = vmatprep.subr.bf16.mxu1 %v5720_v25 }
 0xe64   :  { %5066 = vmatmul.mubr.msk.f32.vlgmr.msra.gmra.mrb[94].mxu0 %vm3497_vm9, %v4417_v44 }
 0xe65   :  { %5078 = vmatprep.mubr.msk.bf16.mxu0 %vm5722_vm11, %v5720_v25  ;;  %5075 = vmatpush3.bf16.msra.mxu0 %v5482_v45 }
 0xe66   :  { %5076 = vmatprep.subr.bf16.mxu0 %v5720_v25 }
 0xe69   :  { %5077 = vmatpush3.bf16.msra.mxu0 %v5483_v1 }
 0xf2f   :  { %v3699_v5 = vpop.f32.mrb[96].mxu0  ;;  %v3748_v21 = vpop.f32.mrb[84].mxu1 }
 0xf30   :  { %v5053_v23 = vpop.f32.mrb[97].mxu0  ;;  %v3749_v24 = vadd.f32 %v3748_v21, %v3699_v5  ;;  %v5059_v26 = vpop.f32.mrb[85].mxu1 }
 0xf31   :  { %v3702_v27 = vpop.f32.mrb[98].mxu0  ;;  %v3751_v28 = vpop.f32.mrb[86].mxu1  ;;  %v4430_v26 = vld [vmem:[#allocation5] ss:$0 sm:$0xff] }
 0xf32   :  { %v5054_v29 = vpop.f32.mrb[99].mxu0  ;;  %v5060_v30 = vpop.f32.mrb[87].mxu1 }
 0xf37   :  { %v3825_v31 = vpop.f32.mrb[94].mxu0 }
 0xf38   :  { %v3832_v11 = vpack.c.bf16 %v3825_v31, %v3825_v31  ;;  %v5067_v19 = vpop.f32.mrb[95].mxu0 }
 0xf3a   :  { %5071 = vmatmul.mubr.msk.bf16.vlgmr.msra.gmra.mrb[88].mxu1 %vm2024_vm2, %v3832_v11 }
 0xf3b   :  { %5084 = vmatprep.mubr.msk.bf16.mxu1 %vm5722_vm11, %v5720_v25 }
0x100d   :  { %v3876_v20 = vpop.f32.mrb[88].mxu1 }
0x100e   :  { %v3882_v33 = vadd.f32 %v3876_v20, %v3749_v24  ;;  %v5072_v35 = vpop.f32.mrb[89].mxu1 }
0x100f   :  { %v3879_v36 = vpop.f32.mrb[90].mxu1 }
0x1010   :  { %v3890_v37 = vadd.f32 %v4424_v32, %v3882_v33  ;;  %v5073_v38 = vpop.f32.mrb[91].mxu1 }
0x1012   :  { %v3891_v39 = vmax.f32 %v3890_v37, 0.0 }
0x1014   :  { %v3893_v41 = vsel %vm3892_vm10, %v3891_v39, 0.0  ;;  %v3903_v42 = vmul.f32 %v3891_v39, %v3891_v39 }
0x1015   :  { %3894 = vadd.xlane.f32.xlu0 %v3893_v41 }
0x1016   :  { %v3904_v34 = vsel %vm3892_vm10, %v3903_v42, 0.0 }
0x1017   :  { %3905 = vadd.xlane.f32.xlu1 %v3904_v34 }
0x1028   :  { %3941 = vperm.xlu1 %5448, %v4425_v43  }
0x10a2   :  { %v3895_v46 = vpop.xlane.xlu0 %3894 }
0x10a3   :  { %v3896_v10 = vsel %vm791_vm13, %v3895_v46, 0.0 }
0x10a4   :  { %v3897_v22 = vrot.slane %v3896_v10, 4  ;;  %v3906_v14 = vpop.xlane.xlu1 %3905 }
0x10a5   :  { %v3907_v40 = vsel %vm791_vm13, %v3906_v14, 0.0 }
0x10a6   :  { %v3898_v47 = vadd.f32 %v3897_v22, %v3896_v10  ;;  %v3908_v48 = vrot.slane %v3907_v40, 4  ;;  %v4040_v10 = vld [vmem:[#allocation4] sm:$0x1] }
0x10a8   :  { %v3899_v49 = vrot.slane %v3898_v47, 2  ;;  %v3909_v50 = vadd.f32 %v3908_v48, %v3907_v40  ;;  %v3942_v7 = vpop.permute.xlu1 %3941 }
0x10aa   :  { %v3900_v51 = vadd.f32 %v3899_v49, %v3898_v47  ;;  %v3910_v52 = vrot.slane %v3909_v50, 2  ;;  %v5484_v47 = vld [vmem:[%s6561_s14] sm:$0xff]  }
0x10ab   :  { %5083 = vmatpush3.bf16.msra.mxu1 %v5484_v47 }
0x10ac   :  { %v3901_v53 = vrot.slane %v3900_v51, 1  ;;  %v3911_v54 = vadd.f32 %v3910_v52, %v3909_v50 }
0x10ae   :  { %v3902_v55 = vadd.f32 %v3901_v53, %v3900_v51  ;;  %v3912_v56 = vrot.slane %v3911_v54, 1 }
0x10b0   :  { %v3915_v57 = vmul.f32 0.0078125, %v3902_v55  ;;  %v3913_v25 = vadd.f32 %v3912_v56, %v3911_v54  ;;  %v4431_v54 = vld [vmem:[%s6562_s15] ss:$0 sm:$0xff] }
0x10b2   :  { %v3917_v58 = vmul.f32 %v3915_v57, %v3915_v57  ;;  %v3916_v59 = vmul.f32 0.0078125, %v3913_v25  ;;  %v3919_v2 = vsub.f32 %v3891_v39, %v3915_v57 }
0x10b4   :  { %v3918_v60 = vsub.f32 %v3916_v59, %v3917_v58 }
0x10b6   :  { %v3921_v61 = vadd.f32 1e-05, %v3918_v60 }
0x10b8   :  { %5489 = vrsqrt.f32 %v3921_v61 }
0x10c2   :  { %v5490_v63 = vpop.eup %5489 }
0x10c3   :  { %v3923_v4 = vmul.f32 %v5490_v63, %v3920_v62 }
0x10c5   :  { %v3928_v0 = vrot.slane %v3923_v4, %v6157_v13 }
0x10c7   :  { %3930 = vperm.xlu0 %5447, %v3928_v0  }
0x1146   :  { %v3931_v3 = vpop.permute.xlu0 %3930 }
0x1147   :  { %v3933_v6 = vmul.f32 %v3931_v3, %v3919_v2 }
0x1149   :  { %v3944_v8 = vadd.f32 %v3942_v7, %v3933_v6 }
0x114b   :  { %v3949_v9 = vpack.c.bf16 %v3944_v8, %v3944_v8 }
0x114d   :  { %5079 = vmatmul.mubr.msk.bf16.vlgmr.msra.gmra.mrb[100].mxu0 %vm303_vm0, %v3949_v9  ;;  %vm4124_vm0 = vcmask 35840  }
0x1220   :  { %v4006_v15 = vpop.f32.mrb[100].mxu0 }
0x1221   :  { %v4007_v16 = vadd.f32 %v4426_v12, %v4006_v15  ;;  %v5080_v17 = vpop.f32.mrb[101].mxu0 }
0x1222   :  { %v4009_v44 = vpop.f32.mrb[102].mxu0 }
0x1223   :  { %v4012_v18 = vmax.f32 %v4007_v16, 0.0  ;;  %v5081_v5 = vpop.f32.mrb[103].mxu0 }
0x1225   :  { %v4013_v21 = vsel %vm3156_vm8, %v4012_v18, 0.0  ;;  %v4023_v23 = vmul.f32 %v4012_v18, %v4012_v18 }
0x1226   :  { %4014 = vadd.xlane.f32.xlu0 %v4013_v21 }
0x1227   :  { %v4024_v24 = vsel %vm3156_vm8, %v4023_v23, 0.0 }
0x1228   :  { %4025 = vadd.xlane.f32.xlu1 %v4024_v24 }
0x1239   :  { %4061 = vperm.xlu1 %5448, %v4430_v26  }
0x12b3   :  { %v4015_v27 = vpop.xlane.xlu0 %4014 }
0x12b4   :  { %v4016_v28 = vsel %vm791_vm13, %v4015_v27, 0.0 }
0x12b5   :  { %v4017_v29 = vrot.slane %v4016_v28, 4  ;;  %v4026_v30 = vpop.xlane.xlu1 %4025 }
0x12b6   :  { %v4027_v31 = vsel %vm791_vm13, %v4026_v30, 0.0 }
0x12b7   :  { %v4018_v11 = vadd.f32 %v4017_v29, %v4016_v28  ;;  %v4028_v19 = vrot.slane %v4027_v31, 4 }
0x12b9   :  { %v4019_v20 = vrot.slane %v4018_v11, 2  ;;  %v4029_v32 = vadd.f32 %v4028_v19, %v4027_v31  ;;  %v4062_v51 = vpop.permute.xlu1 %4061 }
0x12bb   :  { %v4020_v33 = vadd.f32 %v4019_v20, %v4018_v11  ;;  %v4030_v35 = vrot.slane %v4029_v32, 2 }
0x12bd   :  { %v4021_v36 = vrot.slane %v4020_v33, 1  ;;  %v4031_v37 = vadd.f32 %v4030_v35, %v4029_v32 }
0x12bf   :  { %v4022_v38 = vadd.f32 %v4021_v36, %v4020_v33  ;;  %v4032_v39 = vrot.slane %v4031_v37, 1 }
0x12c1   :  { %v4035_v41 = vmul.f32 0.015625, %v4022_v38  ;;  %v4033_v42 = vadd.f32 %v4032_v39, %v4031_v37 }
0x12c3   :  { %v4037_v34 = vmul.f32 %v4035_v41, %v4035_v41  ;;  %v4036_v43 = vmul.f32 0.015625, %v4033_v42  ;;  %v4039_v48 = vsub.f32 %v4012_v18, %v4035_v41 }
0x12c5   :  { %v4038_v45 = vsub.f32 %v4036_v43, %v4037_v34 }
0x12c7   :  { %v4041_v46 = vadd.f32 1e-05, %v4038_v45 }
0x12c9   :  { %5491 = vrsqrt.f32 %v4041_v46 }
0x12d3   :  { %v5492_v22 = vpop.eup %5491 }
0x12d4   :  { %v4043_v14 = vmul.f32 %v5492_v22, %v4040_v10 }
0x12d6   :  { %v4048_v40 = vrot.slane %v4043_v14, %v6157_v13 }
0x12d8   :  { %4050 = vperm.xlu0 %5447, %v4048_v40  }
0x1357   :  { %v4051_v49 = vpop.permute.xlu0 %4050 }
0x1358   :  { %v4053_v50 = vmul.f32 %v4051_v49, %v4039_v48 }
0x135a   :  { %v4064_v52 = vadd.f32 %v4062_v51, %v4053_v50 }
0x135c   :  { %v4067_v53 = vpack.c.bf16 %v4064_v52, %v4064_v52 }
0x135e   :  { %5085 = vmatmul.mubr.msk.bf16.vlgmr.msra.gmra.mrb[92].mxu1 %vm2024_vm2, %v4067_v53 }
0x1431   :  { %v4118_v55 = vpop.f32.mrb[92].mxu1 }
0x1432   :  { %v4119_v56 = vadd.f32 %v4431_v54, %v4118_v55  ;;  %v5086_v57 = vpop.f32.mrb[93].mxu1 }
0x1433   :  { %v4121_v13 = vpop.f32.mrb[94].mxu1 }
0x1434   :  { %v5087_v25 = vpop.f32.mrb[95].mxu1  ;;  %4125 = vst.msk [vmem:[#allocation18] sm:$0xf] %vm4124_vm0, %v4119_v56 }
0x1435   :  { %5658 = shalt.err (!%p5655_p4)
}
0x1436   :  { %s5659_s30 = scalar_lea.hbm %s5871_s27, 64 }
0x1437   :  { %p5660_p5 = scmp.ne.s32.totalorder %s5871_s27, %s5659_s30  ;;  %p5663_p6 = scmp.lt.u32.totalorder %s5659_s30, %s5871_s27 }
0x1439   :  { %p5665_p7 = pnand %p5663_p6, %p5660_p5 }
0x143b   :  { %5668 = shalt.err (!%p5665_p7)
}
0x143c   :  { %4135 = dma.vmem_to_hbm [thread:$0]  %s4133_s18, 64, %s5871_s27, [#allocation8]  }
0x143d   :  { %5677 = dma.done.wait [#allocation8], 64  }
0x143e   :  { %5678 = vsyncadd [#allocation8], 4294967232 }
0x143f   :  { %4139 = vsyncpa [#allocation7], 1 }
0x1440   :  { %4140 = vsyncpa [#allocation10], 1 }
0x1441   :  { %4141 = vsyncpa [#allocation13], 1 }
0x1442   :  { %4142 = vsyncpa [#allocation16], 1 }
0x1443   :  { %4143 = vsyncpa [#allocation8], 1 }

</bundles_post_ra>
